<compile_context>
chip_gen: v7x
topology: tpu7x:2x2x1
jax: 0.10.0
libtpu: 0.0.40
codegen_flags: <defaults>
</compile_context>

<pallas_src>
import functools

import jax
import jax.numpy as jnp
from jax import lax
from jax.experimental import pallas as pl
from jax.experimental.pallas import tpu as pltpu


# ----------------------------------------------------------------------------
# Pallas kernels
# ----------------------------------------------------------------------------
def _bigru_recurrence(x_ref, wih_ref, whh_f, whh_b, bih_ref, bhn_f, bhn_b,
                      gi_sc, write_step):
    """Fused bidirectional GRU over the full sequence (one layer).

    x_ref   : [S, B, Din]  time-major input (bf16)
    wih_ref : [Din, 6H]    fwd|bwd input->gate weights, pre-transposed (bf16)
    whh_f/b : [H, 3H]      hidden->gate weights, merged (r|z|n) per direction (bf16)
    bih_ref : [1, 6H]      b_ih with b_hh_r / b_hh_z folded in, fwd|bwd (f32)
    bhn_f/b : [1, H]       b_hh_n (must stay inside r * (...)) (f32)
    gi_sc   : VMEM [S, B, 6H] f32 — hoisted input-projection gates (single buffer)
    write_step(t, tb, h_f, h_b): per-step sink for the two hidden states.
    """
    S, B, Din = x_ref.shape
    H = whh_f.shape[0]
    cdt = whh_f.dtype  # bf16 matmul operand dtype

    # ---- hoisted input projection: ONE [S*B,Din] @ [Din,6H] MXU matmul ----
    x2d = x_ref[...].reshape(S * B, Din)
    gi = jnp.dot(x2d, wih_ref[...], preferred_element_type=jnp.float32) + bih_ref[...]
    gi_sc[...] = gi.reshape(S, B, 6 * H)            # single lane-dense store

    # ---- serial recurrence: one merged [B,H] @ [H,3H] matmul per direction ----
    def cell(gi_t, h_prev, whh, bhn, off):
        # NOTE: h_prev is kept f32; only the MXU operand is cast to bf16.
        g = jnp.dot(h_prev.astype(cdt), whh[...],
                    preferred_element_type=jnp.float32)            # [B, 3H]
        r = jax.nn.sigmoid(gi_t[:, off:off + H] + g[:, 0:H])
        z = jax.nn.sigmoid(gi_t[:, off + H:off + 2 * H] + g[:, H:2 * H])
        n = jnp.tanh(gi_t[:, off + 2 * H:off + 3 * H]
                     + r * (g[:, 2 * H:3 * H] + bhn[...]))
        return (1.0 - z) * n + z * h_prev            # PyTorch GRU update

    def step(t, carry):
        h_f, h_b = carry
        tb = S - 1 - t                               # backward-direction time index
        h_f = cell(gi_sc[t], h_f, whh_f, bhn_f, 0)
        h_b = cell(gi_sc[tb], h_b, whh_b, bhn_b, 3 * H)
        write_step(t, tb, h_f, h_b)
        return h_f, h_b

    h0 = jnp.zeros((B, H), jnp.float32)              # matches torch.zeros h0
    # Full unroll only for short sequences; partial unroll keeps LLO scheduling
    # visibility without exploding vreg live ranges at realistic S.
    lax.fori_loop(0, S, step, (h0, h0), unroll=(S if S <= 16 else 8))


def bigru_layer_kernel(x_ref, wih_ref, whh_f, whh_b, bih_ref, bhn_f, bhn_b,
                       out_ref, gi_sc):
    """Intermediate bidirectional GRU layer: writes [S, B, 2H] (bf16) in place."""
    H = whh_f.shape[0]

    def write_step(t, tb, h_f, h_b):
        # Direct per-step writes: no hf/hb scratch slabs, no concat, no extra pass.
        out_ref[t, :, 0:H] = h_f.astype(out_ref.dtype)
        out_ref[tb, :, H:2 * H] = h_b.astype(out_ref.dtype)

    _bigru_recurrence(x_ref, wih_ref, whh_f, whh_b, bih_ref, bhn_f, bhn_b,
                      gi_sc, write_step)


def bigru_fc_layer_kernel(x_ref, wih_ref, whh_f, whh_b, bih_ref, bhn_f, bhn_b,
                          fcw_ref, fcb_ref, out_ref, gi_sc, h_sc):
    """Last bidirectional GRU layer with the Linear head fused as a single-matmul
    epilogue. The [S,B,2H] hidden slab lives only in VMEM (bf16)."""
    H = whh_f.shape[0]

    def write_step(t, tb, h_f, h_b):
        h_sc[t, :, 0:H] = h_f.astype(h_sc.dtype)
        h_sc[tb, :, H:2 * H] = h_b.astype(h_sc.dtype)

    _bigru_recurrence(x_ref, wih_ref, whh_f, whh_b, bih_ref, bhn_f, bhn_b,
                      gi_sc, write_step)

    S, B, _ = h_sc.shape
    O = fcw_ref.shape[1]
    h2d = h_sc[...].reshape(S * B, 2 * H)
    logits = (jnp.dot(h2d, fcw_ref[...], preferred_element_type=jnp.float32)
              + fcb_ref[...])
    out_ref[...] = logits.reshape(S, B, O).astype(out_ref.dtype)


# ----------------------------------------------------------------------------
# Pallas wrapper
# ----------------------------------------------------------------------------
def _vmem_limit_bytes():
    """Per-generation VMEM budget (v5e/v6e: 128 MiB, v7x: 64 MiB) with ~25% headroom
    for double-buffered I/O blocks and compiler scratch."""
    try:
        cap = pltpu.get_tpu_info().vmem_capacity_bytes
    except Exception:  # conservative fallback if the query is unavailable
        cap = 64 * 1024 * 1024
    return int(cap * 3 // 4)


def bigru_layer(x_tm, kp, layer, *, with_fc):
    """One fused bidirectional GRU layer. x_tm: [S, B, Din] (bf16, time-major)."""
    S, B, Din = x_tm.shape
    H = kp[f"whh_l{layer}_f"].shape[0]

    weights = [kp[f"wih_l{layer}"], kp[f"whh_l{layer}_f"], kp[f"whh_l{layer}_b"],
               kp[f"bih_l{layer}"], kp[f"bhn_l{layer}_f"], kp[f"bhn_l{layer}_b"]]

    # Batch rows are independent -> "parallel" grid axis.  At these toy sizes the
    # whole batch fits one block (widest possible per-step hidden matmul); at
    # realistic sizes block_b would be capped (multiple of 8) by the VMEM budget.
    # TODO(synk): on v7x additionally shard the two GRU directions across the two
    # TensorCores (extra parallel grid axis / core_map), gated by chip generation.
    block_b = B
    grid = (pl.cdiv(B, block_b),)

    x_spec = pl.BlockSpec((S, block_b, Din), lambda i: (0, i, 0))
    # All weights are 2D and revisited every grid step (constant block index).
    # TODO(synk): pipeline_mode=pl.Buffered(1) would halve their VMEM footprint
    # once the batch grid has more than one block.
    w_specs = [pl.BlockSpec(w.shape, lambda i: (0, 0)) for w in weights]

    cparams = pltpu.CompilerParams(
        dimension_semantics=("parallel",),
        vmem_limit_bytes=_vmem_limit_bytes(),
    )

    gi_scratch = pltpu.VMEM((S, block_b, 6 * H), jnp.float32)

    if with_fc:
        O = kp["fcw"].shape[1]
        return pl.pallas_call(
            bigru_fc_layer_kernel,
            out_shape=jax.ShapeDtypeStruct((S, B, O), jnp.float32),
            grid=grid,
            in_specs=[x_spec] + w_specs + [
                pl.BlockSpec(kp["fcw"].shape, lambda i: (0, 0)),
                pl.BlockSpec(kp["fcb"].shape, lambda i: (0, 0)),
            ],
            out_specs=pl.BlockSpec((S, block_b, O), lambda i: (0, i, 0)),
            scratch_shapes=[gi_scratch,
                            pltpu.VMEM((S, block_b, 2 * H), jnp.bfloat16)],
            compiler_params=cparams,
        )(x_tm, *weights, kp["fcw"], kp["fcb"])

    return pl.pallas_call(
        bigru_layer_kernel,
        out_shape=jax.ShapeDtypeStruct((S, B, 2 * H), jnp.bfloat16),
        grid=grid,
        in_specs=[x_spec] + w_specs,
        out_specs=pl.BlockSpec((S, block_b, 2 * H), lambda i: (0, i, 0)),
        scratch_shapes=[gi_scratch],
        compiler_params=cparams,
    )(x_tm, *weights)


# ----------------------------------------------------------------------------
# Parameters (deterministic, matching the PyTorch module's shapes)
# ----------------------------------------------------------------------------
def build_params(key, vocab_size, bert_hidden, hidden_size, layer_count, output_size):
    """PyTorch-shaped parameters (same layouts as nn.GRU / nn.Linear)."""
    params = {}
    k_embed, key = jax.random.split(key)
    # BERT stand-in: embedding table -> "last_hidden_state"
    params["embed"] = jax.random.normal(k_embed, (vocab_size, bert_hidden), jnp.float32) * 0.1

    bound = 1.0 / jnp.sqrt(jnp.float32(hidden_size))
    for layer in range(layer_count):
        din = bert_hidden if layer == 0 else 2 * hidden_size
        for direction in ("f", "b"):
            key, k0, k1, k2, k3 = jax.random.split(key, 5)
            params[f"w_ih_l{layer}_{direction}"] = jax.random.uniform(
                k0, (3 * hidden_size, din), jnp.float32, -bound, bound)
            params[f"w_hh_l{layer}_{direction}"] = jax.random.uniform(
                k1, (3 * hidden_size, hidden_size), jnp.float32, -bound, bound)
            params[f"b_ih_l{layer}_{direction}"] = jax.random.uniform(
                k2, (3 * hidden_size,), jnp.float32, -bound, bound)
            params[f"b_hh_l{layer}_{direction}"] = jax.random.uniform(
                k3, (3 * hidden_size,), jnp.float32, -bound, bound)

    key, kw, kb = jax.random.split(key, 3)
    fc_bound = 1.0 / jnp.sqrt(jnp.float32(2 * hidden_size))
    params["fc_w"] = jax.random.uniform(
        kw, (output_size, 2 * hidden_size), jnp.float32, -fc_bound, fc_bound)
    params["fc_b"] = jax.random.uniform(
        kb, (output_size,), jnp.float32, -fc_bound, fc_bound)
    return params


def prepare_kernel_params(p, layer_count, hidden_size):
    """One-time conversion to kernel layout: transposed / direction-fused / bf16
    weights, f32 biases with b_hh_r / b_hh_z folded into the hoisted projection bias."""
    H = hidden_size
    kp = {"embed": p["embed"].astype(jnp.bfloat16)}
    for layer in range(layer_count):
        wih_parts, bih_parts = [], []
        for d in ("f", "b"):
            w_ih = p[f"w_ih_l{layer}_{d}"]            # [3H, Din]
            w_hh = p[f"w_hh_l{layer}_{d}"]            # [3H, H]
            b_ih = p[f"b_ih_l{layer}_{d}"]            # [3H]
            b_hh = p[f"b_hh_l{layer}_{d}"]            # [3H]
            wih_parts.append(jnp.transpose(w_ih))     # [Din, 3H]  (r|z|n)
            bih_parts.append(b_ih + jnp.concatenate(
                [b_hh[0:H], b_hh[H:2 * H], jnp.zeros((H,), b_hh.dtype)]))
            # merged hidden->gate weight: [H, 3H] (r|z|n) per direction
            kp[f"whh_l{layer}_{d}"] = jnp.transpose(w_hh).astype(jnp.bfloat16)
            kp[f"bhn_l{layer}_{d}"] = b_hh[2 * H:3 * H].reshape(1, H).astype(jnp.float32)
        # direction-fused input projection weight / bias: [Din, 6H] / [1, 6H]
        kp[f"wih_l{layer}"] = jnp.concatenate(wih_parts, axis=1).astype(jnp.bfloat16)
        kp[f"bih_l{layer}"] = jnp.concatenate(bih_parts).reshape(1, 6 * H).astype(jnp.float32)
    # fc head: single [2H, O] weight (fwd rows 0:H, bwd rows H:2H) + [1, O] bias
    kp["fcw"] = jnp.transpose(p["fc_w"]).astype(jnp.bfloat16)
    kp["fcb"] = p["fc_b"].reshape(1, -1).astype(jnp.float32)
    return kp


# ----------------------------------------------------------------------------
# Forward pass (mirrors TokenClassificator.forward)
# ----------------------------------------------------------------------------
@functools.partial(jax.jit, static_argnames=("layer_count",))
def token_classificator_forward(input_ids, attention_mask, kparams, layer_count):
    del attention_mask  # TODO(synk): only consumed by the (stubbed) XLM-RoBERTa encoder.

    # "last_hidden_state" stand-in with the batch_first -> time-major transpose
    # folded into the embedding gather: [S, B, Dbert]
    layer_in = kparams["embed"][jnp.transpose(input_ids)]

    for layer in range(layer_count):
        layer_in = bigru_layer(layer_in, kparams, layer,
                               with_fc=(layer == layer_count - 1))

    # [S, B, output_size] (fc fused into last layer) -> batch_first [B, S, output_size]
    return jnp.transpose(layer_in, (1, 0, 2))


# ----------------------------------------------------------------------------
# Main
# ----------------------------------------------------------------------------
if __name__ == "__main__":
    BATCH = 2
    SEQ = 8
    VOCAB = 50
    BERT_HIDDEN = 32     # stand-in for self.bert.encoder.layer[-1].output.dense.out_features
    HIDDEN = 32
    LAYERS = 2
    OUTPUT = 8

    key = jax.random.PRNGKey(0)
    k_ids, k_params = jax.random.split(key)

    input_ids = jax.random.randint(k_ids, (BATCH, SEQ), 0, VOCAB, dtype=jnp.int32)
    attention_mask = jnp.ones((BATCH, SEQ), dtype=jnp.int32)

    params = build_params(k_params, VOCAB, BERT_HIDDEN, HIDDEN, LAYERS, OUTPUT)
    kparams = prepare_kernel_params(params, LAYERS, HIDDEN)   # one-time layout prep

    out = token_classificator_forward(input_ids, attention_mask, kparams, LAYERS)
    out = jax.block_until_ready(out)

    assert out.shape == (BATCH, SEQ, OUTPUT), out.shape
    assert jnp.all(jnp.isfinite(out))
    print("KERNEL_OK")
</pallas_src>

<mosaic_0001>
module attributes {stable_mosaic.version = 11 : i64} {
  func.func @bigru_layer_kernel(%arg0: i32, %arg1: memref<8x2x32xbf16, #tpu.memory_space<vmem>>, %arg2: memref<32x192xbf16, #tpu.memory_space<vmem>>, %arg3: memref<32x96xbf16, #tpu.memory_space<vmem>>, %arg4: memref<32x96xbf16, #tpu.memory_space<vmem>>, %arg5: memref<1x192xf32, #tpu.memory_space<vmem>>, %arg6: memref<1x32xf32, #tpu.memory_space<vmem>>, %arg7: memref<1x32xf32, #tpu.memory_space<vmem>>, %arg8: memref<8x2x64xbf16, #tpu.memory_space<vmem>>, %arg9: memref<8x2x192xf32, #tpu.memory_space<vmem>>) attributes {dimension_semantics = [#tpu.dimension_semantics<parallel>], iteration_bounds = array<i64: 1>, scalar_prefetch = 0 : i64, scratch_operands = 1 : i64, tpu.core_type = #tpu.core_type<tc>, window_params = [{transform_indices = @transform_0, window_bounds = array<i64: 8, 2, 32>}, {pipeline_mode = #tpu.pipeline_mode<synchronous>, transform_indices = @transform_1, window_bounds = array<i64: 32, 192>}, {pipeline_mode = #tpu.pipeline_mode<synchronous>, transform_indices = @transform_2, window_bounds = array<i64: 32, 96>}, {pipeline_mode = #tpu.pipeline_mode<synchronous>, transform_indices = @transform_3, window_bounds = array<i64: 32, 96>}, {pipeline_mode = #tpu.pipeline_mode<synchronous>, transform_indices = @transform_4, window_bounds = array<i64: 1, 192>}, {pipeline_mode = #tpu.pipeline_mode<synchronous>, transform_indices = @transform_5, window_bounds = array<i64: 1, 32>}, {pipeline_mode = #tpu.pipeline_mode<synchronous>, transform_indices = @transform_6, window_bounds = array<i64: 1, 32>}, {transform_indices = @transform_7, window_bounds = array<i64: 8, 2, 64>}]} {
    %c0 = arith.constant 0 : index
    %c0_0 = arith.constant 0 : index
    %c0_1 = arith.constant 0 : index
    %0 = vector.load %arg1[%c0, %c0_0, %c0_1] : memref<8x2x32xbf16, #tpu.memory_space<vmem>>, vector<8x2x32xbf16>
    %1 = vector.shape_cast %0 : vector<8x2x32xbf16> to vector<16x32xbf16>
    %c0_2 = arith.constant 0 : index
    %c0_3 = arith.constant 0 : index
    %2 = vector.load %arg2[%c0_2, %c0_3] : memref<32x192xbf16, #tpu.memory_space<vmem>>, vector<32x192xbf16>
    %cst = arith.constant dense<0.000000e+00> : vector<16x192xf32>
    %3 = tpu.matmul %1, %2, %cst {dimension_numbers = #tpu.dot_dimension_numbers<[1], [0], [0], [1], [0, 0, 1, 1], [], []>} : vector<16x32xbf16>, vector<32x192xbf16>, vector<16x192xf32> -> vector<16x192xf32>
    %c0_4 = arith.constant 0 : index
    %c0_5 = arith.constant 0 : index
    %4 = vector.load %arg5[%c0_4, %c0_5] : memref<1x192xf32, #tpu.memory_space<vmem>>, vector<1x192xf32>
    %5 = vector.broadcast %4 : vector<1x192xf32> to vector<16x192xf32>
    %6 = arith.addf %3, %5 : vector<16x192xf32>
    %7 = vector.shape_cast %6 : vector<16x192xf32> to vector<8x2x192xf32>
    %c0_6 = arith.constant 0 : index
    %c0_7 = arith.constant 0 : index
    %c0_8 = arith.constant 0 : index
    %8 = vector.load %arg9[%c0_6, %c0_7, %c0_8] : memref<8x2x192xf32, #tpu.memory_space<vmem>>, vector<8x2x192xf32>
    tpu.vector_store %arg9[%c0_6, %c0_7, %c0_8], %7 {strides = array<i32>} : memref<8x2x192xf32, #tpu.memory_space<vmem>>, vector<8x2x192xf32>,
    %cst_9 = arith.constant 0.000000e+00 : f32
    %9 = vector.broadcast %cst_9 : f32 to vector<2x32xf32>
    %c0_i32 = arith.constant 0 : i32
    %c7_i32 = arith.constant 7 : i32
    %10 = arith.subi %c7_i32, %c0_i32 : i32
    %11 = arith.index_cast %c0_i32 : i32 to index
    %c0_10 = arith.constant 0 : index
    %c0_11 = arith.constant 0 : index
    %12 = vector.load %arg9[%11, %c0_10, %c0_11] : memref<8x2x192xf32, #tpu.memory_space<vmem>>, vector<1x2x192xf32>
    %13 = vector.shape_cast %12 : vector<1x2x192xf32> to vector<2x192xf32>
    %14 = arith.truncf %9 : vector<2x32xf32> to vector<2x32xbf16>
    %c0_12 = arith.constant 0 : index
    %c0_13 = arith.constant 0 : index
    %15 = vector.load %arg3[%c0_12, %c0_13] : memref<32x96xbf16, #tpu.memory_space<vmem>>, vector<32x96xbf16>
    %cst_14 = arith.constant dense<0.000000e+00> : vector<2x96xf32>
    %16 = tpu.matmul %14, %15, %cst_14 {dimension_numbers = #tpu.dot_dimension_numbers<[1], [0], [0], [1], [0, 0, 1, 1], [], []>} : vector<2x32xbf16>, vector<32x96xbf16>, vector<2x96xf32> -> vector<2x96xf32>
    %17 = vector.extract_strided_slice %13 {offsets = [0, 0], sizes = [2, 32], strides = [1, 1]} : vector<2x192xf32> to vector<2x32xf32>
    %18 = vector.extract_strided_slice %16 {offsets = [0, 0], sizes = [2, 32], strides = [1, 1]} : vector<2x96xf32> to vector<2x32xf32>
    %19 = arith.addf %17, %18 : vector<2x32xf32>
    %20 = arith.negf %19 : vector<2x32xf32>
    %21 = math.exp %20 : vector<2x32xf32>
    %cst_15 = arith.constant 1.000000e+00 : f32
    %22 = vector.broadcast %cst_15 : f32 to vector<2x32xf32>
    %23 = arith.addf %22, %21 : vector<2x32xf32>
    %24 = arith.divf %22, %23 : vector<2x32xf32>
    %25 = vector.extract_strided_slice %13 {offsets = [0, 32], sizes = [2, 32], strides = [1, 1]} : vector<2x192xf32> to vector<2x32xf32>
    %26 = vector.extract_strided_slice %16 {offsets = [0, 32], sizes = [2, 32], strides = [1, 1]} : vector<2x96xf32> to vector<2x32xf32>
    %27 = arith.addf %25, %26 : vector<2x32xf32>
    %28 = arith.negf %27 : vector<2x32xf32>
    %29 = math.exp %28 : vector<2x32xf32>
    %cst_16 = arith.constant 1.000000e+00 : f32
    %30 = vector.broadcast %cst_16 : f32 to vector<2x32xf32>
    %31 = arith.addf %30, %29 : vector<2x32xf32>
    %32 = arith.divf %30, %31 : vector<2x32xf32>
    %33 = vector.extract_strided_slice %13 {offsets = [0, 64], sizes = [2, 32], strides = [1, 1]} : vector<2x192xf32> to vector<2x32xf32>
    %34 = vector.extract_strided_slice %16 {offsets = [0, 64], sizes = [2, 32], strides = [1, 1]} : vector<2x96xf32> to vector<2x32xf32>
    %c0_17 = arith.constant 0 : index
    %c0_18 = arith.constant 0 : index
    %35 = vector.load %arg6[%c0_17, %c0_18] : memref<1x32xf32, #tpu.memory_space<vmem>>, vector<1x32xf32>
    %36 = vector.broadcast %35 : vector<1x32xf32> to vector<2x32xf32>
    %37 = arith.addf %34, %36 : vector<2x32xf32>
    %38 = arith.mulf %24, %37 : vector<2x32xf32>
    %39 = arith.addf %33, %38 : vector<2x32xf32>
    %40 = math.tanh %39 : vector<2x32xf32>
    %cst_19 = arith.constant 1.000000e+00 : f32
    %41 = vector.broadcast %cst_19 : f32 to vector<2x32xf32>
    %42 = arith.subf %41, %32 : vector<2x32xf32>
    %43 = arith.mulf %42, %40 : vector<2x32xf32>
    %44 = arith.mulf %32, %9 : vector<2x32xf32>
    %45 = arith.addf %43, %44 : vector<2x32xf32>
    %46 = arith.index_cast %10 : i32 to index
    %c0_20 = arith.constant 0 : index
    %c0_21 = arith.constant 0 : index
    %47 = vector.load %arg9[%46, %c0_20, %c0_21] : memref<8x2x192xf32, #tpu.memory_space<vmem>>, vector<1x2x192xf32>
    %48 = vector.shape_cast %47 : vector<1x2x192xf32> to vector<2x192xf32>
    %49 = arith.truncf %9 : vector<2x32xf32> to vector<2x32xbf16>
    %c0_22 = arith.constant 0 : index
    %c0_23 = arith.constant 0 : index
    %50 = vector.load %arg4[%c0_22, %c0_23] : memref<32x96xbf16, #tpu.memory_space<vmem>>, vector<32x96xbf16>
    %cst_24 = arith.constant dense<0.000000e+00> : vector<2x96xf32>
    %51 = tpu.matmul %49, %50, %cst_24 {dimension_numbers = #tpu.dot_dimension_numbers<[1], [0], [0], [1], [0, 0, 1, 1], [], []>} : vector<2x32xbf16>, vector<32x96xbf16>, vector<2x96xf32> -> vector<2x96xf32>
    %52 = vector.extract_strided_slice %48 {offsets = [0, 96], sizes = [2, 32], strides = [1, 1]} : vector<2x192xf32> to vector<2x32xf32>
    %53 = vector.extract_strided_slice %51 {offsets = [0, 0], sizes = [2, 32], strides = [1, 1]} : vector<2x96xf32> to vector<2x32xf32>
    %54 = arith.addf %52, %53 : vector<2x32xf32>
    %55 = arith.negf %54 : vector<2x32xf32>
    %56 = math.exp %55 : vector<2x32xf32>
    %cst_25 = arith.constant 1.000000e+00 : f32
    %57 = vector.broadcast %cst_25 : f32 to vector<2x32xf32>
    %58 = arith.addf %57, %56 : vector<2x32xf32>
    %59 = arith.divf %57, %58 : vector<2x32xf32>
    %60 = vector.extract_strided_slice %48 {offsets = [0, 128], sizes = [2, 32], strides = [1, 1]} : vector<2x192xf32> to vector<2x32xf32>
    %61 = vector.extract_strided_slice %51 {offsets = [0, 32], sizes = [2, 32], strides = [1, 1]} : vector<2x96xf32> to vector<2x32xf32>
    %62 = arith.addf %60, %61 : vector<2x32xf32>
    %63 = arith.negf %62 : vector<2x32xf32>
    %64 = math.exp %63 : vector<2x32xf32>
    %cst_26 = arith.constant 1.000000e+00 : f32
    %65 = vector.broadcast %cst_26 : f32 to vector<2x32xf32>
    %66 = arith.addf %65, %64 : vector<2x32xf32>
    %67 = arith.divf %65, %66 : vector<2x32xf32>
    %68 = vector.extract_strided_slice %48 {offsets = [0, 160], sizes = [2, 32], strides = [1, 1]} : vector<2x192xf32> to vector<2x32xf32>
    %69 = vector.extract_strided_slice %51 {offsets = [0, 64], sizes = [2, 32], strides = [1, 1]} : vector<2x96xf32> to vector<2x32xf32>
    %c0_27 = arith.constant 0 : index
    %c0_28 = arith.constant 0 : index
    %70 = vector.load %arg7[%c0_27, %c0_28] : memref<1x32xf32, #tpu.memory_space<vmem>>, vector<1x32xf32>
    %71 = vector.broadcast %70 : vector<1x32xf32> to vector<2x32xf32>
    %72 = arith.addf %69, %71 : vector<2x32xf32>
    %73 = arith.mulf %59, %72 : vector<2x32xf32>
    %74 = arith.addf %68, %73 : vector<2x32xf32>
    %75 = math.tanh %74 : vector<2x32xf32>
    %cst_29 = arith.constant 1.000000e+00 : f32
    %76 = vector.broadcast %cst_29 : f32 to vector<2x32xf32>
    %77 = arith.subf %76, %67 : vector<2x32xf32>
    %78 = arith.mulf %77, %75 : vector<2x32xf32>
    %79 = arith.mulf %67, %9 : vector<2x32xf32>
    %80 = arith.addf %78, %79 : vector<2x32xf32>
    %81 = arith.truncf %45 : vector<2x32xf32> to vector<2x32xbf16>
    %82 = arith.index_cast %c0_i32 : i32 to index
    %c0_30 = arith.constant 0 : index
    %c0_31 = arith.constant 0 : index
    %83 = vector.load %arg8[%82, %c0_30, %c0_31] : memref<8x2x64xbf16, #tpu.memory_space<vmem>>, vector<1x2x32xbf16>
    %84 = vector.shape_cast %83 : vector<1x2x32xbf16> to vector<2x32xbf16>
    %85 = vector.shape_cast %81 : vector<2x32xbf16> to vector<1x2x32xbf16>
    tpu.vector_store %arg8[%82, %c0_30, %c0_31], %85 {strides = array<i32>} : memref<8x2x64xbf16, #tpu.memory_space<vmem>>, vector<1x2x32xbf16>,
    %86 = arith.truncf %80 : vector<2x32xf32> to vector<2x32xbf16>
    %87 = arith.index_cast %10 : i32 to index
    %c0_32 = arith.constant 0 : index
    %c32 = arith.constant 32 : index
    %88 = vector.load %arg8[%87, %c0_32, %c32] : memref<8x2x64xbf16, #tpu.memory_space<vmem>>, vector<1x2x32xbf16>
    %89 = vector.shape_cast %88 : vector<1x2x32xbf16> to vector<2x32xbf16>
    %90 = vector.shape_cast %86 : vector<2x32xbf16> to vector<1x2x32xbf16>
    tpu.vector_store %arg8[%87, %c0_32, %c32], %90 {strides = array<i32>} : memref<8x2x64xbf16, #tpu.memory_space<vmem>>, vector<1x2x32xbf16>,
    %c1_i32 = arith.constant 1 : i32
    %c7_i32_33 = arith.constant 7 : i32
    %91 = arith.subi %c7_i32_33, %c1_i32 : i32
    %92 = arith.index_cast %c1_i32 : i32 to index
    %c0_34 = arith.constant 0 : index
    %c0_35 = arith.constant 0 : index
    %93 = vector.load %arg9[%92, %c0_34, %c0_35] : memref<8x2x192xf32, #tpu.memory_space<vmem>>, vector<1x2x192xf32>
    %94 = vector.shape_cast %93 : vector<1x2x192xf32> to vector<2x192xf32>
    %95 = arith.truncf %45 : vector<2x32xf32> to vector<2x32xbf16>
    %c0_36 = arith.constant 0 : index
    %c0_37 = arith.constant 0 : index
    %96 = vector.load %arg3[%c0_36, %c0_37] : memref<32x96xbf16, #tpu.memory_space<vmem>>, vector<32x96xbf16>
    %cst_38 = arith.constant dense<0.000000e+00> : vector<2x96xf32>
    %97 = tpu.matmul %95, %96, %cst_38 {dimension_numbers = #tpu.dot_dimension_numbers<[1], [0], [0], [1], [0, 0, 1, 1], [], []>} : vector<2x32xbf16>, vector<32x96xbf16>, vector<2x96xf32> -> vector<2x96xf32>
    %98 = vector.extract_strided_slice %94 {offsets = [0, 0], sizes = [2, 32], strides = [1, 1]} : vector<2x192xf32> to vector<2x32xf32>
    %99 = vector.extract_strided_slice %97 {offsets = [0, 0], sizes = [2, 32], strides = [1, 1]} : vector<2x96xf32> to vector<2x32xf32>
    %100 = arith.addf %98, %99 : vector<2x32xf32>
    %101 = arith.negf %100 : vector<2x32xf32>
    %102 = math.exp %101 : vector<2x32xf32>
    %cst_39 = arith.constant 1.000000e+00 : f32
    %103 = vector.broadcast %cst_39 : f32 to vector<2x32xf32>
    %104 = arith.addf %103, %102 : vector<2x32xf32>
    %105 = arith.divf %103, %104 : vector<2x32xf32>
    %106 = vector.extract_strided_slice %94 {offsets = [0, 32], sizes = [2, 32], strides = [1, 1]} : vector<2x192xf32> to vector<2x32xf32>
    %107 = vector.extract_strided_slice %97 {offsets = [0, 32], sizes = [2, 32], strides = [1, 1]} : vector<2x96xf32> to vector<2x32xf32>
    %108 = arith.addf %106, %107 : vector<2x32xf32>
    %109 = arith.negf %108 : vector<2x32xf32>
    %110 = math.exp %109 : vector<2x32xf32>
    %cst_40 = arith.constant 1.000000e+00 : f32
    %111 = vector.broadcast %cst_40 : f32 to vector<2x32xf32>
    %112 = arith.addf %111, %110 : vector<2x32xf32>
    %113 = arith.divf %111, %112 : vector<2x32xf32>
    %114 = vector.extract_strided_slice %94 {offsets = [0, 64], sizes = [2, 32], strides = [1, 1]} : vector<2x192xf32> to vector<2x32xf32>
    %115 = vector.extract_strided_slice %97 {offsets = [0, 64], sizes = [2, 32], strides = [1, 1]} : vector<2x96xf32> to vector<2x32xf32>
    %c0_41 = arith.constant 0 : index
    %c0_42 = arith.constant 0 : index
    %116 = vector.load %arg6[%c0_41, %c0_42] : memref<1x32xf32, #tpu.memory_space<vmem>>, vector<1x32xf32>
    %117 = vector.broadcast %116 : vector<1x32xf32> to vector<2x32xf32>
    %118 = arith.addf %115, %117 : vector<2x32xf32>
    %119 = arith.mulf %105, %118 : vector<2x32xf32>
    %120 = arith.addf %114, %119 : vector<2x32xf32>
    %121 = math.tanh %120 : vector<2x32xf32>
    %cst_43 = arith.constant 1.000000e+00 : f32
    %122 = vector.broadcast %cst_43 : f32 to vector<2x32xf32>
    %123 = arith.subf %122, %113 : vector<2x32xf32>
    %124 = arith.mulf %123, %121 : vector<2x32xf32>
    %125 = arith.mulf %113, %45 : vector<2x32xf32>
    %126 = arith.addf %124, %125 : vector<2x32xf32>
    %127 = arith.index_cast %91 : i32 to index
    %c0_44 = arith.constant 0 : index
    %c0_45 = arith.constant 0 : index
    %128 = vector.load %arg9[%127, %c0_44, %c0_45] : memref<8x2x192xf32, #tpu.memory_space<vmem>>, vector<1x2x192xf32>
    %129 = vector.shape_cast %128 : vector<1x2x192xf32> to vector<2x192xf32>
    %130 = arith.truncf %80 : vector<2x32xf32> to vector<2x32xbf16>
    %c0_46 = arith.constant 0 : index
    %c0_47 = arith.constant 0 : index
    %131 = vector.load %arg4[%c0_46, %c0_47] : memref<32x96xbf16, #tpu.memory_space<vmem>>, vector<32x96xbf16>
    %cst_48 = arith.constant dense<0.000000e+00> : vector<2x96xf32>
    %132 = tpu.matmul %130, %131, %cst_48 {dimension_numbers = #tpu.dot_dimension_numbers<[1], [0], [0], [1], [0, 0, 1, 1], [], []>} : vector<2x32xbf16>, vector<32x96xbf16>, vector<2x96xf32> -> vector<2x96xf32>
    %133 = vector.extract_strided_slice %129 {offsets = [0, 96], sizes = [2, 32], strides = [1, 1]} : vector<2x192xf32> to vector<2x32xf32>
    %134 = vector.extract_strided_slice %132 {offsets = [0, 0], sizes = [2, 32], strides = [1, 1]} : vector<2x96xf32> to vector<2x32xf32>
    %135 = arith.addf %133, %134 : vector<2x32xf32>
    %136 = arith.negf %135 : vector<2x32xf32>
    %137 = math.exp %136 : vector<2x32xf32>
    %cst_49 = arith.constant 1.000000e+00 : f32
    %138 = vector.broadcast %cst_49 : f32 to vector<2x32xf32>
    %139 = arith.addf %138, %137 : vector<2x32xf32>
    %140 = arith.divf %138, %139 : vector<2x32xf32>
    %141 = vector.extract_strided_slice %129 {offsets = [0, 128], sizes = [2, 32], strides = [1, 1]} : vector<2x192xf32> to vector<2x32xf32>
    %142 = vector.extract_strided_slice %132 {offsets = [0, 32], sizes = [2, 32], strides = [1, 1]} : vector<2x96xf32> to vector<2x32xf32>
    %143 = arith.addf %141, %142 : vector<2x32xf32>
    %144 = arith.negf %143 : vector<2x32xf32>
    %145 = math.exp %144 : vector<2x32xf32>
    %cst_50 = arith.constant 1.000000e+00 : f32
    %146 = vector.broadcast %cst_50 : f32 to vector<2x32xf32>
    %147 = arith.addf %146, %145 : vector<2x32xf32>
    %148 = arith.divf %146, %147 : vector<2x32xf32>
    %149 = vector.extract_strided_slice %129 {offsets = [0, 160], sizes = [2, 32], strides = [1, 1]} : vector<2x192xf32> to vector<2x32xf32>
    %150 = vector.extract_strided_slice %132 {offsets = [0, 64], sizes = [2, 32], strides = [1, 1]} : vector<2x96xf32> to vector<2x32xf32>
    %c0_51 = arith.constant 0 : index
    %c0_52 = arith.constant 0 : index
    %151 = vector.load %arg7[%c0_51, %c0_52] : memref<1x32xf32, #tpu.memory_space<vmem>>, vector<1x32xf32>
    %152 = vector.broadcast %151 : vector<1x32xf32> to vector<2x32xf32>
    %153 = arith.addf %150, %152 : vector<2x32xf32>
    %154 = arith.mulf %140, %153 : vector<2x32xf32>
    %155 = arith.addf %149, %154 : vector<2x32xf32>
    %156 = math.tanh %155 : vector<2x32xf32>
    %cst_53 = arith.constant 1.000000e+00 : f32
    %157 = vector.broadcast %cst_53 : f32 to vector<2x32xf32>
    %158 = arith.subf %157, %148 : vector<2x32xf32>
    %159 = arith.mulf %158, %156 : vector<2x32xf32>
    %160 = arith.mulf %148, %80 : vector<2x32xf32>
    %161 = arith.addf %159, %160 : vector<2x32xf32>
    %162 = arith.truncf %126 : vector<2x32xf32> to vector<2x32xbf16>
    %163 = arith.index_cast %c1_i32 : i32 to index
    %c0_54 = arith.constant 0 : index
    %c0_55 = arith.constant 0 : index
    %164 = vector.load %arg8[%163, %c0_54, %c0_55] : memref<8x2x64xbf16, #tpu.memory_space<vmem>>, vector<1x2x32xbf16>
    %165 = vector.shape_cast %164 : vector<1x2x32xbf16> to vector<2x32xbf16>
    %166 = vector.shape_cast %162 : vector<2x32xbf16> to vector<1x2x32xbf16>
    tpu.vector_store %arg8[%163, %c0_54, %c0_55], %166 {strides = array<i32>} : memref<8x2x64xbf16, #tpu.memory_space<vmem>>, vector<1x2x32xbf16>,
    %167 = arith.truncf %161 : vector<2x32xf32> to vector<2x32xbf16>
    %168 = arith.index_cast %91 : i32 to index
    %c0_56 = arith.constant 0 : index
    %c32_57 = arith.constant 32 : index
    %169 = vector.load %arg8[%168, %c0_56, %c32_57] : memref<8x2x64xbf16, #tpu.memory_space<vmem>>, vector<1x2x32xbf16>
    %170 = vector.shape_cast %169 : vector<1x2x32xbf16> to vector<2x32xbf16>
    %171 = vector.shape_cast %167 : vector<2x32xbf16> to vector<1x2x32xbf16>
    tpu.vector_store %arg8[%168, %c0_56, %c32_57], %171 {strides = array<i32>} : memref<8x2x64xbf16, #tpu.memory_space<vmem>>, vector<1x2x32xbf16>,
    %c2_i32 = arith.constant 2 : i32
    %c7_i32_58 = arith.constant 7 : i32
    %172 = arith.subi %c7_i32_58, %c2_i32 : i32
    %173 = arith.index_cast %c2_i32 : i32 to index
    %c0_59 = arith.constant 0 : index
    %c0_60 = arith.constant 0 : index
    %174 = vector.load %arg9[%173, %c0_59, %c0_60] : memref<8x2x192xf32, #tpu.memory_space<vmem>>, vector<1x2x192xf32>
    %175 = vector.shape_cast %174 : vector<1x2x192xf32> to vector<2x192xf32>
    %176 = arith.truncf %126 : vector<2x32xf32> to vector<2x32xbf16>
    %c0_61 = arith.constant 0 : index
    %c0_62 = arith.constant 0 : index
    %177 = vector.load %arg3[%c0_61, %c0_62] : memref<32x96xbf16, #tpu.memory_space<vmem>>, vector<32x96xbf16>
    %cst_63 = arith.constant dense<0.000000e+00> : vector<2x96xf32>
    %178 = tpu.matmul %176, %177, %cst_63 {dimension_numbers = #tpu.dot_dimension_numbers<[1], [0], [0], [1], [0, 0, 1, 1], [], []>} : vector<2x32xbf16>, vector<32x96xbf16>, vector<2x96xf32> -> vector<2x96xf32>
    %179 = vector.extract_strided_slice %175 {offsets = [0, 0], sizes = [2, 32], strides = [1, 1]} : vector<2x192xf32> to vector<2x32xf32>
    %180 = vector.extract_strided_slice %178 {offsets = [0, 0], sizes = [2, 32], strides = [1, 1]} : vector<2x96xf32> to vector<2x32xf32>
    %181 = arith.addf %179, %180 : vector<2x32xf32>
    %182 = arith.negf %181 : vector<2x32xf32>
    %183 = math.exp %182 : vector<2x32xf32>
    %cst_64 = arith.constant 1.000000e+00 : f32
    %184 = vector.broadcast %cst_64 : f32 to vector<2x32xf32>
    %185 = arith.addf %184, %183 : vector<2x32xf32>
    %186 = arith.divf %184, %185 : vector<2x32xf32>
    %187 = vector.extract_strided_slice %175 {offsets = [0, 32], sizes = [2, 32], strides = [1, 1]} : vector<2x192xf32> to vector<2x32xf32>
    %188 = vector.extract_strided_slice %178 {offsets = [0, 32], sizes = [2, 32], strides = [1, 1]} : vector<2x96xf32> to vector<2x32xf32>
    %189 = arith.addf %187, %188 : vector<2x32xf32>
    %190 = arith.negf %189 : vector<2x32xf32>
    %191 = math.exp %190 : vector<2x32xf32>
    %cst_65 = arith.constant 1.000000e+00 : f32
    %192 = vector.broadcast %cst_65 : f32 to vector<2x32xf32>
    %193 = arith.addf %192, %191 : vector<2x32xf32>
    %194 = arith.divf %192, %193 : vector<2x32xf32>
    %195 = vector.extract_strided_slice %175 {offsets = [0, 64], sizes = [2, 32], strides = [1, 1]} : vector<2x192xf32> to vector<2x32xf32>
    %196 = vector.extract_strided_slice %178 {offsets = [0, 64], sizes = [2, 32], strides = [1, 1]} : vector<2x96xf32> to vector<2x32xf32>
    %c0_66 = arith.constant 0 : index
    %c0_67 = arith.constant 0 : index
    %197 = vector.load %arg6[%c0_66, %c0_67] : memref<1x32xf32, #tpu.memory_space<vmem>>, vector<1x32xf32>
    %198 = vector.broadcast %197 : vector<1x32xf32> to vector<2x32xf32>
    %199 = arith.addf %196, %198 : vector<2x32xf32>
    %200 = arith.mulf %186, %199 : vector<2x32xf32>
    %201 = arith.addf %195, %200 : vector<2x32xf32>
    %202 = math.tanh %201 : vector<2x32xf32>
    %cst_68 = arith.constant 1.000000e+00 : f32
    %203 = vector.broadcast %cst_68 : f32 to vector<2x32xf32>
    %204 = arith.subf %203, %194 : vector<2x32xf32>
    %205 = arith.mulf %204, %202 : vector<2x32xf32>
    %206 = arith.mulf %194, %126 : vector<2x32xf32>
    %207 = arith.addf %205, %206 : vector<2x32xf32>
    %208 = arith.index_cast %172 : i32 to index
    %c0_69 = arith.constant 0 : index
    %c0_70 = arith.constant 0 : index
    %209 = vector.load %arg9[%208, %c0_69, %c0_70] : memref<8x2x192xf32, #tpu.memory_space<vmem>>, vector<1x2x192xf32>
    %210 = vector.shape_cast %209 : vector<1x2x192xf32> to vector<2x192xf32>
    %211 = arith.truncf %161 : vector<2x32xf32> to vector<2x32xbf16>
    %c0_71 = arith.constant 0 : index
    %c0_72 = arith.constant 0 : index
    %212 = vector.load %arg4[%c0_71, %c0_72] : memref<32x96xbf16, #tpu.memory_space<vmem>>, vector<32x96xbf16>
    %cst_73 = arith.constant dense<0.000000e+00> : vector<2x96xf32>
    %213 = tpu.matmul %211, %212, %cst_73 {dimension_numbers = #tpu.dot_dimension_numbers<[1], [0], [0], [1], [0, 0, 1, 1], [], []>} : vector<2x32xbf16>, vector<32x96xbf16>, vector<2x96xf32> -> vector<2x96xf32>
    %214 = vector.extract_strided_slice %210 {offsets = [0, 96], sizes = [2, 32], strides = [1, 1]} : vector<2x192xf32> to vector<2x32xf32>
    %215 = vector.extract_strided_slice %213 {offsets = [0, 0], sizes = [2, 32], strides = [1, 1]} : vector<2x96xf32> to vector<2x32xf32>
    %216 = arith.addf %214, %215 : vector<2x32xf32>
    %217 = arith.negf %216 : vector<2x32xf32>
    %218 = math.exp %217 : vector<2x32xf32>
    %cst_74 = arith.constant 1.000000e+00 : f32
    %219 = vector.broadcast %cst_74 : f32 to vector<2x32xf32>
    %220 = arith.addf %219, %218 : vector<2x32xf32>
    %221 = arith.divf %219, %220 : vector<2x32xf32>
    %222 = vector.extract_strided_slice %210 {offsets = [0, 128], sizes = [2, 32], strides = [1, 1]} : vector<2x192xf32> to vector<2x32xf32>
    %223 = vector.extract_strided_slice %213 {offsets = [0, 32], sizes = [2, 32], strides = [1, 1]} : vector<2x96xf32> to vector<2x32xf32>
    %224 = arith.addf %222, %223 : vector<2x32xf32>
    %225 = arith.negf %224 : vector<2x32xf32>
    %226 = math.exp %225 : vector<2x32xf32>
    %cst_75 = arith.constant 1.000000e+00 : f32
    %227 = vector.broadcast %cst_75 : f32 to vector<2x32xf32>
    %228 = arith.addf %227, %226 : vector<2x32xf32>
    %229 = arith.divf %227, %228 : vector<2x32xf32>
    %230 = vector.extract_strided_slice %210 {offsets = [0, 160], sizes = [2, 32], strides = [1, 1]} : vector<2x192xf32> to vector<2x32xf32>
    %231 = vector.extract_strided_slice %213 {offsets = [0, 64], sizes = [2, 32], strides = [1, 1]} : vector<2x96xf32> to vector<2x32xf32>
    %c0_76 = arith.constant 0 : index
    %c0_77 = arith.constant 0 : index
    %232 = vector.load %arg7[%c0_76, %c0_77] : memref<1x32xf32, #tpu.memory_space<vmem>>, vector<1x32xf32>
    %233 = vector.broadcast %232 : vector<1x32xf32> to vector<2x32xf32>
    %234 = arith.addf %231, %233 : vector<2x32xf32>
    %235 = arith.mulf %221, %234 : vector<2x32xf32>
    %236 = arith.addf %230, %235 : vector<2x32xf32>
    %237 = math.tanh %236 : vector<2x32xf32>
    %cst_78 = arith.constant 1.000000e+00 : f32
    %238 = vector.broadcast %cst_78 : f32 to vector<2x32xf32>
    %239 = arith.subf %238, %229 : vector<2x32xf32>
    %240 = arith.mulf %239, %237 : vector<2x32xf32>
    %241 = arith.mulf %229, %161 : vector<2x32xf32>
    %242 = arith.addf %240, %241 : vector<2x32xf32>
    %243 = arith.truncf %207 : vector<2x32xf32> to vector<2x32xbf16>
    %244 = arith.index_cast %c2_i32 : i32 to index
    %c0_79 = arith.constant 0 : index
    %c0_80 = arith.constant 0 : index
    %245 = vector.load %arg8[%244, %c0_79, %c0_80] : memref<8x2x64xbf16, #tpu.memory_space<vmem>>, vector<1x2x32xbf16>
    %246 = vector.shape_cast %245 : vector<1x2x32xbf16> to vector<2x32xbf16>
    %247 = vector.shape_cast %243 : vector<2x32xbf16> to vector<1x2x32xbf16>
    tpu.vector_store %arg8[%244, %c0_79, %c0_80], %247 {strides = array<i32>} : memref<8x2x64xbf16, #tpu.memory_space<vmem>>, vector<1x2x32xbf16>,
    %248 = arith.truncf %242 : vector<2x32xf32> to vector<2x32xbf16>
    %249 = arith.index_cast %172 : i32 to index
    %c0_81 = arith.constant 0 : index
    %c32_82 = arith.constant 32 : index
    %250 = vector.load %arg8[%249, %c0_81, %c32_82] : memref<8x2x64xbf16, #tpu.memory_space<vmem>>, vector<1x2x32xbf16>
    %251 = vector.shape_cast %250 : vector<1x2x32xbf16> to vector<2x32xbf16>
    %252 = vector.shape_cast %248 : vector<2x32xbf16> to vector<1x2x32xbf16>
    tpu.vector_store %arg8[%249, %c0_81, %c32_82], %252 {strides = array<i32>} : memref<8x2x64xbf16, #tpu.memory_space<vmem>>, vector<1x2x32xbf16>,
    %c3_i32 = arith.constant 3 : i32
    %c7_i32_83 = arith.constant 7 : i32
    %253 = arith.subi %c7_i32_83, %c3_i32 : i32
    %254 = arith.index_cast %c3_i32 : i32 to index
    %c0_84 = arith.constant 0 : index
    %c0_85 = arith.constant 0 : index
    %255 = vector.load %arg9[%254, %c0_84, %c0_85] : memref<8x2x192xf32, #tpu.memory_space<vmem>>, vector<1x2x192xf32>
    %256 = vector.shape_cast %255 : vector<1x2x192xf32> to vector<2x192xf32>
    %257 = arith.truncf %207 : vector<2x32xf32> to vector<2x32xbf16>
    %c0_86 = arith.constant 0 : index
    %c0_87 = arith.constant 0 : index
    %258 = vector.load %arg3[%c0_86, %c0_87] : memref<32x96xbf16, #tpu.memory_space<vmem>>, vector<32x96xbf16>
    %cst_88 = arith.constant dense<0.000000e+00> : vector<2x96xf32>
    %259 = tpu.matmul %257, %258, %cst_88 {dimension_numbers = #tpu.dot_dimension_numbers<[1], [0], [0], [1], [0, 0, 1, 1], [], []>} : vector<2x32xbf16>, vector<32x96xbf16>, vector<2x96xf32> -> vector<2x96xf32>
    %260 = vector.extract_strided_slice %256 {offsets = [0, 0], sizes = [2, 32], strides = [1, 1]} : vector<2x192xf32> to vector<2x32xf32>
    %261 = vector.extract_strided_slice %259 {offsets = [0, 0], sizes = [2, 32], strides = [1, 1]} : vector<2x96xf32> to vector<2x32xf32>
    %262 = arith.addf %260, %261 : vector<2x32xf32>
    %263 = arith.negf %262 : vector<2x32xf32>
    %264 = math.exp %263 : vector<2x32xf32>
    %cst_89 = arith.constant 1.000000e+00 : f32
    %265 = vector.broadcast %cst_89 : f32 to vector<2x32xf32>
    %266 = arith.addf %265, %264 : vector<2x32xf32>
    %267 = arith.divf %265, %266 : vector<2x32xf32>
    %268 = vector.extract_strided_slice %256 {offsets = [0, 32], sizes = [2, 32], strides = [1, 1]} : vector<2x192xf32> to vector<2x32xf32>
    %269 = vector.extract_strided_slice %259 {offsets = [0, 32], sizes = [2, 32], strides = [1, 1]} : vector<2x96xf32> to vector<2x32xf32>
    %270 = arith.addf %268, %269 : vector<2x32xf32>
    %271 = arith.negf %270 : vector<2x32xf32>
    %272 = math.exp %271 : vector<2x32xf32>
    %cst_90 = arith.constant 1.000000e+00 : f32
    %273 = vector.broadcast %cst_90 : f32 to vector<2x32xf32>
    %274 = arith.addf %273, %272 : vector<2x32xf32>
    %275 = arith.divf %273, %274 : vector<2x32xf32>
    %276 = vector.extract_strided_slice %256 {offsets = [0, 64], sizes = [2, 32], strides = [1, 1]} : vector<2x192xf32> to vector<2x32xf32>
    %277 = vector.extract_strided_slice %259 {offsets = [0, 64], sizes = [2, 32], strides = [1, 1]} : vector<2x96xf32> to vector<2x32xf32>
    %c0_91 = arith.constant 0 : index
    %c0_92 = arith.constant 0 : index
    %278 = vector.load %arg6[%c0_91, %c0_92] : memref<1x32xf32, #tpu.memory_space<vmem>>, vector<1x32xf32>
    %279 = vector.broadcast %278 : vector<1x32xf32> to vector<2x32xf32>
    %280 = arith.addf %277, %279 : vector<2x32xf32>
    %281 = arith.mulf %267, %280 : vector<2x32xf32>
    %282 = arith.addf %276, %281 : vector<2x32xf32>
    %283 = math.tanh %282 : vector<2x32xf32>
    %cst_93 = arith.constant 1.000000e+00 : f32
    %284 = vector.broadcast %cst_93 : f32 to vector<2x32xf32>
    %285 = arith.subf %284, %275 : vector<2x32xf32>
    %286 = arith.mulf %285, %283 : vector<2x32xf32>
    %287 = arith.mulf %275, %207 : vector<2x32xf32>
    %288 = arith.addf %286, %287 : vector<2x32xf32>
    %289 = arith.index_cast %253 : i32 to index
    %c0_94 = arith.constant 0 : index
    %c0_95 = arith.constant 0 : index
    %290 = vector.load %arg9[%289, %c0_94, %c0_95] : memref<8x2x192xf32, #tpu.memory_space<vmem>>, vector<1x2x192xf32>
    %291 = vector.shape_cast %290 : vector<1x2x192xf32> to vector<2x192xf32>
    %292 = arith.truncf %242 : vector<2x32xf32> to vector<2x32xbf16>
    %c0_96 = arith.constant 0 : index
    %c0_97 = arith.constant 0 : index
    %293 = vector.load %arg4[%c0_96, %c0_97] : memref<32x96xbf16, #tpu.memory_space<vmem>>, vector<32x96xbf16>
    %cst_98 = arith.constant dense<0.000000e+00> : vector<2x96xf32>
    %294 = tpu.matmul %292, %293, %cst_98 {dimension_numbers = #tpu.dot_dimension_numbers<[1], [0], [0], [1], [0, 0, 1, 1], [], []>} : vector<2x32xbf16>, vector<32x96xbf16>, vector<2x96xf32> -> vector<2x96xf32>
    %295 = vector.extract_strided_slice %291 {offsets = [0, 96], sizes = [2, 32], strides = [1, 1]} : vector<2x192xf32> to vector<2x32xf32>
    %296 = vector.extract_strided_slice %294 {offsets = [0, 0], sizes = [2, 32], strides = [1, 1]} : vector<2x96xf32> to vector<2x32xf32>
    %297 = arith.addf %295, %296 : vector<2x32xf32>
    %298 = arith.negf %297 : vector<2x32xf32>
    %299 = math.exp %298 : vector<2x32xf32>
    %cst_99 = arith.constant 1.000000e+00 : f32
    %300 = vector.broadcast %cst_99 : f32 to vector<2x32xf32>
    %301 = arith.addf %300, %299 : vector<2x32xf32>
    %302 = arith.divf %300, %301 : vector<2x32xf32>
    %303 = vector.extract_strided_slice %291 {offsets = [0, 128], sizes = [2, 32], strides = [1, 1]} : vector<2x192xf32> to vector<2x32xf32>
    %304 = vector.extract_strided_slice %294 {offsets = [0, 32], sizes = [2, 32], strides = [1, 1]} : vector<2x96xf32> to vector<2x32xf32>
    %305 = arith.addf %303, %304 : vector<2x32xf32>
    %306 = arith.negf %305 : vector<2x32xf32>
    %307 = math.exp %306 : vector<2x32xf32>
    %cst_100 = arith.constant 1.000000e+00 : f32
    %308 = vector.broadcast %cst_100 : f32 to vector<2x32xf32>
    %309 = arith.addf %308, %307 : vector<2x32xf32>
    %310 = arith.divf %308, %309 : vector<2x32xf32>
    %311 = vector.extract_strided_slice %291 {offsets = [0, 160], sizes = [2, 32], strides = [1, 1]} : vector<2x192xf32> to vector<2x32xf32>
    %312 = vector.extract_strided_slice %294 {offsets = [0, 64], sizes = [2, 32], strides = [1, 1]} : vector<2x96xf32> to vector<2x32xf32>
    %c0_101 = arith.constant 0 : index
    %c0_102 = arith.constant 0 : index
    %313 = vector.load %arg7[%c0_101, %c0_102] : memref<1x32xf32, #tpu.memory_space<vmem>>, vector<1x32xf32>
    %314 = vector.broadcast %313 : vector<1x32xf32> to vector<2x32xf32>
    %315 = arith.addf %312, %314 : vector<2x32xf32>
    %316 = arith.mulf %302, %315 : vector<2x32xf32>
    %317 = arith.addf %311, %316 : vector<2x32xf32>
    %318 = math.tanh %317 : vector<2x32xf32>
    %cst_103 = arith.constant 1.000000e+00 : f32
    %319 = vector.broadcast %cst_103 : f32 to vector<2x32xf32>
    %320 = arith.subf %319, %310 : vector<2x32xf32>
    %321 = arith.mulf %320, %318 : vector<2x32xf32>
    %322 = arith.mulf %310, %242 : vector<2x32xf32>
    %323 = arith.addf %321, %322 : vector<2x32xf32>
    %324 = arith.truncf %288 : vector<2x32xf32> to vector<2x32xbf16>
    %325 = arith.index_cast %c3_i32 : i32 to index
    %c0_104 = arith.constant 0 : index
    %c0_105 = arith.constant 0 : index
    %326 = vector.load %arg8[%325, %c0_104, %c0_105] : memref<8x2x64xbf16, #tpu.memory_space<vmem>>, vector<1x2x32xbf16>
    %327 = vector.shape_cast %326 : vector<1x2x32xbf16> to vector<2x32xbf16>
    %328 = vector.shape_cast %324 : vector<2x32xbf16> to vector<1x2x32xbf16>
    tpu.vector_store %arg8[%325, %c0_104, %c0_105], %328 {strides = array<i32>} : memref<8x2x64xbf16, #tpu.memory_space<vmem>>, vector<1x2x32xbf16>,
    %329 = arith.truncf %323 : vector<2x32xf32> to vector<2x32xbf16>
    %330 = arith.index_cast %253 : i32 to index
    %c0_106 = arith.constant 0 : index
    %c32_107 = arith.constant 32 : index
    %331 = vector.load %arg8[%330, %c0_106, %c32_107] : memref<8x2x64xbf16, #tpu.memory_space<vmem>>, vector<1x2x32xbf16>
    %332 = vector.shape_cast %331 : vector<1x2x32xbf16> to vector<2x32xbf16>
    %333 = vector.shape_cast %329 : vector<2x32xbf16> to vector<1x2x32xbf16>
    tpu.vector_store %arg8[%330, %c0_106, %c32_107], %333 {strides = array<i32>} : memref<8x2x64xbf16, #tpu.memory_space<vmem>>, vector<1x2x32xbf16>,
    %c4_i32 = arith.constant 4 : i32
    %c7_i32_108 = arith.constant 7 : i32
    %334 = arith.subi %c7_i32_108, %c4_i32 : i32
    %335 = arith.index_cast %c4_i32 : i32 to index
    %c0_109 = arith.constant 0 : index
    %c0_110 = arith.constant 0 : index
    %336 = vector.load %arg9[%335, %c0_109, %c0_110] : memref<8x2x192xf32, #tpu.memory_space<vmem>>, vector<1x2x192xf32>
    %337 = vector.shape_cast %336 : vector<1x2x192xf32> to vector<2x192xf32>
    %338 = arith.truncf %288 : vector<2x32xf32> to vector<2x32xbf16>
    %c0_111 = arith.constant 0 : index
    %c0_112 = arith.constant 0 : index
    %339 = vector.load %arg3[%c0_111, %c0_112] : memref<32x96xbf16, #tpu.memory_space<vmem>>, vector<32x96xbf16>
    %cst_113 = arith.constant dense<0.000000e+00> : vector<2x96xf32>
    %340 = tpu.matmul %338, %339, %cst_113 {dimension_numbers = #tpu.dot_dimension_numbers<[1], [0], [0], [1], [0, 0, 1, 1], [], []>} : vector<2x32xbf16>, vector<32x96xbf16>, vector<2x96xf32> -> vector<2x96xf32>
    %341 = vector.extract_strided_slice %337 {offsets = [0, 0], sizes = [2, 32], strides = [1, 1]} : vector<2x192xf32> to vector<2x32xf32>
    %342 = vector.extract_strided_slice %340 {offsets = [0, 0], sizes = [2, 32], strides = [1, 1]} : vector<2x96xf32> to vector<2x32xf32>
    %343 = arith.addf %341, %342 : vector<2x32xf32>
    %344 = arith.negf %343 : vector<2x32xf32>
    %345 = math.exp %344 : vector<2x32xf32>
    %cst_114 = arith.constant 1.000000e+00 : f32
    %346 = vector.broadcast %cst_114 : f32 to vector<2x32xf32>
    %347 = arith.addf %346, %345 : vector<2x32xf32>
    %348 = arith.divf %346, %347 : vector<2x32xf32>
    %349 = vector.extract_strided_slice %337 {offsets = [0, 32], sizes = [2, 32], strides = [1, 1]} : vector<2x192xf32> to vector<2x32xf32>
    %350 = vector.extract_strided_slice %340 {offsets = [0, 32], sizes = [2, 32], strides = [1, 1]} : vector<2x96xf32> to vector<2x32xf32>
    %351 = arith.addf %349, %350 : vector<2x32xf32>
    %352 = arith.negf %351 : vector<2x32xf32>
    %353 = math.exp %352 : vector<2x32xf32>
    %cst_115 = arith.constant 1.000000e+00 : f32
    %354 = vector.broadcast %cst_115 : f32 to vector<2x32xf32>
    %355 = arith.addf %354, %353 : vector<2x32xf32>
    %356 = arith.divf %354, %355 : vector<2x32xf32>
    %357 = vector.extract_strided_slice %337 {offsets = [0, 64], sizes = [2, 32], strides = [1, 1]} : vector<2x192xf32> to vector<2x32xf32>
    %358 = vector.extract_strided_slice %340 {offsets = [0, 64], sizes = [2, 32], strides = [1, 1]} : vector<2x96xf32> to vector<2x32xf32>
    %c0_116 = arith.constant 0 : index
    %c0_117 = arith.constant 0 : index
    %359 = vector.load %arg6[%c0_116, %c0_117] : memref<1x32xf32, #tpu.memory_space<vmem>>, vector<1x32xf32>
    %360 = vector.broadcast %359 : vector<1x32xf32> to vector<2x32xf32>
    %361 = arith.addf %358, %360 : vector<2x32xf32>
    %362 = arith.mulf %348, %361 : vector<2x32xf32>
    %363 = arith.addf %357, %362 : vector<2x32xf32>
    %364 = math.tanh %363 : vector<2x32xf32>
    %cst_118 = arith.constant 1.000000e+00 : f32
    %365 = vector.broadcast %cst_118 : f32 to vector<2x32xf32>
    %366 = arith.subf %365, %356 : vector<2x32xf32>
    %367 = arith.mulf %366, %364 : vector<2x32xf32>
    %368 = arith.mulf %356, %288 : vector<2x32xf32>
    %369 = arith.addf %367, %368 : vector<2x32xf32>
    %370 = arith.index_cast %334 : i32 to index
    %c0_119 = arith.constant 0 : index
    %c0_120 = arith.constant 0 : index
    %371 = vector.load %arg9[%370, %c0_119, %c0_120] : memref<8x2x192xf32, #tpu.memory_space<vmem>>, vector<1x2x192xf32>
    %372 = vector.shape_cast %371 : vector<1x2x192xf32> to vector<2x192xf32>
    %373 = arith.truncf %323 : vector<2x32xf32> to vector<2x32xbf16>
    %c0_121 = arith.constant 0 : index
    %c0_122 = arith.constant 0 : index
    %374 = vector.load %arg4[%c0_121, %c0_122] : memref<32x96xbf16, #tpu.memory_space<vmem>>, vector<32x96xbf16>
    %cst_123 = arith.constant dense<0.000000e+00> : vector<2x96xf32>
    %375 = tpu.matmul %373, %374, %cst_123 {dimension_numbers = #tpu.dot_dimension_numbers<[1], [0], [0], [1], [0, 0, 1, 1], [], []>} : vector<2x32xbf16>, vector<32x96xbf16>, vector<2x96xf32> -> vector<2x96xf32>
    %376 = vector.extract_strided_slice %372 {offsets = [0, 96], sizes = [2, 32], strides = [1, 1]} : vector<2x192xf32> to vector<2x32xf32>
    %377 = vector.extract_strided_slice %375 {offsets = [0, 0], sizes = [2, 32], strides = [1, 1]} : vector<2x96xf32> to vector<2x32xf32>
    %378 = arith.addf %376, %377 : vector<2x32xf32>
    %379 = arith.negf %378 : vector<2x32xf32>
    %380 = math.exp %379 : vector<2x32xf32>
    %cst_124 = arith.constant 1.000000e+00 : f32
    %381 = vector.broadcast %cst_124 : f32 to vector<2x32xf32>
    %382 = arith.addf %381, %380 : vector<2x32xf32>
    %383 = arith.divf %381, %382 : vector<2x32xf32>
    %384 = vector.extract_strided_slice %372 {offsets = [0, 128], sizes = [2, 32], strides = [1, 1]} : vector<2x192xf32> to vector<2x32xf32>
    %385 = vector.extract_strided_slice %375 {offsets = [0, 32], sizes = [2, 32], strides = [1, 1]} : vector<2x96xf32> to vector<2x32xf32>
    %386 = arith.addf %384, %385 : vector<2x32xf32>
    %387 = arith.negf %386 : vector<2x32xf32>
    %388 = math.exp %387 : vector<2x32xf32>
    %cst_125 = arith.constant 1.000000e+00 : f32
    %389 = vector.broadcast %cst_125 : f32 to vector<2x32xf32>
    %390 = arith.addf %389, %388 : vector<2x32xf32>
    %391 = arith.divf %389, %390 : vector<2x32xf32>
    %392 = vector.extract_strided_slice %372 {offsets = [0, 160], sizes = [2, 32], strides = [1, 1]} : vector<2x192xf32> to vector<2x32xf32>
    %393 = vector.extract_strided_slice %375 {offsets = [0, 64], sizes = [2, 32], strides = [1, 1]} : vector<2x96xf32> to vector<2x32xf32>
    %c0_126 = arith.constant 0 : index
    %c0_127 = arith.constant 0 : index
    %394 = vector.load %arg7[%c0_126, %c0_127] : memref<1x32xf32, #tpu.memory_space<vmem>>, vector<1x32xf32>
    %395 = vector.broadcast %394 : vector<1x32xf32> to vector<2x32xf32>
    %396 = arith.addf %393, %395 : vector<2x32xf32>
    %397 = arith.mulf %383, %396 : vector<2x32xf32>
    %398 = arith.addf %392, %397 : vector<2x32xf32>
    %399 = math.tanh %398 : vector<2x32xf32>
    %cst_128 = arith.constant 1.000000e+00 : f32
    %400 = vector.broadcast %cst_128 : f32 to vector<2x32xf32>
    %401 = arith.subf %400, %391 : vector<2x32xf32>
    %402 = arith.mulf %401, %399 : vector<2x32xf32>
    %403 = arith.mulf %391, %323 : vector<2x32xf32>
    %404 = arith.addf %402, %403 : vector<2x32xf32>
    %405 = arith.truncf %369 : vector<2x32xf32> to vector<2x32xbf16>
    %406 = arith.index_cast %c4_i32 : i32 to index
    %c0_129 = arith.constant 0 : index
    %c0_130 = arith.constant 0 : index
    %407 = vector.load %arg8[%406, %c0_129, %c0_130] : memref<8x2x64xbf16, #tpu.memory_space<vmem>>, vector<1x2x32xbf16>
    %408 = vector.shape_cast %407 : vector<1x2x32xbf16> to vector<2x32xbf16>
    %409 = vector.shape_cast %405 : vector<2x32xbf16> to vector<1x2x32xbf16>
    tpu.vector_store %arg8[%406, %c0_129, %c0_130], %409 {strides = array<i32>} : memref<8x2x64xbf16, #tpu.memory_space<vmem>>, vector<1x2x32xbf16>,
    %410 = arith.truncf %404 : vector<2x32xf32> to vector<2x32xbf16>
    %411 = arith.index_cast %334 : i32 to index
    %c0_131 = arith.constant 0 : index
    %c32_132 = arith.constant 32 : index
    %412 = vector.load %arg8[%411, %c0_131, %c32_132] : memref<8x2x64xbf16, #tpu.memory_space<vmem>>, vector<1x2x32xbf16>
    %413 = vector.shape_cast %412 : vector<1x2x32xbf16> to vector<2x32xbf16>
    %414 = vector.shape_cast %410 : vector<2x32xbf16> to vector<1x2x32xbf16>
    tpu.vector_store %arg8[%411, %c0_131, %c32_132], %414 {strides = array<i32>} : memref<8x2x64xbf16, #tpu.memory_space<vmem>>, vector<1x2x32xbf16>,
    %c5_i32 = arith.constant 5 : i32
    %c7_i32_133 = arith.constant 7 : i32
    %415 = arith.subi %c7_i32_133, %c5_i32 : i32
    %416 = arith.index_cast %c5_i32 : i32 to index
    %c0_134 = arith.constant 0 : index
    %c0_135 = arith.constant 0 : index
    %417 = vector.load %arg9[%416, %c0_134, %c0_135] : memref<8x2x192xf32, #tpu.memory_space<vmem>>, vector<1x2x192xf32>
    %418 = vector.shape_cast %417 : vector<1x2x192xf32> to vector<2x192xf32>
    %419 = arith.truncf %369 : vector<2x32xf32> to vector<2x32xbf16>
    %c0_136 = arith.constant 0 : index
    %c0_137 = arith.constant 0 : index
    %420 = vector.load %arg3[%c0_136, %c0_137] : memref<32x96xbf16, #tpu.memory_space<vmem>>, vector<32x96xbf16>
    %cst_138 = arith.constant dense<0.000000e+00> : vector<2x96xf32>
    %421 = tpu.matmul %419, %420, %cst_138 {dimension_numbers = #tpu.dot_dimension_numbers<[1], [0], [0], [1], [0, 0, 1, 1], [], []>} : vector<2x32xbf16>, vector<32x96xbf16>, vector<2x96xf32> -> vector<2x96xf32>
    %422 = vector.extract_strided_slice %418 {offsets = [0, 0], sizes = [2, 32], strides = [1, 1]} : vector<2x192xf32> to vector<2x32xf32>
    %423 = vector.extract_strided_slice %421 {offsets = [0, 0], sizes = [2, 32], strides = [1, 1]} : vector<2x96xf32> to vector<2x32xf32>
    %424 = arith.addf %422, %423 : vector<2x32xf32>
    %425 = arith.negf %424 : vector<2x32xf32>
    %426 = math.exp %425 : vector<2x32xf32>
    %cst_139 = arith.constant 1.000000e+00 : f32
    %427 = vector.broadcast %cst_139 : f32 to vector<2x32xf32>
    %428 = arith.addf %427, %426 : vector<2x32xf32>
    %429 = arith.divf %427, %428 : vector<2x32xf32>
    %430 = vector.extract_strided_slice %418 {offsets = [0, 32], sizes = [2, 32], strides = [1, 1]} : vector<2x192xf32> to vector<2x32xf32>
    %431 = vector.extract_strided_slice %421 {offsets = [0, 32], sizes = [2, 32], strides = [1, 1]} : vector<2x96xf32> to vector<2x32xf32>
    %432 = arith.addf %430, %431 : vector<2x32xf32>
    %433 = arith.negf %432 : vector<2x32xf32>
    %434 = math.exp %433 : vector<2x32xf32>
    %cst_140 = arith.constant 1.000000e+00 : f32
    %435 = vector.broadcast %cst_140 : f32 to vector<2x32xf32>
    %436 = arith.addf %435, %434 : vector<2x32xf32>
    %437 = arith.divf %435, %436 : vector<2x32xf32>
    %438 = vector.extract_strided_slice %418 {offsets = [0, 64], sizes = [2, 32], strides = [1, 1]} : vector<2x192xf32> to vector<2x32xf32>
    %439 = vector.extract_strided_slice %421 {offsets = [0, 64], sizes = [2, 32], strides = [1, 1]} : vector<2x96xf32> to vector<2x32xf32>
    %c0_141 = arith.constant 0 : index
    %c0_142 = arith.constant 0 : index
    %440 = vector.load %arg6[%c0_141, %c0_142] : memref<1x32xf32, #tpu.memory_space<vmem>>, vector<1x32xf32>
    %441 = vector.broadcast %440 : vector<1x32xf32> to vector<2x32xf32>
    %442 = arith.addf %439, %441 : vector<2x32xf32>
    %443 = arith.mulf %429, %442 : vector<2x32xf32>
    %444 = arith.addf %438, %443 : vector<2x32xf32>
    %445 = math.tanh %444 : vector<2x32xf32>
    %cst_143 = arith.constant 1.000000e+00 : f32
    %446 = vector.broadcast %cst_143 : f32 to vector<2x32xf32>
    %447 = arith.subf %446, %437 : vector<2x32xf32>
    %448 = arith.mulf %447, %445 : vector<2x32xf32>
    %449 = arith.mulf %437, %369 : vector<2x32xf32>
    %450 = arith.addf %448, %449 : vector<2x32xf32>
    %451 = arith.index_cast %415 : i32 to index
    %c0_144 = arith.constant 0 : index
    %c0_145 = arith.constant 0 : index
    %452 = vector.load %arg9[%451, %c0_144, %c0_145] : memref<8x2x192xf32, #tpu.memory_space<vmem>>, vector<1x2x192xf32>
    %453 = vector.shape_cast %452 : vector<1x2x192xf32> to vector<2x192xf32>
    %454 = arith.truncf %404 : vector<2x32xf32> to vector<2x32xbf16>
    %c0_146 = arith.constant 0 : index
    %c0_147 = arith.constant 0 : index
    %455 = vector.load %arg4[%c0_146, %c0_147] : memref<32x96xbf16, #tpu.memory_space<vmem>>, vector<32x96xbf16>
    %cst_148 = arith.constant dense<0.000000e+00> : vector<2x96xf32>
    %456 = tpu.matmul %454, %455, %cst_148 {dimension_numbers = #tpu.dot_dimension_numbers<[1], [0], [0], [1], [0, 0, 1, 1], [], []>} : vector<2x32xbf16>, vector<32x96xbf16>, vector<2x96xf32> -> vector<2x96xf32>
    %457 = vector.extract_strided_slice %453 {offsets = [0, 96], sizes = [2, 32], strides = [1, 1]} : vector<2x192xf32> to vector<2x32xf32>
    %458 = vector.extract_strided_slice %456 {offsets = [0, 0], sizes = [2, 32], strides = [1, 1]} : vector<2x96xf32> to vector<2x32xf32>
    %459 = arith.addf %457, %458 : vector<2x32xf32>
    %460 = arith.negf %459 : vector<2x32xf32>
    %461 = math.exp %460 : vector<2x32xf32>
    %cst_149 = arith.constant 1.000000e+00 : f32
    %462 = vector.broadcast %cst_149 : f32 to vector<2x32xf32>
    %463 = arith.addf %462, %461 : vector<2x32xf32>
    %464 = arith.divf %462, %463 : vector<2x32xf32>
    %465 = vector.extract_strided_slice %453 {offsets = [0, 128], sizes = [2, 32], strides = [1, 1]} : vector<2x192xf32> to vector<2x32xf32>
    %466 = vector.extract_strided_slice %456 {offsets = [0, 32], sizes = [2, 32], strides = [1, 1]} : vector<2x96xf32> to vector<2x32xf32>
    %467 = arith.addf %465, %466 : vector<2x32xf32>
    %468 = arith.negf %467 : vector<2x32xf32>
    %469 = math.exp %468 : vector<2x32xf32>
    %cst_150 = arith.constant 1.000000e+00 : f32
    %470 = vector.broadcast %cst_150 : f32 to vector<2x32xf32>
    %471 = arith.addf %470, %469 : vector<2x32xf32>
    %472 = arith.divf %470, %471 : vector<2x32xf32>
    %473 = vector.extract_strided_slice %453 {offsets = [0, 160], sizes = [2, 32], strides = [1, 1]} : vector<2x192xf32> to vector<2x32xf32>
    %474 = vector.extract_strided_slice %456 {offsets = [0, 64], sizes = [2, 32], strides = [1, 1]} : vector<2x96xf32> to vector<2x32xf32>
    %c0_151 = arith.constant 0 : index
    %c0_152 = arith.constant 0 : index
    %475 = vector.load %arg7[%c0_151, %c0_152] : memref<1x32xf32, #tpu.memory_space<vmem>>, vector<1x32xf32>
    %476 = vector.broadcast %475 : vector<1x32xf32> to vector<2x32xf32>
    %477 = arith.addf %474, %476 : vector<2x32xf32>
    %478 = arith.mulf %464, %477 : vector<2x32xf32>
    %479 = arith.addf %473, %478 : vector<2x32xf32>
    %480 = math.tanh %479 : vector<2x32xf32>
    %cst_153 = arith.constant 1.000000e+00 : f32
    %481 = vector.broadcast %cst_153 : f32 to vector<2x32xf32>
    %482 = arith.subf %481, %472 : vector<2x32xf32>
    %483 = arith.mulf %482, %480 : vector<2x32xf32>
    %484 = arith.mulf %472, %404 : vector<2x32xf32>
    %485 = arith.addf %483, %484 : vector<2x32xf32>
    %486 = arith.truncf %450 : vector<2x32xf32> to vector<2x32xbf16>
    %487 = arith.index_cast %c5_i32 : i32 to index
    %c0_154 = arith.constant 0 : index
    %c0_155 = arith.constant 0 : index
    %488 = vector.load %arg8[%487, %c0_154, %c0_155] : memref<8x2x64xbf16, #tpu.memory_space<vmem>>, vector<1x2x32xbf16>
    %489 = vector.shape_cast %488 : vector<1x2x32xbf16> to vector<2x32xbf16>
    %490 = vector.shape_cast %486 : vector<2x32xbf16> to vector<1x2x32xbf16>
    tpu.vector_store %arg8[%487, %c0_154, %c0_155], %490 {strides = array<i32>} : memref<8x2x64xbf16, #tpu.memory_space<vmem>>, vector<1x2x32xbf16>,
    %491 = arith.truncf %485 : vector<2x32xf32> to vector<2x32xbf16>
    %492 = arith.index_cast %415 : i32 to index
    %c0_156 = arith.constant 0 : index
    %c32_157 = arith.constant 32 : index
    %493 = vector.load %arg8[%492, %c0_156, %c32_157] : memref<8x2x64xbf16, #tpu.memory_space<vmem>>, vector<1x2x32xbf16>
    %494 = vector.shape_cast %493 : vector<1x2x32xbf16> to vector<2x32xbf16>
    %495 = vector.shape_cast %491 : vector<2x32xbf16> to vector<1x2x32xbf16>
    tpu.vector_store %arg8[%492, %c0_156, %c32_157], %495 {strides = array<i32>} : memref<8x2x64xbf16, #tpu.memory_space<vmem>>, vector<1x2x32xbf16>,
    %c6_i32 = arith.constant 6 : i32
    %c7_i32_158 = arith.constant 7 : i32
    %496 = arith.subi %c7_i32_158, %c6_i32 : i32
    %497 = arith.index_cast %c6_i32 : i32 to index
    %c0_159 = arith.constant 0 : index
    %c0_160 = arith.constant 0 : index
    %498 = vector.load %arg9[%497, %c0_159, %c0_160] : memref<8x2x192xf32, #tpu.memory_space<vmem>>, vector<1x2x192xf32>
    %499 = vector.shape_cast %498 : vector<1x2x192xf32> to vector<2x192xf32>
    %500 = arith.truncf %450 : vector<2x32xf32> to vector<2x32xbf16>
    %c0_161 = arith.constant 0 : index
    %c0_162 = arith.constant 0 : index
    %501 = vector.load %arg3[%c0_161, %c0_162] : memref<32x96xbf16, #tpu.memory_space<vmem>>, vector<32x96xbf16>
    %cst_163 = arith.constant dense<0.000000e+00> : vector<2x96xf32>
    %502 = tpu.matmul %500, %501, %cst_163 {dimension_numbers = #tpu.dot_dimension_numbers<[1], [0], [0], [1], [0, 0, 1, 1], [], []>} : vector<2x32xbf16>, vector<32x96xbf16>, vector<2x96xf32> -> vector<2x96xf32>
    %503 = vector.extract_strided_slice %499 {offsets = [0, 0], sizes = [2, 32], strides = [1, 1]} : vector<2x192xf32> to vector<2x32xf32>
    %504 = vector.extract_strided_slice %502 {offsets = [0, 0], sizes = [2, 32], strides = [1, 1]} : vector<2x96xf32> to vector<2x32xf32>
    %505 = arith.addf %503, %504 : vector<2x32xf32>
    %506 = arith.negf %505 : vector<2x32xf32>
    %507 = math.exp %506 : vector<2x32xf32>
    %cst_164 = arith.constant 1.000000e+00 : f32
    %508 = vector.broadcast %cst_164 : f32 to vector<2x32xf32>
    %509 = arith.addf %508, %507 : vector<2x32xf32>
    %510 = arith.divf %508, %509 : vector<2x32xf32>
    %511 = vector.extract_strided_slice %499 {offsets = [0, 32], sizes = [2, 32], strides = [1, 1]} : vector<2x192xf32> to vector<2x32xf32>
    %512 = vector.extract_strided_slice %502 {offsets = [0, 32], sizes = [2, 32], strides = [1, 1]} : vector<2x96xf32> to vector<2x32xf32>
    %513 = arith.addf %511, %512 : vector<2x32xf32>
    %514 = arith.negf %513 : vector<2x32xf32>
    %515 = math.exp %514 : vector<2x32xf32>
    %cst_165 = arith.constant 1.000000e+00 : f32
    %516 = vector.broadcast %cst_165 : f32 to vector<2x32xf32>
    %517 = arith.addf %516, %515 : vector<2x32xf32>
    %518 = arith.divf %516, %517 : vector<2x32xf32>
    %519 = vector.extract_strided_slice %499 {offsets = [0, 64], sizes = [2, 32], strides = [1, 1]} : vector<2x192xf32> to vector<2x32xf32>
    %520 = vector.extract_strided_slice %502 {offsets = [0, 64], sizes = [2, 32], strides = [1, 1]} : vector<2x96xf32> to vector<2x32xf32>
    %c0_166 = arith.constant 0 : index
    %c0_167 = arith.constant 0 : index
    %521 = vector.load %arg6[%c0_166, %c0_167] : memref<1x32xf32, #tpu.memory_space<vmem>>, vector<1x32xf32>
    %522 = vector.broadcast %521 : vector<1x32xf32> to vector<2x32xf32>
    %523 = arith.addf %520, %522 : vector<2x32xf32>
    %524 = arith.mulf %510, %523 : vector<2x32xf32>
    %525 = arith.addf %519, %524 : vector<2x32xf32>
    %526 = math.tanh %525 : vector<2x32xf32>
    %cst_168 = arith.constant 1.000000e+00 : f32
    %527 = vector.broadcast %cst_168 : f32 to vector<2x32xf32>
    %528 = arith.subf %527, %518 : vector<2x32xf32>
    %529 = arith.mulf %528, %526 : vector<2x32xf32>
    %530 = arith.mulf %518, %450 : vector<2x32xf32>
    %531 = arith.addf %529, %530 : vector<2x32xf32>
    %532 = arith.index_cast %496 : i32 to index
    %c0_169 = arith.constant 0 : index
    %c0_170 = arith.constant 0 : index
    %533 = vector.load %arg9[%532, %c0_169, %c0_170] : memref<8x2x192xf32, #tpu.memory_space<vmem>>, vector<1x2x192xf32>
    %534 = vector.shape_cast %533 : vector<1x2x192xf32> to vector<2x192xf32>
    %535 = arith.truncf %485 : vector<2x32xf32> to vector<2x32xbf16>
    %c0_171 = arith.constant 0 : index
    %c0_172 = arith.constant 0 : index
    %536 = vector.load %arg4[%c0_171, %c0_172] : memref<32x96xbf16, #tpu.memory_space<vmem>>, vector<32x96xbf16>
    %cst_173 = arith.constant dense<0.000000e+00> : vector<2x96xf32>
    %537 = tpu.matmul %535, %536, %cst_173 {dimension_numbers = #tpu.dot_dimension_numbers<[1], [0], [0], [1], [0, 0, 1, 1], [], []>} : vector<2x32xbf16>, vector<32x96xbf16>, vector<2x96xf32> -> vector<2x96xf32>
    %538 = vector.extract_strided_slice %534 {offsets = [0, 96], sizes = [2, 32], strides = [1, 1]} : vector<2x192xf32> to vector<2x32xf32>
    %539 = vector.extract_strided_slice %537 {offsets = [0, 0], sizes = [2, 32], strides = [1, 1]} : vector<2x96xf32> to vector<2x32xf32>
    %540 = arith.addf %538, %539 : vector<2x32xf32>
    %541 = arith.negf %540 : vector<2x32xf32>
    %542 = math.exp %541 : vector<2x32xf32>
    %cst_174 = arith.constant 1.000000e+00 : f32
    %543 = vector.broadcast %cst_174 : f32 to vector<2x32xf32>
    %544 = arith.addf %543, %542 : vector<2x32xf32>
    %545 = arith.divf %543, %544 : vector<2x32xf32>
    %546 = vector.extract_strided_slice %534 {offsets = [0, 128], sizes = [2, 32], strides = [1, 1]} : vector<2x192xf32> to vector<2x32xf32>
    %547 = vector.extract_strided_slice %537 {offsets = [0, 32], sizes = [2, 32], strides = [1, 1]} : vector<2x96xf32> to vector<2x32xf32>
    %548 = arith.addf %546, %547 : vector<2x32xf32>
    %549 = arith.negf %548 : vector<2x32xf32>
    %550 = math.exp %549 : vector<2x32xf32>
    %cst_175 = arith.constant 1.000000e+00 : f32
    %551 = vector.broadcast %cst_175 : f32 to vector<2x32xf32>
    %552 = arith.addf %551, %550 : vector<2x32xf32>
    %553 = arith.divf %551, %552 : vector<2x32xf32>
    %554 = vector.extract_strided_slice %534 {offsets = [0, 160], sizes = [2, 32], strides = [1, 1]} : vector<2x192xf32> to vector<2x32xf32>
    %555 = vector.extract_strided_slice %537 {offsets = [0, 64], sizes = [2, 32], strides = [1, 1]} : vector<2x96xf32> to vector<2x32xf32>
    %c0_176 = arith.constant 0 : index
    %c0_177 = arith.constant 0 : index
    %556 = vector.load %arg7[%c0_176, %c0_177] : memref<1x32xf32, #tpu.memory_space<vmem>>, vector<1x32xf32>
    %557 = vector.broadcast %556 : vector<1x32xf32> to vector<2x32xf32>
    %558 = arith.addf %555, %557 : vector<2x32xf32>
    %559 = arith.mulf %545, %558 : vector<2x32xf32>
    %560 = arith.addf %554, %559 : vector<2x32xf32>
    %561 = math.tanh %560 : vector<2x32xf32>
    %cst_178 = arith.constant 1.000000e+00 : f32
    %562 = vector.broadcast %cst_178 : f32 to vector<2x32xf32>
    %563 = arith.subf %562, %553 : vector<2x32xf32>
    %564 = arith.mulf %563, %561 : vector<2x32xf32>
    %565 = arith.mulf %553, %485 : vector<2x32xf32>
    %566 = arith.addf %564, %565 : vector<2x32xf32>
    %567 = arith.truncf %531 : vector<2x32xf32> to vector<2x32xbf16>
    %568 = arith.index_cast %c6_i32 : i32 to index
    %c0_179 = arith.constant 0 : index
    %c0_180 = arith.constant 0 : index
    %569 = vector.load %arg8[%568, %c0_179, %c0_180] : memref<8x2x64xbf16, #tpu.memory_space<vmem>>, vector<1x2x32xbf16>
    %570 = vector.shape_cast %569 : vector<1x2x32xbf16> to vector<2x32xbf16>
    %571 = vector.shape_cast %567 : vector<2x32xbf16> to vector<1x2x32xbf16>
    tpu.vector_store %arg8[%568, %c0_179, %c0_180], %571 {strides = array<i32>} : memref<8x2x64xbf16, #tpu.memory_space<vmem>>, vector<1x2x32xbf16>,
    %572 = arith.truncf %566 : vector<2x32xf32> to vector<2x32xbf16>
    %573 = arith.index_cast %496 : i32 to index
    %c0_181 = arith.constant 0 : index
    %c32_182 = arith.constant 32 : index
    %574 = vector.load %arg8[%573, %c0_181, %c32_182] : memref<8x2x64xbf16, #tpu.memory_space<vmem>>, vector<1x2x32xbf16>
    %575 = vector.shape_cast %574 : vector<1x2x32xbf16> to vector<2x32xbf16>
    %576 = vector.shape_cast %572 : vector<2x32xbf16> to vector<1x2x32xbf16>
    tpu.vector_store %arg8[%573, %c0_181, %c32_182], %576 {strides = array<i32>} : memref<8x2x64xbf16, #tpu.memory_space<vmem>>, vector<1x2x32xbf16>,
    %c7_i32_183 = arith.constant 7 : i32
    %c7_i32_184 = arith.constant 7 : i32
    %577 = arith.subi %c7_i32_184, %c7_i32_183 : i32
    %578 = arith.index_cast %c7_i32_183 : i32 to index
    %c0_185 = arith.constant 0 : index
    %c0_186 = arith.constant 0 : index
    %579 = vector.load %arg9[%578, %c0_185, %c0_186] : memref<8x2x192xf32, #tpu.memory_space<vmem>>, vector<1x2x192xf32>
    %580 = vector.shape_cast %579 : vector<1x2x192xf32> to vector<2x192xf32>
    %581 = arith.truncf %531 : vector<2x32xf32> to vector<2x32xbf16>
    %c0_187 = arith.constant 0 : index
    %c0_188 = arith.constant 0 : index
    %582 = vector.load %arg3[%c0_187, %c0_188] : memref<32x96xbf16, #tpu.memory_space<vmem>>, vector<32x96xbf16>
    %cst_189 = arith.constant dense<0.000000e+00> : vector<2x96xf32>
    %583 = tpu.matmul %581, %582, %cst_189 {dimension_numbers = #tpu.dot_dimension_numbers<[1], [0], [0], [1], [0, 0, 1, 1], [], []>} : vector<2x32xbf16>, vector<32x96xbf16>, vector<2x96xf32> -> vector<2x96xf32>
    %584 = vector.extract_strided_slice %580 {offsets = [0, 0], sizes = [2, 32], strides = [1, 1]} : vector<2x192xf32> to vector<2x32xf32>
    %585 = vector.extract_strided_slice %583 {offsets = [0, 0], sizes = [2, 32], strides = [1, 1]} : vector<2x96xf32> to vector<2x32xf32>
    %586 = arith.addf %584, %585 : vector<2x32xf32>
    %587 = arith.negf %586 : vector<2x32xf32>
    %588 = math.exp %587 : vector<2x32xf32>
    %cst_190 = arith.constant 1.000000e+00 : f32
    %589 = vector.broadcast %cst_190 : f32 to vector<2x32xf32>
    %590 = arith.addf %589, %588 : vector<2x32xf32>
    %591 = arith.divf %589, %590 : vector<2x32xf32>
    %592 = vector.extract_strided_slice %580 {offsets = [0, 32], sizes = [2, 32], strides = [1, 1]} : vector<2x192xf32> to vector<2x32xf32>
    %593 = vector.extract_strided_slice %583 {offsets = [0, 32], sizes = [2, 32], strides = [1, 1]} : vector<2x96xf32> to vector<2x32xf32>
    %594 = arith.addf %592, %593 : vector<2x32xf32>
    %595 = arith.negf %594 : vector<2x32xf32>
    %596 = math.exp %595 : vector<2x32xf32>
    %cst_191 = arith.constant 1.000000e+00 : f32
    %597 = vector.broadcast %cst_191 : f32 to vector<2x32xf32>
    %598 = arith.addf %597, %596 : vector<2x32xf32>
    %599 = arith.divf %597, %598 : vector<2x32xf32>
    %600 = vector.extract_strided_slice %580 {offsets = [0, 64], sizes = [2, 32], strides = [1, 1]} : vector<2x192xf32> to vector<2x32xf32>
    %601 = vector.extract_strided_slice %583 {offsets = [0, 64], sizes = [2, 32], strides = [1, 1]} : vector<2x96xf32> to vector<2x32xf32>
    %c0_192 = arith.constant 0 : index
    %c0_193 = arith.constant 0 : index
    %602 = vector.load %arg6[%c0_192, %c0_193] : memref<1x32xf32, #tpu.memory_space<vmem>>, vector<1x32xf32>
    %603 = vector.broadcast %602 : vector<1x32xf32> to vector<2x32xf32>
    %604 = arith.addf %601, %603 : vector<2x32xf32>
    %605 = arith.mulf %591, %604 : vector<2x32xf32>
    %606 = arith.addf %600, %605 : vector<2x32xf32>
    %607 = math.tanh %606 : vector<2x32xf32>
    %cst_194 = arith.constant 1.000000e+00 : f32
    %608 = vector.broadcast %cst_194 : f32 to vector<2x32xf32>
    %609 = arith.subf %608, %599 : vector<2x32xf32>
    %610 = arith.mulf %609, %607 : vector<2x32xf32>
    %611 = arith.mulf %599, %531 : vector<2x32xf32>
    %612 = arith.addf %610, %611 : vector<2x32xf32>
    %613 = arith.index_cast %577 : i32 to index
    %c0_195 = arith.constant 0 : index
    %c0_196 = arith.constant 0 : index
    %614 = vector.load %arg9[%613, %c0_195, %c0_196] : memref<8x2x192xf32, #tpu.memory_space<vmem>>, vector<1x2x192xf32>
    %615 = vector.shape_cast %614 : vector<1x2x192xf32> to vector<2x192xf32>
    %616 = arith.truncf %566 : vector<2x32xf32> to vector<2x32xbf16>
    %c0_197 = arith.constant 0 : index
    %c0_198 = arith.constant 0 : index
    %617 = vector.load %arg4[%c0_197, %c0_198] : memref<32x96xbf16, #tpu.memory_space<vmem>>, vector<32x96xbf16>
    %cst_199 = arith.constant dense<0.000000e+00> : vector<2x96xf32>
    %618 = tpu.matmul %616, %617, %cst_199 {dimension_numbers = #tpu.dot_dimension_numbers<[1], [0], [0], [1], [0, 0, 1, 1], [], []>} : vector<2x32xbf16>, vector<32x96xbf16>, vector<2x96xf32> -> vector<2x96xf32>
    %619 = vector.extract_strided_slice %615 {offsets = [0, 96], sizes = [2, 32], strides = [1, 1]} : vector<2x192xf32> to vector<2x32xf32>
    %620 = vector.extract_strided_slice %618 {offsets = [0, 0], sizes = [2, 32], strides = [1, 1]} : vector<2x96xf32> to vector<2x32xf32>
    %621 = arith.addf %619, %620 : vector<2x32xf32>
    %622 = arith.negf %621 : vector<2x32xf32>
    %623 = math.exp %622 : vector<2x32xf32>
    %cst_200 = arith.constant 1.000000e+00 : f32
    %624 = vector.broadcast %cst_200 : f32 to vector<2x32xf32>
    %625 = arith.addf %624, %623 : vector<2x32xf32>
    %626 = arith.divf %624, %625 : vector<2x32xf32>
    %627 = vector.extract_strided_slice %615 {offsets = [0, 128], sizes = [2, 32], strides = [1, 1]} : vector<2x192xf32> to vector<2x32xf32>
    %628 = vector.extract_strided_slice %618 {offsets = [0, 32], sizes = [2, 32], strides = [1, 1]} : vector<2x96xf32> to vector<2x32xf32>
    %629 = arith.addf %627, %628 : vector<2x32xf32>
    %630 = arith.negf %629 : vector<2x32xf32>
    %631 = math.exp %630 : vector<2x32xf32>
    %cst_201 = arith.constant 1.000000e+00 : f32
    %632 = vector.broadcast %cst_201 : f32 to vector<2x32xf32>
    %633 = arith.addf %632, %631 : vector<2x32xf32>
    %634 = arith.divf %632, %633 : vector<2x32xf32>
    %635 = vector.extract_strided_slice %615 {offsets = [0, 160], sizes = [2, 32], strides = [1, 1]} : vector<2x192xf32> to vector<2x32xf32>
    %636 = vector.extract_strided_slice %618 {offsets = [0, 64], sizes = [2, 32], strides = [1, 1]} : vector<2x96xf32> to vector<2x32xf32>
    %c0_202 = arith.constant 0 : index
    %c0_203 = arith.constant 0 : index
    %637 = vector.load %arg7[%c0_202, %c0_203] : memref<1x32xf32, #tpu.memory_space<vmem>>, vector<1x32xf32>
    %638 = vector.broadcast %637 : vector<1x32xf32> to vector<2x32xf32>
    %639 = arith.addf %636, %638 : vector<2x32xf32>
    %640 = arith.mulf %626, %639 : vector<2x32xf32>
    %641 = arith.addf %635, %640 : vector<2x32xf32>
    %642 = math.tanh %641 : vector<2x32xf32>
    %cst_204 = arith.constant 1.000000e+00 : f32
    %643 = vector.broadcast %cst_204 : f32 to vector<2x32xf32>
    %644 = arith.subf %643, %634 : vector<2x32xf32>
    %645 = arith.mulf %644, %642 : vector<2x32xf32>
    %646 = arith.mulf %634, %566 : vector<2x32xf32>
    %647 = arith.addf %645, %646 : vector<2x32xf32>
    %648 = arith.truncf %612 : vector<2x32xf32> to vector<2x32xbf16>
    %649 = arith.index_cast %c7_i32_183 : i32 to index
    %c0_205 = arith.constant 0 : index
    %c0_206 = arith.constant 0 : index
    %650 = vector.load %arg8[%649, %c0_205, %c0_206] : memref<8x2x64xbf16, #tpu.memory_space<vmem>>, vector<1x2x32xbf16>
    %651 = vector.shape_cast %650 : vector<1x2x32xbf16> to vector<2x32xbf16>
    %652 = vector.shape_cast %648 : vector<2x32xbf16> to vector<1x2x32xbf16>
    tpu.vector_store %arg8[%649, %c0_205, %c0_206], %652 {strides = array<i32>} : memref<8x2x64xbf16, #tpu.memory_space<vmem>>, vector<1x2x32xbf16>,
    %653 = arith.truncf %647 : vector<2x32xf32> to vector<2x32xbf16>
    %654 = arith.index_cast %577 : i32 to index
    %c0_207 = arith.constant 0 : index
    %c32_208 = arith.constant 32 : index
    %655 = vector.load %arg8[%654, %c0_207, %c32_208] : memref<8x2x64xbf16, #tpu.memory_space<vmem>>, vector<1x2x32xbf16>
    %656 = vector.shape_cast %655 : vector<1x2x32xbf16> to vector<2x32xbf16>
    %657 = vector.shape_cast %653 : vector<2x32xbf16> to vector<1x2x32xbf16>
    tpu.vector_store %arg8[%654, %c0_207, %c32_208], %657 {strides = array<i32>} : memref<8x2x64xbf16, #tpu.memory_space<vmem>>, vector<1x2x32xbf16>,
    %c8_i32 = arith.constant 8 : i32
    return
  }
  func.func @transform_0(%arg0: i32) -> (i32, i32, i32) {
    %c0_i32 = arith.constant 0 : i32
    %c0_i32_0 = arith.constant 0 : i32
    %c0_i32_1 = arith.constant 0 : i32
    return %c0_i32, %arg0, %c0_i32_0 : i32, i32, i32
  }
  func.func @transform_1(%arg0: i32) -> (i32, i32) {
    %c0_i32 = arith.constant 0 : i32
    %c0_i32_0 = arith.constant 0 : i32
    %c0_i32_1 = arith.constant 0 : i32
    return %c0_i32, %c0_i32_0 : i32, i32
  }
  func.func @transform_2(%arg0: i32) -> (i32, i32) {
    %c0_i32 = arith.constant 0 : i32
    %c0_i32_0 = arith.constant 0 : i32
    %c0_i32_1 = arith.constant 0 : i32
    return %c0_i32, %c0_i32_0 : i32, i32
  }
  func.func @transform_3(%arg0: i32) -> (i32, i32) {
    %c0_i32 = arith.constant 0 : i32
    %c0_i32_0 = arith.constant 0 : i32
    %c0_i32_1 = arith.constant 0 : i32
    return %c0_i32, %c0_i32_0 : i32, i32
  }
  func.func @transform_4(%arg0: i32) -> (i32, i32) {
    %c0_i32 = arith.constant 0 : i32
    %c0_i32_0 = arith.constant 0 : i32
    %c0_i32_1 = arith.constant 0 : i32
    return %c0_i32, %c0_i32_0 : i32, i32
  }
  func.func @transform_5(%arg0: i32) -> (i32, i32) {
    %c0_i32 = arith.constant 0 : i32
    %c0_i32_0 = arith.constant 0 : i32
    %c0_i32_1 = arith.constant 0 : i32
    return %c0_i32, %c0_i32_0 : i32, i32
  }
  func.func @transform_6(%arg0: i32) -> (i32, i32) {
    %c0_i32 = arith.constant 0 : i32
    %c0_i32_0 = arith.constant 0 : i32
    %c0_i32_1 = arith.constant 0 : i32
    return %c0_i32, %c0_i32_0 : i32, i32
  }
  func.func @transform_7(%arg0: i32) -> (i32, i32, i32) {
    %c0_i32 = arith.constant 0 : i32
    %c0_i32_0 = arith.constant 0 : i32
    %c0_i32_1 = arith.constant 0 : i32
    return %c0_i32, %arg0, %c0_i32_0 : i32, i32, i32
  }
}

module attributes {stable_mosaic.version = 11 : i64} {
  func.func @bigru_fc_layer_kernel(%arg0: i32, %arg1: memref<8x2x64xbf16, #tpu.memory_space<vmem>>, %arg2: memref<64x192xbf16, #tpu.memory_space<vmem>>, %arg3: memref<32x96xbf16, #tpu.memory_space<vmem>>, %arg4: memref<32x96xbf16, #tpu.memory_space<vmem>>, %arg5: memref<1x192xf32, #tpu.memory_space<vmem>>, %arg6: memref<1x32xf32, #tpu.memory_space<vmem>>, %arg7: memref<1x32xf32, #tpu.memory_space<vmem>>, %arg8: memref<64x8xbf16, #tpu.memory_space<vmem>>, %arg9: memref<1x8xf32, #tpu.memory_space<vmem>>, %arg10: memref<8x2x8xf32, #tpu.memory_space<vmem>>, %arg11: memref<8x2x192xf32, #tpu.memory_space<vmem>>, %arg12: memref<8x2x64xbf16, #tpu.memory_space<vmem>>) attributes {dimension_semantics = [#tpu.dimension_semantics<parallel>], iteration_bounds = array<i64: 1>, scalar_prefetch = 0 : i64, scratch_operands = 2 : i64, tpu.core_type = #tpu.core_type<tc>, window_params = [{transform_indices = @transform_0, window_bounds = array<i64: 8, 2, 64>}, {pipeline_mode = #tpu.pipeline_mode<synchronous>, transform_indices = @transform_1, window_bounds = array<i64: 64, 192>}, {pipeline_mode = #tpu.pipeline_mode<synchronous>, transform_indices = @transform_2, window_bounds = array<i64: 32, 96>}, {pipeline_mode = #tpu.pipeline_mode<synchronous>, transform_indices = @transform_3, window_bounds = array<i64: 32, 96>}, {pipeline_mode = #tpu.pipeline_mode<synchronous>, transform_indices = @transform_4, window_bounds = array<i64: 1, 192>}, {pipeline_mode = #tpu.pipeline_mode<synchronous>, transform_indices = @transform_5, window_bounds = array<i64: 1, 32>}, {pipeline_mode = #tpu.pipeline_mode<synchronous>, transform_indices = @transform_6, window_bounds = array<i64: 1, 32>}, {pipeline_mode = #tpu.pipeline_mode<synchronous>, transform_indices = @transform_7, window_bounds = array<i64: 64, 8>}, {pipeline_mode = #tpu.pipeline_mode<synchronous>, transform_indices = @transform_8, window_bounds = array<i64: 1, 8>}, {transform_indices = @transform_9, window_bounds = array<i64: 8, 2, 8>}]} {
    %c0 = arith.constant 0 : index
    %c0_0 = arith.constant 0 : index
    %c0_1 = arith.constant 0 : index
    %0 = vector.load %arg1[%c0, %c0_0, %c0_1] : memref<8x2x64xbf16, #tpu.memory_space<vmem>>, vector<8x2x64xbf16>
    %1 = vector.shape_cast %0 : vector<8x2x64xbf16> to vector<16x64xbf16>
    %c0_2 = arith.constant 0 : index
    %c0_3 = arith.constant 0 : index
    %2 = vector.load %arg2[%c0_2, %c0_3] : memref<64x192xbf16, #tpu.memory_space<vmem>>, vector<64x192xbf16>
    %cst = arith.constant dense<0.000000e+00> : vector<16x192xf32>
    %3 = tpu.matmul %1, %2, %cst {dimension_numbers = #tpu.dot_dimension_numbers<[1], [0], [0], [1], [0, 0, 1, 1], [], []>} : vector<16x64xbf16>, vector<64x192xbf16>, vector<16x192xf32> -> vector<16x192xf32>
    %c0_4 = arith.constant 0 : index
    %c0_5 = arith.constant 0 : index
    %4 = vector.load %arg5[%c0_4, %c0_5] : memref<1x192xf32, #tpu.memory_space<vmem>>, vector<1x192xf32>
    %5 = vector.broadcast %4 : vector<1x192xf32> to vector<16x192xf32>
    %6 = arith.addf %3, %5 : vector<16x192xf32>
    %7 = vector.shape_cast %6 : vector<16x192xf32> to vector<8x2x192xf32>
    %c0_6 = arith.constant 0 : index
    %c0_7 = arith.constant 0 : index
    %c0_8 = arith.constant 0 : index
    %8 = vector.load %arg11[%c0_6, %c0_7, %c0_8] : memref<8x2x192xf32, #tpu.memory_space<vmem>>, vector<8x2x192xf32>
    tpu.vector_store %arg11[%c0_6, %c0_7, %c0_8], %7 {strides = array<i32>} : memref<8x2x192xf32, #tpu.memory_space<vmem>>, vector<8x2x192xf32>,
    %cst_9 = arith.constant 0.000000e+00 : f32
    %9 = vector.broadcast %cst_9 : f32 to vector<2x32xf32>
    %c0_i32 = arith.constant 0 : i32
    %c7_i32 = arith.constant 7 : i32
    %10 = arith.subi %c7_i32, %c0_i32 : i32
    %11 = arith.index_cast %c0_i32 : i32 to index
    %c0_10 = arith.constant 0 : index
    %c0_11 = arith.constant 0 : index
    %12 = vector.load %arg11[%11, %c0_10, %c0_11] : memref<8x2x192xf32, #tpu.memory_space<vmem>>, vector<1x2x192xf32>
    %13 = vector.shape_cast %12 : vector<1x2x192xf32> to vector<2x192xf32>
    %14 = arith.truncf %9 : vector<2x32xf32> to vector<2x32xbf16>
    %c0_12 = arith.constant 0 : index
    %c0_13 = arith.constant 0 : index
    %15 = vector.load %arg3[%c0_12, %c0_13] : memref<32x96xbf16, #tpu.memory_space<vmem>>, vector<32x96xbf16>
    %cst_14 = arith.constant dense<0.000000e+00> : vector<2x96xf32>
    %16 = tpu.matmul %14, %15, %cst_14 {dimension_numbers = #tpu.dot_dimension_numbers<[1], [0], [0], [1], [0, 0, 1, 1], [], []>} : vector<2x32xbf16>, vector<32x96xbf16>, vector<2x96xf32> -> vector<2x96xf32>
    %17 = vector.extract_strided_slice %13 {offsets = [0, 0], sizes = [2, 32], strides = [1, 1]} : vector<2x192xf32> to vector<2x32xf32>
    %18 = vector.extract_strided_slice %16 {offsets = [0, 0], sizes = [2, 32], strides = [1, 1]} : vector<2x96xf32> to vector<2x32xf32>
    %19 = arith.addf %17, %18 : vector<2x32xf32>
    %20 = arith.negf %19 : vector<2x32xf32>
    %21 = math.exp %20 : vector<2x32xf32>
    %cst_15 = arith.constant 1.000000e+00 : f32
    %22 = vector.broadcast %cst_15 : f32 to vector<2x32xf32>
    %23 = arith.addf %22, %21 : vector<2x32xf32>
    %24 = arith.divf %22, %23 : vector<2x32xf32>
    %25 = vector.extract_strided_slice %13 {offsets = [0, 32], sizes = [2, 32], strides = [1, 1]} : vector<2x192xf32> to vector<2x32xf32>
    %26 = vector.extract_strided_slice %16 {offsets = [0, 32], sizes = [2, 32], strides = [1, 1]} : vector<2x96xf32> to vector<2x32xf32>
    %27 = arith.addf %25, %26 : vector<2x32xf32>
    %28 = arith.negf %27 : vector<2x32xf32>
    %29 = math.exp %28 : vector<2x32xf32>
    %cst_16 = arith.constant 1.000000e+00 : f32
    %30 = vector.broadcast %cst_16 : f32 to vector<2x32xf32>
    %31 = arith.addf %30, %29 : vector<2x32xf32>
    %32 = arith.divf %30, %31 : vector<2x32xf32>
    %33 = vector.extract_strided_slice %13 {offsets = [0, 64], sizes = [2, 32], strides = [1, 1]} : vector<2x192xf32> to vector<2x32xf32>
    %34 = vector.extract_strided_slice %16 {offsets = [0, 64], sizes = [2, 32], strides = [1, 1]} : vector<2x96xf32> to vector<2x32xf32>
    %c0_17 = arith.constant 0 : index
    %c0_18 = arith.constant 0 : index
    %35 = vector.load %arg6[%c0_17, %c0_18] : memref<1x32xf32, #tpu.memory_space<vmem>>, vector<1x32xf32>
    %36 = vector.broadcast %35 : vector<1x32xf32> to vector<2x32xf32>
    %37 = arith.addf %34, %36 : vector<2x32xf32>
    %38 = arith.mulf %24, %37 : vector<2x32xf32>
    %39 = arith.addf %33, %38 : vector<2x32xf32>
    %40 = math.tanh %39 : vector<2x32xf32>
    %cst_19 = arith.constant 1.000000e+00 : f32
    %41 = vector.broadcast %cst_19 : f32 to vector<2x32xf32>
    %42 = arith.subf %41, %32 : vector<2x32xf32>
    %43 = arith.mulf %42, %40 : vector<2x32xf32>
    %44 = arith.mulf %32, %9 : vector<2x32xf32>
    %45 = arith.addf %43, %44 : vector<2x32xf32>
    %46 = arith.index_cast %10 : i32 to index
    %c0_20 = arith.constant 0 : index
    %c0_21 = arith.constant 0 : index
    %47 = vector.load %arg11[%46, %c0_20, %c0_21] : memref<8x2x192xf32, #tpu.memory_space<vmem>>, vector<1x2x192xf32>
    %48 = vector.shape_cast %47 : vector<1x2x192xf32> to vector<2x192xf32>
    %49 = arith.truncf %9 : vector<2x32xf32> to vector<2x32xbf16>
    %c0_22 = arith.constant 0 : index
    %c0_23 = arith.constant 0 : index
    %50 = vector.load %arg4[%c0_22, %c0_23] : memref<32x96xbf16, #tpu.memory_space<vmem>>, vector<32x96xbf16>
    %cst_24 = arith.constant dense<0.000000e+00> : vector<2x96xf32>
    %51 = tpu.matmul %49, %50, %cst_24 {dimension_numbers = #tpu.dot_dimension_numbers<[1], [0], [0], [1], [0, 0, 1, 1], [], []>} : vector<2x32xbf16>, vector<32x96xbf16>, vector<2x96xf32> -> vector<2x96xf32>
    %52 = vector.extract_strided_slice %48 {offsets = [0, 96], sizes = [2, 32], strides = [1, 1]} : vector<2x192xf32> to vector<2x32xf32>
    %53 = vector.extract_strided_slice %51 {offsets = [0, 0], sizes = [2, 32], strides = [1, 1]} : vector<2x96xf32> to vector<2x32xf32>
    %54 = arith.addf %52, %53 : vector<2x32xf32>
    %55 = arith.negf %54 : vector<2x32xf32>
    %56 = math.exp %55 : vector<2x32xf32>
    %cst_25 = arith.constant 1.000000e+00 : f32
    %57 = vector.broadcast %cst_25 : f32 to vector<2x32xf32>
    %58 = arith.addf %57, %56 : vector<2x32xf32>
    %59 = arith.divf %57, %58 : vector<2x32xf32>
    %60 = vector.extract_strided_slice %48 {offsets = [0, 128], sizes = [2, 32], strides = [1, 1]} : vector<2x192xf32> to vector<2x32xf32>
    %61 = vector.extract_strided_slice %51 {offsets = [0, 32], sizes = [2, 32], strides = [1, 1]} : vector<2x96xf32> to vector<2x32xf32>
    %62 = arith.addf %60, %61 : vector<2x32xf32>
    %63 = arith.negf %62 : vector<2x32xf32>
    %64 = math.exp %63 : vector<2x32xf32>
    %cst_26 = arith.constant 1.000000e+00 : f32
    %65 = vector.broadcast %cst_26 : f32 to vector<2x32xf32>
    %66 = arith.addf %65, %64 : vector<2x32xf32>
    %67 = arith.divf %65, %66 : vector<2x32xf32>
    %68 = vector.extract_strided_slice %48 {offsets = [0, 160], sizes = [2, 32], strides = [1, 1]} : vector<2x192xf32> to vector<2x32xf32>
    %69 = vector.extract_strided_slice %51 {offsets = [0, 64], sizes = [2, 32], strides = [1, 1]} : vector<2x96xf32> to vector<2x32xf32>
    %c0_27 = arith.constant 0 : index
    %c0_28 = arith.constant 0 : index
    %70 = vector.load %arg7[%c0_27, %c0_28] : memref<1x32xf32, #tpu.memory_space<vmem>>, vector<1x32xf32>
    %71 = vector.broadcast %70 : vector<1x32xf32> to vector<2x32xf32>
    %72 = arith.addf %69, %71 : vector<2x32xf32>
    %73 = arith.mulf %59, %72 : vector<2x32xf32>
    %74 = arith.addf %68, %73 : vector<2x32xf32>
    %75 = math.tanh %74 : vector<2x32xf32>
    %cst_29 = arith.constant 1.000000e+00 : f32
    %76 = vector.broadcast %cst_29 : f32 to vector<2x32xf32>
    %77 = arith.subf %76, %67 : vector<2x32xf32>
    %78 = arith.mulf %77, %75 : vector<2x32xf32>
    %79 = arith.mulf %67, %9 : vector<2x32xf32>
    %80 = arith.addf %78, %79 : vector<2x32xf32>
    %81 = arith.truncf %45 : vector<2x32xf32> to vector<2x32xbf16>
    %82 = arith.index_cast %c0_i32 : i32 to index
    %c0_30 = arith.constant 0 : index
    %c0_31 = arith.constant 0 : index
    %83 = vector.load %arg12[%82, %c0_30, %c0_31] : memref<8x2x64xbf16, #tpu.memory_space<vmem>>, vector<1x2x32xbf16>
    %84 = vector.shape_cast %83 : vector<1x2x32xbf16> to vector<2x32xbf16>
    %85 = vector.shape_cast %81 : vector<2x32xbf16> to vector<1x2x32xbf16>
    tpu.vector_store %arg12[%82, %c0_30, %c0_31], %85 {strides = array<i32>} : memref<8x2x64xbf16, #tpu.memory_space<vmem>>, vector<1x2x32xbf16>,
    %86 = arith.truncf %80 : vector<2x32xf32> to vector<2x32xbf16>
    %87 = arith.index_cast %10 : i32 to index
    %c0_32 = arith.constant 0 : index
    %c32 = arith.constant 32 : index
    %88 = vector.load %arg12[%87, %c0_32, %c32] : memref<8x2x64xbf16, #tpu.memory_space<vmem>>, vector<1x2x32xbf16>
    %89 = vector.shape_cast %88 : vector<1x2x32xbf16> to vector<2x32xbf16>
    %90 = vector.shape_cast %86 : vector<2x32xbf16> to vector<1x2x32xbf16>
    tpu.vector_store %arg12[%87, %c0_32, %c32], %90 {strides = array<i32>} : memref<8x2x64xbf16, #tpu.memory_space<vmem>>, vector<1x2x32xbf16>,
    %c1_i32 = arith.constant 1 : i32
    %c7_i32_33 = arith.constant 7 : i32
    %91 = arith.subi %c7_i32_33, %c1_i32 : i32
    %92 = arith.index_cast %c1_i32 : i32 to index
    %c0_34 = arith.constant 0 : index
    %c0_35 = arith.constant 0 : index
    %93 = vector.load %arg11[%92, %c0_34, %c0_35] : memref<8x2x192xf32, #tpu.memory_space<vmem>>, vector<1x2x192xf32>
    %94 = vector.shape_cast %93 : vector<1x2x192xf32> to vector<2x192xf32>
    %95 = arith.truncf %45 : vector<2x32xf32> to vector<2x32xbf16>
    %c0_36 = arith.constant 0 : index
    %c0_37 = arith.constant 0 : index
    %96 = vector.load %arg3[%c0_36, %c0_37] : memref<32x96xbf16, #tpu.memory_space<vmem>>, vector<32x96xbf16>
    %cst_38 = arith.constant dense<0.000000e+00> : vector<2x96xf32>
    %97 = tpu.matmul %95, %96, %cst_38 {dimension_numbers = #tpu.dot_dimension_numbers<[1], [0], [0], [1], [0, 0, 1, 1], [], []>} : vector<2x32xbf16>, vector<32x96xbf16>, vector<2x96xf32> -> vector<2x96xf32>
    %98 = vector.extract_strided_slice %94 {offsets = [0, 0], sizes = [2, 32], strides = [1, 1]} : vector<2x192xf32> to vector<2x32xf32>
    %99 = vector.extract_strided_slice %97 {offsets = [0, 0], sizes = [2, 32], strides = [1, 1]} : vector<2x96xf32> to vector<2x32xf32>
    %100 = arith.addf %98, %99 : vector<2x32xf32>
    %101 = arith.negf %100 : vector<2x32xf32>
    %102 = math.exp %101 : vector<2x32xf32>
    %cst_39 = arith.constant 1.000000e+00 : f32
    %103 = vector.broadcast %cst_39 : f32 to vector<2x32xf32>
    %104 = arith.addf %103, %102 : vector<2x32xf32>
    %105 = arith.divf %103, %104 : vector<2x32xf32>
    %106 = vector.extract_strided_slice %94 {offsets = [0, 32], sizes = [2, 32], strides = [1, 1]} : vector<2x192xf32> to vector<2x32xf32>
    %107 = vector.extract_strided_slice %97 {offsets = [0, 32], sizes = [2, 32], strides = [1, 1]} : vector<2x96xf32> to vector<2x32xf32>
    %108 = arith.addf %106, %107 : vector<2x32xf32>
    %109 = arith.negf %108 : vector<2x32xf32>
    %110 = math.exp %109 : vector<2x32xf32>
    %cst_40 = arith.constant 1.000000e+00 : f32
    %111 = vector.broadcast %cst_40 : f32 to vector<2x32xf32>
    %112 = arith.addf %111, %110 : vector<2x32xf32>
    %113 = arith.divf %111, %112 : vector<2x32xf32>
    %114 = vector.extract_strided_slice %94 {offsets = [0, 64], sizes = [2, 32], strides = [1, 1]} : vector<2x192xf32> to vector<2x32xf32>
    %115 = vector.extract_strided_slice %97 {offsets = [0, 64], sizes = [2, 32], strides = [1, 1]} : vector<2x96xf32> to vector<2x32xf32>
    %c0_41 = arith.constant 0 : index
    %c0_42 = arith.constant 0 : index
    %116 = vector.load %arg6[%c0_41, %c0_42] : memref<1x32xf32, #tpu.memory_space<vmem>>, vector<1x32xf32>
    %117 = vector.broadcast %116 : vector<1x32xf32> to vector<2x32xf32>
    %118 = arith.addf %115, %117 : vector<2x32xf32>
    %119 = arith.mulf %105, %118 : vector<2x32xf32>
    %120 = arith.addf %114, %119 : vector<2x32xf32>
    %121 = math.tanh %120 : vector<2x32xf32>
    %cst_43 = arith.constant 1.000000e+00 : f32
    %122 = vector.broadcast %cst_43 : f32 to vector<2x32xf32>
    %123 = arith.subf %122, %113 : vector<2x32xf32>
    %124 = arith.mulf %123, %121 : vector<2x32xf32>
    %125 = arith.mulf %113, %45 : vector<2x32xf32>
    %126 = arith.addf %124, %125 : vector<2x32xf32>
    %127 = arith.index_cast %91 : i32 to index
    %c0_44 = arith.constant 0 : index
    %c0_45 = arith.constant 0 : index
    %128 = vector.load %arg11[%127, %c0_44, %c0_45] : memref<8x2x192xf32, #tpu.memory_space<vmem>>, vector<1x2x192xf32>
    %129 = vector.shape_cast %128 : vector<1x2x192xf32> to vector<2x192xf32>
    %130 = arith.truncf %80 : vector<2x32xf32> to vector<2x32xbf16>
    %c0_46 = arith.constant 0 : index
    %c0_47 = arith.constant 0 : index
    %131 = vector.load %arg4[%c0_46, %c0_47] : memref<32x96xbf16, #tpu.memory_space<vmem>>, vector<32x96xbf16>
    %cst_48 = arith.constant dense<0.000000e+00> : vector<2x96xf32>
    %132 = tpu.matmul %130, %131, %cst_48 {dimension_numbers = #tpu.dot_dimension_numbers<[1], [0], [0], [1], [0, 0, 1, 1], [], []>} : vector<2x32xbf16>, vector<32x96xbf16>, vector<2x96xf32> -> vector<2x96xf32>
    %133 = vector.extract_strided_slice %129 {offsets = [0, 96], sizes = [2, 32], strides = [1, 1]} : vector<2x192xf32> to vector<2x32xf32>
    %134 = vector.extract_strided_slice %132 {offsets = [0, 0], sizes = [2, 32], strides = [1, 1]} : vector<2x96xf32> to vector<2x32xf32>
    %135 = arith.addf %133, %134 : vector<2x32xf32>
    %136 = arith.negf %135 : vector<2x32xf32>
    %137 = math.exp %136 : vector<2x32xf32>
    %cst_49 = arith.constant 1.000000e+00 : f32
    %138 = vector.broadcast %cst_49 : f32 to vector<2x32xf32>
    %139 = arith.addf %138, %137 : vector<2x32xf32>
    %140 = arith.divf %138, %139 : vector<2x32xf32>
    %141 = vector.extract_strided_slice %129 {offsets = [0, 128], sizes = [2, 32], strides = [1, 1]} : vector<2x192xf32> to vector<2x32xf32>
    %142 = vector.extract_strided_slice %132 {offsets = [0, 32], sizes = [2, 32], strides = [1, 1]} : vector<2x96xf32> to vector<2x32xf32>
    %143 = arith.addf %141, %142 : vector<2x32xf32>
    %144 = arith.negf %143 : vector<2x32xf32>
    %145 = math.exp %144 : vector<2x32xf32>
    %cst_50 = arith.constant 1.000000e+00 : f32
    %146 = vector.broadcast %cst_50 : f32 to vector<2x32xf32>
    %147 = arith.addf %146, %145 : vector<2x32xf32>
    %148 = arith.divf %146, %147 : vector<2x32xf32>
    %149 = vector.extract_strided_slice %129 {offsets = [0, 160], sizes = [2, 32], strides = [1, 1]} : vector<2x192xf32> to vector<2x32xf32>
    %150 = vector.extract_strided_slice %132 {offsets = [0, 64], sizes = [2, 32], strides = [1, 1]} : vector<2x96xf32> to vector<2x32xf32>
    %c0_51 = arith.constant 0 : index
    %c0_52 = arith.constant 0 : index
    %151 = vector.load %arg7[%c0_51, %c0_52] : memref<1x32xf32, #tpu.memory_space<vmem>>, vector<1x32xf32>
    %152 = vector.broadcast %151 : vector<1x32xf32> to vector<2x32xf32>
    %153 = arith.addf %150, %152 : vector<2x32xf32>
    %154 = arith.mulf %140, %153 : vector<2x32xf32>
    %155 = arith.addf %149, %154 : vector<2x32xf32>
    %156 = math.tanh %155 : vector<2x32xf32>
    %cst_53 = arith.constant 1.000000e+00 : f32
    %157 = vector.broadcast %cst_53 : f32 to vector<2x32xf32>
    %158 = arith.subf %157, %148 : vector<2x32xf32>
    %159 = arith.mulf %158, %156 : vector<2x32xf32>
    %160 = arith.mulf %148, %80 : vector<2x32xf32>
    %161 = arith.addf %159, %160 : vector<2x32xf32>
    %162 = arith.truncf %126 : vector<2x32xf32> to vector<2x32xbf16>
    %163 = arith.index_cast %c1_i32 : i32 to index
    %c0_54 = arith.constant 0 : index
    %c0_55 = arith.constant 0 : index
    %164 = vector.load %arg12[%163, %c0_54, %c0_55] : memref<8x2x64xbf16, #tpu.memory_space<vmem>>, vector<1x2x32xbf16>
    %165 = vector.shape_cast %164 : vector<1x2x32xbf16> to vector<2x32xbf16>
    %166 = vector.shape_cast %162 : vector<2x32xbf16> to vector<1x2x32xbf16>
    tpu.vector_store %arg12[%163, %c0_54, %c0_55], %166 {strides = array<i32>} : memref<8x2x64xbf16, #tpu.memory_space<vmem>>, vector<1x2x32xbf16>,
    %167 = arith.truncf %161 : vector<2x32xf32> to vector<2x32xbf16>
    %168 = arith.index_cast %91 : i32 to index
    %c0_56 = arith.constant 0 : index
    %c32_57 = arith.constant 32 : index
    %169 = vector.load %arg12[%168, %c0_56, %c32_57] : memref<8x2x64xbf16, #tpu.memory_space<vmem>>, vector<1x2x32xbf16>
    %170 = vector.shape_cast %169 : vector<1x2x32xbf16> to vector<2x32xbf16>
    %171 = vector.shape_cast %167 : vector<2x32xbf16> to vector<1x2x32xbf16>
    tpu.vector_store %arg12[%168, %c0_56, %c32_57], %171 {strides = array<i32>} : memref<8x2x64xbf16, #tpu.memory_space<vmem>>, vector<1x2x32xbf16>,
    %c2_i32 = arith.constant 2 : i32
    %c7_i32_58 = arith.constant 7 : i32
    %172 = arith.subi %c7_i32_58, %c2_i32 : i32
    %173 = arith.index_cast %c2_i32 : i32 to index
    %c0_59 = arith.constant 0 : index
    %c0_60 = arith.constant 0 : index
    %174 = vector.load %arg11[%173, %c0_59, %c0_60] : memref<8x2x192xf32, #tpu.memory_space<vmem>>, vector<1x2x192xf32>
    %175 = vector.shape_cast %174 : vector<1x2x192xf32> to vector<2x192xf32>
    %176 = arith.truncf %126 : vector<2x32xf32> to vector<2x32xbf16>
    %c0_61 = arith.constant 0 : index
    %c0_62 = arith.constant 0 : index
    %177 = vector.load %arg3[%c0_61, %c0_62] : memref<32x96xbf16, #tpu.memory_space<vmem>>, vector<32x96xbf16>
    %cst_63 = arith.constant dense<0.000000e+00> : vector<2x96xf32>
    %178 = tpu.matmul %176, %177, %cst_63 {dimension_numbers = #tpu.dot_dimension_numbers<[1], [0], [0], [1], [0, 0, 1, 1], [], []>} : vector<2x32xbf16>, vector<32x96xbf16>, vector<2x96xf32> -> vector<2x96xf32>
    %179 = vector.extract_strided_slice %175 {offsets = [0, 0], sizes = [2, 32], strides = [1, 1]} : vector<2x192xf32> to vector<2x32xf32>
    %180 = vector.extract_strided_slice %178 {offsets = [0, 0], sizes = [2, 32], strides = [1, 1]} : vector<2x96xf32> to vector<2x32xf32>
    %181 = arith.addf %179, %180 : vector<2x32xf32>
    %182 = arith.negf %181 : vector<2x32xf32>
    %183 = math.exp %182 : vector<2x32xf32>
    %cst_64 = arith.constant 1.000000e+00 : f32
    %184 = vector.broadcast %cst_64 : f32 to vector<2x32xf32>
    %185 = arith.addf %184, %183 : vector<2x32xf32>
    %186 = arith.divf %184, %185 : vector<2x32xf32>
    %187 = vector.extract_strided_slice %175 {offsets = [0, 32], sizes = [2, 32], strides = [1, 1]} : vector<2x192xf32> to vector<2x32xf32>
    %188 = vector.extract_strided_slice %178 {offsets = [0, 32], sizes = [2, 32], strides = [1, 1]} : vector<2x96xf32> to vector<2x32xf32>
    %189 = arith.addf %187, %188 : vector<2x32xf32>
    %190 = arith.negf %189 : vector<2x32xf32>
    %191 = math.exp %190 : vector<2x32xf32>
    %cst_65 = arith.constant 1.000000e+00 : f32
    %192 = vector.broadcast %cst_65 : f32 to vector<2x32xf32>
    %193 = arith.addf %192, %191 : vector<2x32xf32>
    %194 = arith.divf %192, %193 : vector<2x32xf32>
    %195 = vector.extract_strided_slice %175 {offsets = [0, 64], sizes = [2, 32], strides = [1, 1]} : vector<2x192xf32> to vector<2x32xf32>
    %196 = vector.extract_strided_slice %178 {offsets = [0, 64], sizes = [2, 32], strides = [1, 1]} : vector<2x96xf32> to vector<2x32xf32>
    %c0_66 = arith.constant 0 : index
    %c0_67 = arith.constant 0 : index
    %197 = vector.load %arg6[%c0_66, %c0_67] : memref<1x32xf32, #tpu.memory_space<vmem>>, vector<1x32xf32>
    %198 = vector.broadcast %197 : vector<1x32xf32> to vector<2x32xf32>
    %199 = arith.addf %196, %198 : vector<2x32xf32>
    %200 = arith.mulf %186, %199 : vector<2x32xf32>
    %201 = arith.addf %195, %200 : vector<2x32xf32>
    %202 = math.tanh %201 : vector<2x32xf32>
    %cst_68 = arith.constant 1.000000e+00 : f32
    %203 = vector.broadcast %cst_68 : f32 to vector<2x32xf32>
    %204 = arith.subf %203, %194 : vector<2x32xf32>
    %205 = arith.mulf %204, %202 : vector<2x32xf32>
    %206 = arith.mulf %194, %126 : vector<2x32xf32>
    %207 = arith.addf %205, %206 : vector<2x32xf32>
    %208 = arith.index_cast %172 : i32 to index
    %c0_69 = arith.constant 0 : index
    %c0_70 = arith.constant 0 : index
    %209 = vector.load %arg11[%208, %c0_69, %c0_70] : memref<8x2x192xf32, #tpu.memory_space<vmem>>, vector<1x2x192xf32>
    %210 = vector.shape_cast %209 : vector<1x2x192xf32> to vector<2x192xf32>
    %211 = arith.truncf %161 : vector<2x32xf32> to vector<2x32xbf16>
    %c0_71 = arith.constant 0 : index
    %c0_72 = arith.constant 0 : index
    %212 = vector.load %arg4[%c0_71, %c0_72] : memref<32x96xbf16, #tpu.memory_space<vmem>>, vector<32x96xbf16>
    %cst_73 = arith.constant dense<0.000000e+00> : vector<2x96xf32>
    %213 = tpu.matmul %211, %212, %cst_73 {dimension_numbers = #tpu.dot_dimension_numbers<[1], [0], [0], [1], [0, 0, 1, 1], [], []>} : vector<2x32xbf16>, vector<32x96xbf16>, vector<2x96xf32> -> vector<2x96xf32>
    %214 = vector.extract_strided_slice %210 {offsets = [0, 96], sizes = [2, 32], strides = [1, 1]} : vector<2x192xf32> to vector<2x32xf32>
    %215 = vector.extract_strided_slice %213 {offsets = [0, 0], sizes = [2, 32], strides = [1, 1]} : vector<2x96xf32> to vector<2x32xf32>
    %216 = arith.addf %214, %215 : vector<2x32xf32>
    %217 = arith.negf %216 : vector<2x32xf32>
    %218 = math.exp %217 : vector<2x32xf32>
    %cst_74 = arith.constant 1.000000e+00 : f32
    %219 = vector.broadcast %cst_74 : f32 to vector<2x32xf32>
    %220 = arith.addf %219, %218 : vector<2x32xf32>
    %221 = arith.divf %219, %220 : vector<2x32xf32>
    %222 = vector.extract_strided_slice %210 {offsets = [0, 128], sizes = [2, 32], strides = [1, 1]} : vector<2x192xf32> to vector<2x32xf32>
    %223 = vector.extract_strided_slice %213 {offsets = [0, 32], sizes = [2, 32], strides = [1, 1]} : vector<2x96xf32> to vector<2x32xf32>
    %224 = arith.addf %222, %223 : vector<2x32xf32>
    %225 = arith.negf %224 : vector<2x32xf32>
    %226 = math.exp %225 : vector<2x32xf32>
    %cst_75 = arith.constant 1.000000e+00 : f32
    %227 = vector.broadcast %cst_75 : f32 to vector<2x32xf32>
    %228 = arith.addf %227, %226 : vector<2x32xf32>
    %229 = arith.divf %227, %228 : vector<2x32xf32>
    %230 = vector.extract_strided_slice %210 {offsets = [0, 160], sizes = [2, 32], strides = [1, 1]} : vector<2x192xf32> to vector<2x32xf32>
    %231 = vector.extract_strided_slice %213 {offsets = [0, 64], sizes = [2, 32], strides = [1, 1]} : vector<2x96xf32> to vector<2x32xf32>
    %c0_76 = arith.constant 0 : index
    %c0_77 = arith.constant 0 : index
    %232 = vector.load %arg7[%c0_76, %c0_77] : memref<1x32xf32, #tpu.memory_space<vmem>>, vector<1x32xf32>
    %233 = vector.broadcast %232 : vector<1x32xf32> to vector<2x32xf32>
    %234 = arith.addf %231, %233 : vector<2x32xf32>
    %235 = arith.mulf %221, %234 : vector<2x32xf32>
    %236 = arith.addf %230, %235 : vector<2x32xf32>
    %237 = math.tanh %236 : vector<2x32xf32>
    %cst_78 = arith.constant 1.000000e+00 : f32
    %238 = vector.broadcast %cst_78 : f32 to vector<2x32xf32>
    %239 = arith.subf %238, %229 : vector<2x32xf32>
    %240 = arith.mulf %239, %237 : vector<2x32xf32>
    %241 = arith.mulf %229, %161 : vector<2x32xf32>
    %242 = arith.addf %240, %241 : vector<2x32xf32>
    %243 = arith.truncf %207 : vector<2x32xf32> to vector<2x32xbf16>
    %244 = arith.index_cast %c2_i32 : i32 to index
    %c0_79 = arith.constant 0 : index
    %c0_80 = arith.constant 0 : index
    %245 = vector.load %arg12[%244, %c0_79, %c0_80] : memref<8x2x64xbf16, #tpu.memory_space<vmem>>, vector<1x2x32xbf16>
    %246 = vector.shape_cast %245 : vector<1x2x32xbf16> to vector<2x32xbf16>
    %247 = vector.shape_cast %243 : vector<2x32xbf16> to vector<1x2x32xbf16>
    tpu.vector_store %arg12[%244, %c0_79, %c0_80], %247 {strides = array<i32>} : memref<8x2x64xbf16, #tpu.memory_space<vmem>>, vector<1x2x32xbf16>,
    %248 = arith.truncf %242 : vector<2x32xf32> to vector<2x32xbf16>
    %249 = arith.index_cast %172 : i32 to index
    %c0_81 = arith.constant 0 : index
    %c32_82 = arith.constant 32 : index
    %250 = vector.load %arg12[%249, %c0_81, %c32_82] : memref<8x2x64xbf16, #tpu.memory_space<vmem>>, vector<1x2x32xbf16>
    %251 = vector.shape_cast %250 : vector<1x2x32xbf16> to vector<2x32xbf16>
    %252 = vector.shape_cast %248 : vector<2x32xbf16> to vector<1x2x32xbf16>
    tpu.vector_store %arg12[%249, %c0_81, %c32_82], %252 {strides = array<i32>} : memref<8x2x64xbf16, #tpu.memory_space<vmem>>, vector<1x2x32xbf16>,
    %c3_i32 = arith.constant 3 : i32
    %c7_i32_83 = arith.constant 7 : i32
    %253 = arith.subi %c7_i32_83, %c3_i32 : i32
    %254 = arith.index_cast %c3_i32 : i32 to index
    %c0_84 = arith.constant 0 : index
    %c0_85 = arith.constant 0 : index
    %255 = vector.load %arg11[%254, %c0_84, %c0_85] : memref<8x2x192xf32, #tpu.memory_space<vmem>>, vector<1x2x192xf32>
    %256 = vector.shape_cast %255 : vector<1x2x192xf32> to vector<2x192xf32>
    %257 = arith.truncf %207 : vector<2x32xf32> to vector<2x32xbf16>
    %c0_86 = arith.constant 0 : index
    %c0_87 = arith.constant 0 : index
    %258 = vector.load %arg3[%c0_86, %c0_87] : memref<32x96xbf16, #tpu.memory_space<vmem>>, vector<32x96xbf16>
    %cst_88 = arith.constant dense<0.000000e+00> : vector<2x96xf32>
    %259 = tpu.matmul %257, %258, %cst_88 {dimension_numbers = #tpu.dot_dimension_numbers<[1], [0], [0], [1], [0, 0, 1, 1], [], []>} : vector<2x32xbf16>, vector<32x96xbf16>, vector<2x96xf32> -> vector<2x96xf32>
    %260 = vector.extract_strided_slice %256 {offsets = [0, 0], sizes = [2, 32], strides = [1, 1]} : vector<2x192xf32> to vector<2x32xf32>
    %261 = vector.extract_strided_slice %259 {offsets = [0, 0], sizes = [2, 32], strides = [1, 1]} : vector<2x96xf32> to vector<2x32xf32>
    %262 = arith.addf %260, %261 : vector<2x32xf32>
    %263 = arith.negf %262 : vector<2x32xf32>
    %264 = math.exp %263 : vector<2x32xf32>
    %cst_89 = arith.constant 1.000000e+00 : f32
    %265 = vector.broadcast %cst_89 : f32 to vector<2x32xf32>
    %266 = arith.addf %265, %264 : vector<2x32xf32>
    %267 = arith.divf %265, %266 : vector<2x32xf32>
    %268 = vector.extract_strided_slice %256 {offsets = [0, 32], sizes = [2, 32], strides = [1, 1]} : vector<2x192xf32> to vector<2x32xf32>
    %269 = vector.extract_strided_slice %259 {offsets = [0, 32], sizes = [2, 32], strides = [1, 1]} : vector<2x96xf32> to vector<2x32xf32>
    %270 = arith.addf %268, %269 : vector<2x32xf32>
    %271 = arith.negf %270 : vector<2x32xf32>
    %272 = math.exp %271 : vector<2x32xf32>
    %cst_90 = arith.constant 1.000000e+00 : f32
    %273 = vector.broadcast %cst_90 : f32 to vector<2x32xf32>
    %274 = arith.addf %273, %272 : vector<2x32xf32>
    %275 = arith.divf %273, %274 : vector<2x32xf32>
    %276 = vector.extract_strided_slice %256 {offsets = [0, 64], sizes = [2, 32], strides = [1, 1]} : vector<2x192xf32> to vector<2x32xf32>
    %277 = vector.extract_strided_slice %259 {offsets = [0, 64], sizes = [2, 32], strides = [1, 1]} : vector<2x96xf32> to vector<2x32xf32>
    %c0_91 = arith.constant 0 : index
    %c0_92 = arith.constant 0 : index
    %278 = vector.load %arg6[%c0_91, %c0_92] : memref<1x32xf32, #tpu.memory_space<vmem>>, vector<1x32xf32>
    %279 = vector.broadcast %278 : vector<1x32xf32> to vector<2x32xf32>
    %280 = arith.addf %277, %279 : vector<2x32xf32>
    %281 = arith.mulf %267, %280 : vector<2x32xf32>
    %282 = arith.addf %276, %281 : vector<2x32xf32>
    %283 = math.tanh %282 : vector<2x32xf32>
    %cst_93 = arith.constant 1.000000e+00 : f32
    %284 = vector.broadcast %cst_93 : f32 to vector<2x32xf32>
    %285 = arith.subf %284, %275 : vector<2x32xf32>
    %286 = arith.mulf %285, %283 : vector<2x32xf32>
    %287 = arith.mulf %275, %207 : vector<2x32xf32>
    %288 = arith.addf %286, %287 : vector<2x32xf32>
    %289 = arith.index_cast %253 : i32 to index
    %c0_94 = arith.constant 0 : index
    %c0_95 = arith.constant 0 : index
    %290 = vector.load %arg11[%289, %c0_94, %c0_95] : memref<8x2x192xf32, #tpu.memory_space<vmem>>, vector<1x2x192xf32>
    %291 = vector.shape_cast %290 : vector<1x2x192xf32> to vector<2x192xf32>
    %292 = arith.truncf %242 : vector<2x32xf32> to vector<2x32xbf16>
    %c0_96 = arith.constant 0 : index
    %c0_97 = arith.constant 0 : index
    %293 = vector.load %arg4[%c0_96, %c0_97] : memref<32x96xbf16, #tpu.memory_space<vmem>>, vector<32x96xbf16>
    %cst_98 = arith.constant dense<0.000000e+00> : vector<2x96xf32>
    %294 = tpu.matmul %292, %293, %cst_98 {dimension_numbers = #tpu.dot_dimension_numbers<[1], [0], [0], [1], [0, 0, 1, 1], [], []>} : vector<2x32xbf16>, vector<32x96xbf16>, vector<2x96xf32> -> vector<2x96xf32>
    %295 = vector.extract_strided_slice %291 {offsets = [0, 96], sizes = [2, 32], strides = [1, 1]} : vector<2x192xf32> to vector<2x32xf32>
    %296 = vector.extract_strided_slice %294 {offsets = [0, 0], sizes = [2, 32], strides = [1, 1]} : vector<2x96xf32> to vector<2x32xf32>
    %297 = arith.addf %295, %296 : vector<2x32xf32>
    %298 = arith.negf %297 : vector<2x32xf32>
    %299 = math.exp %298 : vector<2x32xf32>
    %cst_99 = arith.constant 1.000000e+00 : f32
    %300 = vector.broadcast %cst_99 : f32 to vector<2x32xf32>
    %301 = arith.addf %300, %299 : vector<2x32xf32>
    %302 = arith.divf %300, %301 : vector<2x32xf32>
    %303 = vector.extract_strided_slice %291 {offsets = [0, 128], sizes = [2, 32], strides = [1, 1]} : vector<2x192xf32> to vector<2x32xf32>
    %304 = vector.extract_strided_slice %294 {offsets = [0, 32], sizes = [2, 32], strides = [1, 1]} : vector<2x96xf32> to vector<2x32xf32>
    %305 = arith.addf %303, %304 : vector<2x32xf32>
    %306 = arith.negf %305 : vector<2x32xf32>
    %307 = math.exp %306 : vector<2x32xf32>
    %cst_100 = arith.constant 1.000000e+00 : f32
    %308 = vector.broadcast %cst_100 : f32 to vector<2x32xf32>
    %309 = arith.addf %308, %307 : vector<2x32xf32>
    %310 = arith.divf %308, %309 : vector<2x32xf32>
    %311 = vector.extract_strided_slice %291 {offsets = [0, 160], sizes = [2, 32], strides = [1, 1]} : vector<2x192xf32> to vector<2x32xf32>
    %312 = vector.extract_strided_slice %294 {offsets = [0, 64], sizes = [2, 32], strides = [1, 1]} : vector<2x96xf32> to vector<2x32xf32>
    %c0_101 = arith.constant 0 : index
    %c0_102 = arith.constant 0 : index
    %313 = vector.load %arg7[%c0_101, %c0_102] : memref<1x32xf32, #tpu.memory_space<vmem>>, vector<1x32xf32>
    %314 = vector.broadcast %313 : vector<1x32xf32> to vector<2x32xf32>
    %315 = arith.addf %312, %314 : vector<2x32xf32>
    %316 = arith.mulf %302, %315 : vector<2x32xf32>
    %317 = arith.addf %311, %316 : vector<2x32xf32>
    %318 = math.tanh %317 : vector<2x32xf32>
    %cst_103 = arith.constant 1.000000e+00 : f32
    %319 = vector.broadcast %cst_103 : f32 to vector<2x32xf32>
    %320 = arith.subf %319, %310 : vector<2x32xf32>
    %321 = arith.mulf %320, %318 : vector<2x32xf32>
    %322 = arith.mulf %310, %242 : vector<2x32xf32>
    %323 = arith.addf %321, %322 : vector<2x32xf32>
    %324 = arith.truncf %288 : vector<2x32xf32> to vector<2x32xbf16>
    %325 = arith.index_cast %c3_i32 : i32 to index
    %c0_104 = arith.constant 0 : index
    %c0_105 = arith.constant 0 : index
    %326 = vector.load %arg12[%325, %c0_104, %c0_105] : memref<8x2x64xbf16, #tpu.memory_space<vmem>>, vector<1x2x32xbf16>
    %327 = vector.shape_cast %326 : vector<1x2x32xbf16> to vector<2x32xbf16>
    %328 = vector.shape_cast %324 : vector<2x32xbf16> to vector<1x2x32xbf16>
    tpu.vector_store %arg12[%325, %c0_104, %c0_105], %328 {strides = array<i32>} : memref<8x2x64xbf16, #tpu.memory_space<vmem>>, vector<1x2x32xbf16>,
    %329 = arith.truncf %323 : vector<2x32xf32> to vector<2x32xbf16>
    %330 = arith.index_cast %253 : i32 to index
    %c0_106 = arith.constant 0 : index
    %c32_107 = arith.constant 32 : index
    %331 = vector.load %arg12[%330, %c0_106, %c32_107] : memref<8x2x64xbf16, #tpu.memory_space<vmem>>, vector<1x2x32xbf16>
    %332 = vector.shape_cast %331 : vector<1x2x32xbf16> to vector<2x32xbf16>
    %333 = vector.shape_cast %329 : vector<2x32xbf16> to vector<1x2x32xbf16>
    tpu.vector_store %arg12[%330, %c0_106, %c32_107], %333 {strides = array<i32>} : memref<8x2x64xbf16, #tpu.memory_space<vmem>>, vector<1x2x32xbf16>,
    %c4_i32 = arith.constant 4 : i32
    %c7_i32_108 = arith.constant 7 : i32
    %334 = arith.subi %c7_i32_108, %c4_i32 : i32
    %335 = arith.index_cast %c4_i32 : i32 to index
    %c0_109 = arith.constant 0 : index
    %c0_110 = arith.constant 0 : index
    %336 = vector.load %arg11[%335, %c0_109, %c0_110] : memref<8x2x192xf32, #tpu.memory_space<vmem>>, vector<1x2x192xf32>
    %337 = vector.shape_cast %336 : vector<1x2x192xf32> to vector<2x192xf32>
    %338 = arith.truncf %288 : vector<2x32xf32> to vector<2x32xbf16>
    %c0_111 = arith.constant 0 : index
    %c0_112 = arith.constant 0 : index
    %339 = vector.load %arg3[%c0_111, %c0_112] : memref<32x96xbf16, #tpu.memory_space<vmem>>, vector<32x96xbf16>
    %cst_113 = arith.constant dense<0.000000e+00> : vector<2x96xf32>
    %340 = tpu.matmul %338, %339, %cst_113 {dimension_numbers = #tpu.dot_dimension_numbers<[1], [0], [0], [1], [0, 0, 1, 1], [], []>} : vector<2x32xbf16>, vector<32x96xbf16>, vector<2x96xf32> -> vector<2x96xf32>
    %341 = vector.extract_strided_slice %337 {offsets = [0, 0], sizes = [2, 32], strides = [1, 1]} : vector<2x192xf32> to vector<2x32xf32>
    %342 = vector.extract_strided_slice %340 {offsets = [0, 0], sizes = [2, 32], strides = [1, 1]} : vector<2x96xf32> to vector<2x32xf32>
    %343 = arith.addf %341, %342 : vector<2x32xf32>
    %344 = arith.negf %343 : vector<2x32xf32>
    %345 = math.exp %344 : vector<2x32xf32>
    %cst_114 = arith.constant 1.000000e+00 : f32
    %346 = vector.broadcast %cst_114 : f32 to vector<2x32xf32>
    %347 = arith.addf %346, %345 : vector<2x32xf32>
    %348 = arith.divf %346, %347 : vector<2x32xf32>
    %349 = vector.extract_strided_slice %337 {offsets = [0, 32], sizes = [2, 32], strides = [1, 1]} : vector<2x192xf32> to vector<2x32xf32>
    %350 = vector.extract_strided_slice %340 {offsets = [0, 32], sizes = [2, 32], strides = [1, 1]} : vector<2x96xf32> to vector<2x32xf32>
    %351 = arith.addf %349, %350 : vector<2x32xf32>
    %352 = arith.negf %351 : vector<2x32xf32>
    %353 = math.exp %352 : vector<2x32xf32>
    %cst_115 = arith.constant 1.000000e+00 : f32
    %354 = vector.broadcast %cst_115 : f32 to vector<2x32xf32>
    %355 = arith.addf %354, %353 : vector<2x32xf32>
    %356 = arith.divf %354, %355 : vector<2x32xf32>
    %357 = vector.extract_strided_slice %337 {offsets = [0, 64], sizes = [2, 32], strides = [1, 1]} : vector<2x192xf32> to vector<2x32xf32>
    %358 = vector.extract_strided_slice %340 {offsets = [0, 64], sizes = [2, 32], strides = [1, 1]} : vector<2x96xf32> to vector<2x32xf32>
    %c0_116 = arith.constant 0 : index
    %c0_117 = arith.constant 0 : index
    %359 = vector.load %arg6[%c0_116, %c0_117] : memref<1x32xf32, #tpu.memory_space<vmem>>, vector<1x32xf32>
    %360 = vector.broadcast %359 : vector<1x32xf32> to vector<2x32xf32>
    %361 = arith.addf %358, %360 : vector<2x32xf32>
    %362 = arith.mulf %348, %361 : vector<2x32xf32>
    %363 = arith.addf %357, %362 : vector<2x32xf32>
    %364 = math.tanh %363 : vector<2x32xf32>
    %cst_118 = arith.constant 1.000000e+00 : f32
    %365 = vector.broadcast %cst_118 : f32 to vector<2x32xf32>
    %366 = arith.subf %365, %356 : vector<2x32xf32>
    %367 = arith.mulf %366, %364 : vector<2x32xf32>
    %368 = arith.mulf %356, %288 : vector<2x32xf32>
    %369 = arith.addf %367, %368 : vector<2x32xf32>
    %370 = arith.index_cast %334 : i32 to index
    %c0_119 = arith.constant 0 : index
    %c0_120 = arith.constant 0 : index
    %371 = vector.load %arg11[%370, %c0_119, %c0_120] : memref<8x2x192xf32, #tpu.memory_space<vmem>>, vector<1x2x192xf32>
    %372 = vector.shape_cast %371 : vector<1x2x192xf32> to vector<2x192xf32>
    %373 = arith.truncf %323 : vector<2x32xf32> to vector<2x32xbf16>
    %c0_121 = arith.constant 0 : index
    %c0_122 = arith.constant 0 : index
    %374 = vector.load %arg4[%c0_121, %c0_122] : memref<32x96xbf16, #tpu.memory_space<vmem>>, vector<32x96xbf16>
    %cst_123 = arith.constant dense<0.000000e+00> : vector<2x96xf32>
    %375 = tpu.matmul %373, %374, %cst_123 {dimension_numbers = #tpu.dot_dimension_numbers<[1], [0], [0], [1], [0, 0, 1, 1], [], []>} : vector<2x32xbf16>, vector<32x96xbf16>, vector<2x96xf32> -> vector<2x96xf32>
    %376 = vector.extract_strided_slice %372 {offsets = [0, 96], sizes = [2, 32], strides = [1, 1]} : vector<2x192xf32> to vector<2x32xf32>
    %377 = vector.extract_strided_slice %375 {offsets = [0, 0], sizes = [2, 32], strides = [1, 1]} : vector<2x96xf32> to vector<2x32xf32>
    %378 = arith.addf %376, %377 : vector<2x32xf32>
    %379 = arith.negf %378 : vector<2x32xf32>
    %380 = math.exp %379 : vector<2x32xf32>
    %cst_124 = arith.constant 1.000000e+00 : f32
    %381 = vector.broadcast %cst_124 : f32 to vector<2x32xf32>
    %382 = arith.addf %381, %380 : vector<2x32xf32>
    %383 = arith.divf %381, %382 : vector<2x32xf32>
    %384 = vector.extract_strided_slice %372 {offsets = [0, 128], sizes = [2, 32], strides = [1, 1]} : vector<2x192xf32> to vector<2x32xf32>
    %385 = vector.extract_strided_slice %375 {offsets = [0, 32], sizes = [2, 32], strides = [1, 1]} : vector<2x96xf32> to vector<2x32xf32>
    %386 = arith.addf %384, %385 : vector<2x32xf32>
    %387 = arith.negf %386 : vector<2x32xf32>
    %388 = math.exp %387 : vector<2x32xf32>
    %cst_125 = arith.constant 1.000000e+00 : f32
    %389 = vector.broadcast %cst_125 : f32 to vector<2x32xf32>
    %390 = arith.addf %389, %388 : vector<2x32xf32>
    %391 = arith.divf %389, %390 : vector<2x32xf32>
    %392 = vector.extract_strided_slice %372 {offsets = [0, 160], sizes = [2, 32], strides = [1, 1]} : vector<2x192xf32> to vector<2x32xf32>
    %393 = vector.extract_strided_slice %375 {offsets = [0, 64], sizes = [2, 32], strides = [1, 1]} : vector<2x96xf32> to vector<2x32xf32>
    %c0_126 = arith.constant 0 : index
    %c0_127 = arith.constant 0 : index
    %394 = vector.load %arg7[%c0_126, %c0_127] : memref<1x32xf32, #tpu.memory_space<vmem>>, vector<1x32xf32>
    %395 = vector.broadcast %394 : vector<1x32xf32> to vector<2x32xf32>
    %396 = arith.addf %393, %395 : vector<2x32xf32>
    %397 = arith.mulf %383, %396 : vector<2x32xf32>
    %398 = arith.addf %392, %397 : vector<2x32xf32>
    %399 = math.tanh %398 : vector<2x32xf32>
    %cst_128 = arith.constant 1.000000e+00 : f32
    %400 = vector.broadcast %cst_128 : f32 to vector<2x32xf32>
    %401 = arith.subf %400, %391 : vector<2x32xf32>
    %402 = arith.mulf %401, %399 : vector<2x32xf32>
    %403 = arith.mulf %391, %323 : vector<2x32xf32>
    %404 = arith.addf %402, %403 : vector<2x32xf32>
    %405 = arith.truncf %369 : vector<2x32xf32> to vector<2x32xbf16>
    %406 = arith.index_cast %c4_i32 : i32 to index
    %c0_129 = arith.constant 0 : index
    %c0_130 = arith.constant 0 : index
    %407 = vector.load %arg12[%406, %c0_129, %c0_130] : memref<8x2x64xbf16, #tpu.memory_space<vmem>>, vector<1x2x32xbf16>
    %408 = vector.shape_cast %407 : vector<1x2x32xbf16> to vector<2x32xbf16>
    %409 = vector.shape_cast %405 : vector<2x32xbf16> to vector<1x2x32xbf16>
    tpu.vector_store %arg12[%406, %c0_129, %c0_130], %409 {strides = array<i32>} : memref<8x2x64xbf16, #tpu.memory_space<vmem>>, vector<1x2x32xbf16>,
    %410 = arith.truncf %404 : vector<2x32xf32> to vector<2x32xbf16>
    %411 = arith.index_cast %334 : i32 to index
    %c0_131 = arith.constant 0 : index
    %c32_132 = arith.constant 32 : index
    %412 = vector.load %arg12[%411, %c0_131, %c32_132] : memref<8x2x64xbf16, #tpu.memory_space<vmem>>, vector<1x2x32xbf16>
    %413 = vector.shape_cast %412 : vector<1x2x32xbf16> to vector<2x32xbf16>
    %414 = vector.shape_cast %410 : vector<2x32xbf16> to vector<1x2x32xbf16>
    tpu.vector_store %arg12[%411, %c0_131, %c32_132], %414 {strides = array<i32>} : memref<8x2x64xbf16, #tpu.memory_space<vmem>>, vector<1x2x32xbf16>,
    %c5_i32 = arith.constant 5 : i32
    %c7_i32_133 = arith.constant 7 : i32
    %415 = arith.subi %c7_i32_133, %c5_i32 : i32
    %416 = arith.index_cast %c5_i32 : i32 to index
    %c0_134 = arith.constant 0 : index
    %c0_135 = arith.constant 0 : index
    %417 = vector.load %arg11[%416, %c0_134, %c0_135] : memref<8x2x192xf32, #tpu.memory_space<vmem>>, vector<1x2x192xf32>
    %418 = vector.shape_cast %417 : vector<1x2x192xf32> to vector<2x192xf32>
    %419 = arith.truncf %369 : vector<2x32xf32> to vector<2x32xbf16>
    %c0_136 = arith.constant 0 : index
    %c0_137 = arith.constant 0 : index
    %420 = vector.load %arg3[%c0_136, %c0_137] : memref<32x96xbf16, #tpu.memory_space<vmem>>, vector<32x96xbf16>
    %cst_138 = arith.constant dense<0.000000e+00> : vector<2x96xf32>
    %421 = tpu.matmul %419, %420, %cst_138 {dimension_numbers = #tpu.dot_dimension_numbers<[1], [0], [0], [1], [0, 0, 1, 1], [], []>} : vector<2x32xbf16>, vector<32x96xbf16>, vector<2x96xf32> -> vector<2x96xf32>
    %422 = vector.extract_strided_slice %418 {offsets = [0, 0], sizes = [2, 32], strides = [1, 1]} : vector<2x192xf32> to vector<2x32xf32>
    %423 = vector.extract_strided_slice %421 {offsets = [0, 0], sizes = [2, 32], strides = [1, 1]} : vector<2x96xf32> to vector<2x32xf32>
    %424 = arith.addf %422, %423 : vector<2x32xf32>
    %425 = arith.negf %424 : vector<2x32xf32>
    %426 = math.exp %425 : vector<2x32xf32>
    %cst_139 = arith.constant 1.000000e+00 : f32
    %427 = vector.broadcast %cst_139 : f32 to vector<2x32xf32>
    %428 = arith.addf %427, %426 : vector<2x32xf32>
    %429 = arith.divf %427, %428 : vector<2x32xf32>
    %430 = vector.extract_strided_slice %418 {offsets = [0, 32], sizes = [2, 32], strides = [1, 1]} : vector<2x192xf32> to vector<2x32xf32>
    %431 = vector.extract_strided_slice %421 {offsets = [0, 32], sizes = [2, 32], strides = [1, 1]} : vector<2x96xf32> to vector<2x32xf32>
    %432 = arith.addf %430, %431 : vector<2x32xf32>
    %433 = arith.negf %432 : vector<2x32xf32>
    %434 = math.exp %433 : vector<2x32xf32>
    %cst_140 = arith.constant 1.000000e+00 : f32
    %435 = vector.broadcast %cst_140 : f32 to vector<2x32xf32>
    %436 = arith.addf %435, %434 : vector<2x32xf32>
    %437 = arith.divf %435, %436 : vector<2x32xf32>
    %438 = vector.extract_strided_slice %418 {offsets = [0, 64], sizes = [2, 32], strides = [1, 1]} : vector<2x192xf32> to vector<2x32xf32>
    %439 = vector.extract_strided_slice %421 {offsets = [0, 64], sizes = [2, 32], strides = [1, 1]} : vector<2x96xf32> to vector<2x32xf32>
    %c0_141 = arith.constant 0 : index
    %c0_142 = arith.constant 0 : index
    %440 = vector.load %arg6[%c0_141, %c0_142] : memref<1x32xf32, #tpu.memory_space<vmem>>, vector<1x32xf32>
    %441 = vector.broadcast %440 : vector<1x32xf32> to vector<2x32xf32>
    %442 = arith.addf %439, %441 : vector<2x32xf32>
    %443 = arith.mulf %429, %442 : vector<2x32xf32>
    %444 = arith.addf %438, %443 : vector<2x32xf32>
    %445 = math.tanh %444 : vector<2x32xf32>
    %cst_143 = arith.constant 1.000000e+00 : f32
    %446 = vector.broadcast %cst_143 : f32 to vector<2x32xf32>
    %447 = arith.subf %446, %437 : vector<2x32xf32>
    %448 = arith.mulf %447, %445 : vector<2x32xf32>
    %449 = arith.mulf %437, %369 : vector<2x32xf32>
    %450 = arith.addf %448, %449 : vector<2x32xf32>
    %451 = arith.index_cast %415 : i32 to index
    %c0_144 = arith.constant 0 : index
    %c0_145 = arith.constant 0 : index
    %452 = vector.load %arg11[%451, %c0_144, %c0_145] : memref<8x2x192xf32, #tpu.memory_space<vmem>>, vector<1x2x192xf32>
    %453 = vector.shape_cast %452 : vector<1x2x192xf32> to vector<2x192xf32>
    %454 = arith.truncf %404 : vector<2x32xf32> to vector<2x32xbf16>
    %c0_146 = arith.constant 0 : index
    %c0_147 = arith.constant 0 : index
    %455 = vector.load %arg4[%c0_146, %c0_147] : memref<32x96xbf16, #tpu.memory_space<vmem>>, vector<32x96xbf16>
    %cst_148 = arith.constant dense<0.000000e+00> : vector<2x96xf32>
    %456 = tpu.matmul %454, %455, %cst_148 {dimension_numbers = #tpu.dot_dimension_numbers<[1], [0], [0], [1], [0, 0, 1, 1], [], []>} : vector<2x32xbf16>, vector<32x96xbf16>, vector<2x96xf32> -> vector<2x96xf32>
    %457 = vector.extract_strided_slice %453 {offsets = [0, 96], sizes = [2, 32], strides = [1, 1]} : vector<2x192xf32> to vector<2x32xf32>
    %458 = vector.extract_strided_slice %456 {offsets = [0, 0], sizes = [2, 32], strides = [1, 1]} : vector<2x96xf32> to vector<2x32xf32>
    %459 = arith.addf %457, %458 : vector<2x32xf32>
    %460 = arith.negf %459 : vector<2x32xf32>
    %461 = math.exp %460 : vector<2x32xf32>
    %cst_149 = arith.constant 1.000000e+00 : f32
    %462 = vector.broadcast %cst_149 : f32 to vector<2x32xf32>
    %463 = arith.addf %462, %461 : vector<2x32xf32>
    %464 = arith.divf %462, %463 : vector<2x32xf32>
    %465 = vector.extract_strided_slice %453 {offsets = [0, 128], sizes = [2, 32], strides = [1, 1]} : vector<2x192xf32> to vector<2x32xf32>
    %466 = vector.extract_strided_slice %456 {offsets = [0, 32], sizes = [2, 32], strides = [1, 1]} : vector<2x96xf32> to vector<2x32xf32>
    %467 = arith.addf %465, %466 : vector<2x32xf32>
    %468 = arith.negf %467 : vector<2x32xf32>
    %469 = math.exp %468 : vector<2x32xf32>
    %cst_150 = arith.constant 1.000000e+00 : f32
    %470 = vector.broadcast %cst_150 : f32 to vector<2x32xf32>
    %471 = arith.addf %470, %469 : vector<2x32xf32>
    %472 = arith.divf %470, %471 : vector<2x32xf32>
    %473 = vector.extract_strided_slice %453 {offsets = [0, 160], sizes = [2, 32], strides = [1, 1]} : vector<2x192xf32> to vector<2x32xf32>
    %474 = vector.extract_strided_slice %456 {offsets = [0, 64], sizes = [2, 32], strides = [1, 1]} : vector<2x96xf32> to vector<2x32xf32>
    %c0_151 = arith.constant 0 : index
    %c0_152 = arith.constant 0 : index
    %475 = vector.load %arg7[%c0_151, %c0_152] : memref<1x32xf32, #tpu.memory_space<vmem>>, vector<1x32xf32>
    %476 = vector.broadcast %475 : vector<1x32xf32> to vector<2x32xf32>
    %477 = arith.addf %474, %476 : vector<2x32xf32>
    %478 = arith.mulf %464, %477 : vector<2x32xf32>
    %479 = arith.addf %473, %478 : vector<2x32xf32>
    %480 = math.tanh %479 : vector<2x32xf32>
    %cst_153 = arith.constant 1.000000e+00 : f32
    %481 = vector.broadcast %cst_153 : f32 to vector<2x32xf32>
    %482 = arith.subf %481, %472 : vector<2x32xf32>
    %483 = arith.mulf %482, %480 : vector<2x32xf32>
    %484 = arith.mulf %472, %404 : vector<2x32xf32>
    %485 = arith.addf %483, %484 : vector<2x32xf32>
    %486 = arith.truncf %450 : vector<2x32xf32> to vector<2x32xbf16>
    %487 = arith.index_cast %c5_i32 : i32 to index
    %c0_154 = arith.constant 0 : index
    %c0_155 = arith.constant 0 : index
    %488 = vector.load %arg12[%487, %c0_154, %c0_155] : memref<8x2x64xbf16, #tpu.memory_space<vmem>>, vector<1x2x32xbf16>
    %489 = vector.shape_cast %488 : vector<1x2x32xbf16> to vector<2x32xbf16>
    %490 = vector.shape_cast %486 : vector<2x32xbf16> to vector<1x2x32xbf16>
    tpu.vector_store %arg12[%487, %c0_154, %c0_155], %490 {strides = array<i32>} : memref<8x2x64xbf16, #tpu.memory_space<vmem>>, vector<1x2x32xbf16>,
    %491 = arith.truncf %485 : vector<2x32xf32> to vector<2x32xbf16>
    %492 = arith.index_cast %415 : i32 to index
    %c0_156 = arith.constant 0 : index
    %c32_157 = arith.constant 32 : index
    %493 = vector.load %arg12[%492, %c0_156, %c32_157] : memref<8x2x64xbf16, #tpu.memory_space<vmem>>, vector<1x2x32xbf16>
    %494 = vector.shape_cast %493 : vector<1x2x32xbf16> to vector<2x32xbf16>
    %495 = vector.shape_cast %491 : vector<2x32xbf16> to vector<1x2x32xbf16>
    tpu.vector_store %arg12[%492, %c0_156, %c32_157], %495 {strides = array<i32>} : memref<8x2x64xbf16, #tpu.memory_space<vmem>>, vector<1x2x32xbf16>,
    %c6_i32 = arith.constant 6 : i32
    %c7_i32_158 = arith.constant 7 : i32
    %496 = arith.subi %c7_i32_158, %c6_i32 : i32
    %497 = arith.index_cast %c6_i32 : i32 to index
    %c0_159 = arith.constant 0 : index
    %c0_160 = arith.constant 0 : index
    %498 = vector.load %arg11[%497, %c0_159, %c0_160] : memref<8x2x192xf32, #tpu.memory_space<vmem>>, vector<1x2x192xf32>
    %499 = vector.shape_cast %498 : vector<1x2x192xf32> to vector<2x192xf32>
    %500 = arith.truncf %450 : vector<2x32xf32> to vector<2x32xbf16>
    %c0_161 = arith.constant 0 : index
    %c0_162 = arith.constant 0 : index
    %501 = vector.load %arg3[%c0_161, %c0_162] : memref<32x96xbf16, #tpu.memory_space<vmem>>, vector<32x96xbf16>
    %cst_163 = arith.constant dense<0.000000e+00> : vector<2x96xf32>
    %502 = tpu.matmul %500, %501, %cst_163 {dimension_numbers = #tpu.dot_dimension_numbers<[1], [0], [0], [1], [0, 0, 1, 1], [], []>} : vector<2x32xbf16>, vector<32x96xbf16>, vector<2x96xf32> -> vector<2x96xf32>
    %503 = vector.extract_strided_slice %499 {offsets = [0, 0], sizes = [2, 32], strides = [1, 1]} : vector<2x192xf32> to vector<2x32xf32>
    %504 = vector.extract_strided_slice %502 {offsets = [0, 0], sizes = [2, 32], strides = [1, 1]} : vector<2x96xf32> to vector<2x32xf32>
    %505 = arith.addf %503, %504 : vector<2x32xf32>
    %506 = arith.negf %505 : vector<2x32xf32>
    %507 = math.exp %506 : vector<2x32xf32>
    %cst_164 = arith.constant 1.000000e+00 : f32
    %508 = vector.broadcast %cst_164 : f32 to vector<2x32xf32>
    %509 = arith.addf %508, %507 : vector<2x32xf32>
    %510 = arith.divf %508, %509 : vector<2x32xf32>
    %511 = vector.extract_strided_slice %499 {offsets = [0, 32], sizes = [2, 32], strides = [1, 1]} : vector<2x192xf32> to vector<2x32xf32>
    %512 = vector.extract_strided_slice %502 {offsets = [0, 32], sizes = [2, 32], strides = [1, 1]} : vector<2x96xf32> to vector<2x32xf32>
    %513 = arith.addf %511, %512 : vector<2x32xf32>
    %514 = arith.negf %513 : vector<2x32xf32>
    %515 = math.exp %514 : vector<2x32xf32>
    %cst_165 = arith.constant 1.000000e+00 : f32
    %516 = vector.broadcast %cst_165 : f32 to vector<2x32xf32>
    %517 = arith.addf %516, %515 : vector<2x32xf32>
    %518 = arith.divf %516, %517 : vector<2x32xf32>
    %519 = vector.extract_strided_slice %499 {offsets = [0, 64], sizes = [2, 32], strides = [1, 1]} : vector<2x192xf32> to vector<2x32xf32>
    %520 = vector.extract_strided_slice %502 {offsets = [0, 64], sizes = [2, 32], strides = [1, 1]} : vector<2x96xf32> to vector<2x32xf32>
    %c0_166 = arith.constant 0 : index
    %c0_167 = arith.constant 0 : index
    %521 = vector.load %arg6[%c0_166, %c0_167] : memref<1x32xf32, #tpu.memory_space<vmem>>, vector<1x32xf32>
    %522 = vector.broadcast %521 : vector<1x32xf32> to vector<2x32xf32>
    %523 = arith.addf %520, %522 : vector<2x32xf32>
    %524 = arith.mulf %510, %523 : vector<2x32xf32>
    %525 = arith.addf %519, %524 : vector<2x32xf32>
    %526 = math.tanh %525 : vector<2x32xf32>
    %cst_168 = arith.constant 1.000000e+00 : f32
    %527 = vector.broadcast %cst_168 : f32 to vector<2x32xf32>
    %528 = arith.subf %527, %518 : vector<2x32xf32>
    %529 = arith.mulf %528, %526 : vector<2x32xf32>
    %530 = arith.mulf %518, %450 : vector<2x32xf32>
    %531 = arith.addf %529, %530 : vector<2x32xf32>
    %532 = arith.index_cast %496 : i32 to index
    %c0_169 = arith.constant 0 : index
    %c0_170 = arith.constant 0 : index
    %533 = vector.load %arg11[%532, %c0_169, %c0_170] : memref<8x2x192xf32, #tpu.memory_space<vmem>>, vector<1x2x192xf32>
    %534 = vector.shape_cast %533 : vector<1x2x192xf32> to vector<2x192xf32>
    %535 = arith.truncf %485 : vector<2x32xf32> to vector<2x32xbf16>
    %c0_171 = arith.constant 0 : index
    %c0_172 = arith.constant 0 : index
    %536 = vector.load %arg4[%c0_171, %c0_172] : memref<32x96xbf16, #tpu.memory_space<vmem>>, vector<32x96xbf16>
    %cst_173 = arith.constant dense<0.000000e+00> : vector<2x96xf32>
    %537 = tpu.matmul %535, %536, %cst_173 {dimension_numbers = #tpu.dot_dimension_numbers<[1], [0], [0], [1], [0, 0, 1, 1], [], []>} : vector<2x32xbf16>, vector<32x96xbf16>, vector<2x96xf32> -> vector<2x96xf32>
    %538 = vector.extract_strided_slice %534 {offsets = [0, 96], sizes = [2, 32], strides = [1, 1]} : vector<2x192xf32> to vector<2x32xf32>
    %539 = vector.extract_strided_slice %537 {offsets = [0, 0], sizes = [2, 32], strides = [1, 1]} : vector<2x96xf32> to vector<2x32xf32>
    %540 = arith.addf %538, %539 : vector<2x32xf32>
    %541 = arith.negf %540 : vector<2x32xf32>
    %542 = math.exp %541 : vector<2x32xf32>
    %cst_174 = arith.constant 1.000000e+00 : f32
    %543 = vector.broadcast %cst_174 : f32 to vector<2x32xf32>
    %544 = arith.addf %543, %542 : vector<2x32xf32>
    %545 = arith.divf %543, %544 : vector<2x32xf32>
    %546 = vector.extract_strided_slice %534 {offsets = [0, 128], sizes = [2, 32], strides = [1, 1]} : vector<2x192xf32> to vector<2x32xf32>
    %547 = vector.extract_strided_slice %537 {offsets = [0, 32], sizes = [2, 32], strides = [1, 1]} : vector<2x96xf32> to vector<2x32xf32>
    %548 = arith.addf %546, %547 : vector<2x32xf32>
    %549 = arith.negf %548 : vector<2x32xf32>
    %550 = math.exp %549 : vector<2x32xf32>
    %cst_175 = arith.constant 1.000000e+00 : f32
    %551 = vector.broadcast %cst_175 : f32 to vector<2x32xf32>
    %552 = arith.addf %551, %550 : vector<2x32xf32>
    %553 = arith.divf %551, %552 : vector<2x32xf32>
    %554 = vector.extract_strided_slice %534 {offsets = [0, 160], sizes = [2, 32], strides = [1, 1]} : vector<2x192xf32> to vector<2x32xf32>
    %555 = vector.extract_strided_slice %537 {offsets = [0, 64], sizes = [2, 32], strides = [1, 1]} : vector<2x96xf32> to vector<2x32xf32>
    %c0_176 = arith.constant 0 : index
    %c0_177 = arith.constant 0 : index
    %556 = vector.load %arg7[%c0_176, %c0_177] : memref<1x32xf32, #tpu.memory_space<vmem>>, vector<1x32xf32>
    %557 = vector.broadcast %556 : vector<1x32xf32> to vector<2x32xf32>
    %558 = arith.addf %555, %557 : vector<2x32xf32>
    %559 = arith.mulf %545, %558 : vector<2x32xf32>
    %560 = arith.addf %554, %559 : vector<2x32xf32>
    %561 = math.tanh %560 : vector<2x32xf32>
    %cst_178 = arith.constant 1.000000e+00 : f32
    %562 = vector.broadcast %cst_178 : f32 to vector<2x32xf32>
    %563 = arith.subf %562, %553 : vector<2x32xf32>
    %564 = arith.mulf %563, %561 : vector<2x32xf32>
    %565 = arith.mulf %553, %485 : vector<2x32xf32>
    %566 = arith.addf %564, %565 : vector<2x32xf32>
    %567 = arith.truncf %531 : vector<2x32xf32> to vector<2x32xbf16>
    %568 = arith.index_cast %c6_i32 : i32 to index
    %c0_179 = arith.constant 0 : index
    %c0_180 = arith.constant 0 : index
    %569 = vector.load %arg12[%568, %c0_179, %c0_180] : memref<8x2x64xbf16, #tpu.memory_space<vmem>>, vector<1x2x32xbf16>
    %570 = vector.shape_cast %569 : vector<1x2x32xbf16> to vector<2x32xbf16>
    %571 = vector.shape_cast %567 : vector<2x32xbf16> to vector<1x2x32xbf16>
    tpu.vector_store %arg12[%568, %c0_179, %c0_180], %571 {strides = array<i32>} : memref<8x2x64xbf16, #tpu.memory_space<vmem>>, vector<1x2x32xbf16>,
    %572 = arith.truncf %566 : vector<2x32xf32> to vector<2x32xbf16>
    %573 = arith.index_cast %496 : i32 to index
    %c0_181 = arith.constant 0 : index
    %c32_182 = arith.constant 32 : index
    %574 = vector.load %arg12[%573, %c0_181, %c32_182] : memref<8x2x64xbf16, #tpu.memory_space<vmem>>, vector<1x2x32xbf16>
    %575 = vector.shape_cast %574 : vector<1x2x32xbf16> to vector<2x32xbf16>
    %576 = vector.shape_cast %572 : vector<2x32xbf16> to vector<1x2x32xbf16>
    tpu.vector_store %arg12[%573, %c0_181, %c32_182], %576 {strides = array<i32>} : memref<8x2x64xbf16, #tpu.memory_space<vmem>>, vector<1x2x32xbf16>,
    %c7_i32_183 = arith.constant 7 : i32
    %c7_i32_184 = arith.constant 7 : i32
    %577 = arith.subi %c7_i32_184, %c7_i32_183 : i32
    %578 = arith.index_cast %c7_i32_183 : i32 to index
    %c0_185 = arith.constant 0 : index
    %c0_186 = arith.constant 0 : index
    %579 = vector.load %arg11[%578, %c0_185, %c0_186] : memref<8x2x192xf32, #tpu.memory_space<vmem>>, vector<1x2x192xf32>
    %580 = vector.shape_cast %579 : vector<1x2x192xf32> to vector<2x192xf32>
    %581 = arith.truncf %531 : vector<2x32xf32> to vector<2x32xbf16>
    %c0_187 = arith.constant 0 : index
    %c0_188 = arith.constant 0 : index
    %582 = vector.load %arg3[%c0_187, %c0_188] : memref<32x96xbf16, #tpu.memory_space<vmem>>, vector<32x96xbf16>
    %cst_189 = arith.constant dense<0.000000e+00> : vector<2x96xf32>
    %583 = tpu.matmul %581, %582, %cst_189 {dimension_numbers = #tpu.dot_dimension_numbers<[1], [0], [0], [1], [0, 0, 1, 1], [], []>} : vector<2x32xbf16>, vector<32x96xbf16>, vector<2x96xf32> -> vector<2x96xf32>
    %584 = vector.extract_strided_slice %580 {offsets = [0, 0], sizes = [2, 32], strides = [1, 1]} : vector<2x192xf32> to vector<2x32xf32>
    %585 = vector.extract_strided_slice %583 {offsets = [0, 0], sizes = [2, 32], strides = [1, 1]} : vector<2x96xf32> to vector<2x32xf32>
    %586 = arith.addf %584, %585 : vector<2x32xf32>
    %587 = arith.negf %586 : vector<2x32xf32>
    %588 = math.exp %587 : vector<2x32xf32>
    %cst_190 = arith.constant 1.000000e+00 : f32
    %589 = vector.broadcast %cst_190 : f32 to vector<2x32xf32>
    %590 = arith.addf %589, %588 : vector<2x32xf32>
    %591 = arith.divf %589, %590 : vector<2x32xf32>
    %592 = vector.extract_strided_slice %580 {offsets = [0, 32], sizes = [2, 32], strides = [1, 1]} : vector<2x192xf32> to vector<2x32xf32>
    %593 = vector.extract_strided_slice %583 {offsets = [0, 32], sizes = [2, 32], strides = [1, 1]} : vector<2x96xf32> to vector<2x32xf32>
    %594 = arith.addf %592, %593 : vector<2x32xf32>
    %595 = arith.negf %594 : vector<2x32xf32>
    %596 = math.exp %595 : vector<2x32xf32>
    %cst_191 = arith.constant 1.000000e+00 : f32
    %597 = vector.broadcast %cst_191 : f32 to vector<2x32xf32>
    %598 = arith.addf %597, %596 : vector<2x32xf32>
    %599 = arith.divf %597, %598 : vector<2x32xf32>
    %600 = vector.extract_strided_slice %580 {offsets = [0, 64], sizes = [2, 32], strides = [1, 1]} : vector<2x192xf32> to vector<2x32xf32>
    %601 = vector.extract_strided_slice %583 {offsets = [0, 64], sizes = [2, 32], strides = [1, 1]} : vector<2x96xf32> to vector<2x32xf32>
    %c0_192 = arith.constant 0 : index
    %c0_193 = arith.constant 0 : index
    %602 = vector.load %arg6[%c0_192, %c0_193] : memref<1x32xf32, #tpu.memory_space<vmem>>, vector<1x32xf32>
    %603 = vector.broadcast %602 : vector<1x32xf32> to vector<2x32xf32>
    %604 = arith.addf %601, %603 : vector<2x32xf32>
    %605 = arith.mulf %591, %604 : vector<2x32xf32>
    %606 = arith.addf %600, %605 : vector<2x32xf32>
    %607 = math.tanh %606 : vector<2x32xf32>
    %cst_194 = arith.constant 1.000000e+00 : f32
    %608 = vector.broadcast %cst_194 : f32 to vector<2x32xf32>
    %609 = arith.subf %608, %599 : vector<2x32xf32>
    %610 = arith.mulf %609, %607 : vector<2x32xf32>
    %611 = arith.mulf %599, %531 : vector<2x32xf32>
    %612 = arith.addf %610, %611 : vector<2x32xf32>
    %613 = arith.index_cast %577 : i32 to index
    %c0_195 = arith.constant 0 : index
    %c0_196 = arith.constant 0 : index
    %614 = vector.load %arg11[%613, %c0_195, %c0_196] : memref<8x2x192xf32, #tpu.memory_space<vmem>>, vector<1x2x192xf32>
    %615 = vector.shape_cast %614 : vector<1x2x192xf32> to vector<2x192xf32>
    %616 = arith.truncf %566 : vector<2x32xf32> to vector<2x32xbf16>
    %c0_197 = arith.constant 0 : index
    %c0_198 = arith.constant 0 : index
    %617 = vector.load %arg4[%c0_197, %c0_198] : memref<32x96xbf16, #tpu.memory_space<vmem>>, vector<32x96xbf16>
    %cst_199 = arith.constant dense<0.000000e+00> : vector<2x96xf32>
    %618 = tpu.matmul %616, %617, %cst_199 {dimension_numbers = #tpu.dot_dimension_numbers<[1], [0], [0], [1], [0, 0, 1, 1], [], []>} : vector<2x32xbf16>, vector<32x96xbf16>, vector<2x96xf32> -> vector<2x96xf32>
    %619 = vector.extract_strided_slice %615 {offsets = [0, 96], sizes = [2, 32], strides = [1, 1]} : vector<2x192xf32> to vector<2x32xf32>
    %620 = vector.extract_strided_slice %618 {offsets = [0, 0], sizes = [2, 32], strides = [1, 1]} : vector<2x96xf32> to vector<2x32xf32>
    %621 = arith.addf %619, %620 : vector<2x32xf32>
    %622 = arith.negf %621 : vector<2x32xf32>
    %623 = math.exp %622 : vector<2x32xf32>
    %cst_200 = arith.constant 1.000000e+00 : f32
    %624 = vector.broadcast %cst_200 : f32 to vector<2x32xf32>
    %625 = arith.addf %624, %623 : vector<2x32xf32>
    %626 = arith.divf %624, %625 : vector<2x32xf32>
    %627 = vector.extract_strided_slice %615 {offsets = [0, 128], sizes = [2, 32], strides = [1, 1]} : vector<2x192xf32> to vector<2x32xf32>
    %628 = vector.extract_strided_slice %618 {offsets = [0, 32], sizes = [2, 32], strides = [1, 1]} : vector<2x96xf32> to vector<2x32xf32>
    %629 = arith.addf %627, %628 : vector<2x32xf32>
    %630 = arith.negf %629 : vector<2x32xf32>
    %631 = math.exp %630 : vector<2x32xf32>
    %cst_201 = arith.constant 1.000000e+00 : f32
    %632 = vector.broadcast %cst_201 : f32 to vector<2x32xf32>
    %633 = arith.addf %632, %631 : vector<2x32xf32>
    %634 = arith.divf %632, %633 : vector<2x32xf32>
    %635 = vector.extract_strided_slice %615 {offsets = [0, 160], sizes = [2, 32], strides = [1, 1]} : vector<2x192xf32> to vector<2x32xf32>
    %636 = vector.extract_strided_slice %618 {offsets = [0, 64], sizes = [2, 32], strides = [1, 1]} : vector<2x96xf32> to vector<2x32xf32>
    %c0_202 = arith.constant 0 : index
    %c0_203 = arith.constant 0 : index
    %637 = vector.load %arg7[%c0_202, %c0_203] : memref<1x32xf32, #tpu.memory_space<vmem>>, vector<1x32xf32>
    %638 = vector.broadcast %637 : vector<1x32xf32> to vector<2x32xf32>
    %639 = arith.addf %636, %638 : vector<2x32xf32>
    %640 = arith.mulf %626, %639 : vector<2x32xf32>
    %641 = arith.addf %635, %640 : vector<2x32xf32>
    %642 = math.tanh %641 : vector<2x32xf32>
    %cst_204 = arith.constant 1.000000e+00 : f32
    %643 = vector.broadcast %cst_204 : f32 to vector<2x32xf32>
    %644 = arith.subf %643, %634 : vector<2x32xf32>
    %645 = arith.mulf %644, %642 : vector<2x32xf32>
    %646 = arith.mulf %634, %566 : vector<2x32xf32>
    %647 = arith.addf %645, %646 : vector<2x32xf32>
    %648 = arith.truncf %612 : vector<2x32xf32> to vector<2x32xbf16>
    %649 = arith.index_cast %c7_i32_183 : i32 to index
    %c0_205 = arith.constant 0 : index
    %c0_206 = arith.constant 0 : index
    %650 = vector.load %arg12[%649, %c0_205, %c0_206] : memref<8x2x64xbf16, #tpu.memory_space<vmem>>, vector<1x2x32xbf16>
    %651 = vector.shape_cast %650 : vector<1x2x32xbf16> to vector<2x32xbf16>
    %652 = vector.shape_cast %648 : vector<2x32xbf16> to vector<1x2x32xbf16>
    tpu.vector_store %arg12[%649, %c0_205, %c0_206], %652 {strides = array<i32>} : memref<8x2x64xbf16, #tpu.memory_space<vmem>>, vector<1x2x32xbf16>,
    %653 = arith.truncf %647 : vector<2x32xf32> to vector<2x32xbf16>
    %654 = arith.index_cast %577 : i32 to index
    %c0_207 = arith.constant 0 : index
    %c32_208 = arith.constant 32 : index
    %655 = vector.load %arg12[%654, %c0_207, %c32_208] : memref<8x2x64xbf16, #tpu.memory_space<vmem>>, vector<1x2x32xbf16>
    %656 = vector.shape_cast %655 : vector<1x2x32xbf16> to vector<2x32xbf16>
    %657 = vector.shape_cast %653 : vector<2x32xbf16> to vector<1x2x32xbf16>
    tpu.vector_store %arg12[%654, %c0_207, %c32_208], %657 {strides = array<i32>} : memref<8x2x64xbf16, #tpu.memory_space<vmem>>, vector<1x2x32xbf16>,
    %c8_i32 = arith.constant 8 : i32
    %c0_209 = arith.constant 0 : index
    %c0_210 = arith.constant 0 : index
    %c0_211 = arith.constant 0 : index
    %658 = vector.load %arg12[%c0_209, %c0_210, %c0_211] : memref<8x2x64xbf16, #tpu.memory_space<vmem>>, vector<8x2x64xbf16>
    %659 = vector.shape_cast %658 : vector<8x2x64xbf16> to vector<16x64xbf16>
    %c0_212 = arith.constant 0 : index
    %c0_213 = arith.constant 0 : index
    %660 = vector.load %arg8[%c0_212, %c0_213] : memref<64x8xbf16, #tpu.memory_space<vmem>>, vector<64x8xbf16>
    %cst_214 = arith.constant dense<0.000000e+00> : vector<16x8xf32>
    %661 = tpu.matmul %659, %660, %cst_214 {dimension_numbers = #tpu.dot_dimension_numbers<[1], [0], [0], [1], [0, 0, 1, 1], [], []>} : vector<16x64xbf16>, vector<64x8xbf16>, vector<16x8xf32> -> vector<16x8xf32>
    %c0_215 = arith.constant 0 : index
    %c0_216 = arith.constant 0 : index
    %662 = vector.load %arg9[%c0_215, %c0_216] : memref<1x8xf32, #tpu.memory_space<vmem>>, vector<1x8xf32>
    %663 = vector.broadcast %662 : vector<1x8xf32> to vector<16x8xf32>
    %664 = arith.addf %661, %663 : vector<16x8xf32>
    %665 = vector.shape_cast %664 : vector<16x8xf32> to vector<8x2x8xf32>
    %c0_217 = arith.constant 0 : index
    %c0_218 = arith.constant 0 : index
    %c0_219 = arith.constant 0 : index
    %666 = vector.load %arg10[%c0_217, %c0_218, %c0_219] : memref<8x2x8xf32, #tpu.memory_space<vmem>>, vector<8x2x8xf32>
    tpu.vector_store %arg10[%c0_217, %c0_218, %c0_219], %665 {strides = array<i32>} : memref<8x2x8xf32, #tpu.memory_space<vmem>>, vector<8x2x8xf32>,
    return
  }
  func.func @transform_0(%arg0: i32) -> (i32, i32, i32) {
    %c0_i32 = arith.constant 0 : i32
    %c0_i32_0 = arith.constant 0 : i32
    %c0_i32_1 = arith.constant 0 : i32
    return %c0_i32, %arg0, %c0_i32_0 : i32, i32, i32
  }
  func.func @transform_1(%arg0: i32) -> (i32, i32) {
    %c0_i32 = arith.constant 0 : i32
    %c0_i32_0 = arith.constant 0 : i32
    %c0_i32_1 = arith.constant 0 : i32
    return %c0_i32, %c0_i32_0 : i32, i32
  }
  func.func @transform_2(%arg0: i32) -> (i32, i32) {
    %c0_i32 = arith.constant 0 : i32
    %c0_i32_0 = arith.constant 0 : i32
    %c0_i32_1 = arith.constant 0 : i32
    return %c0_i32, %c0_i32_0 : i32, i32
  }
  func.func @transform_3(%arg0: i32) -> (i32, i32) {
    %c0_i32 = arith.constant 0 : i32
    %c0_i32_0 = arith.constant 0 : i32
    %c0_i32_1 = arith.constant 0 : i32
    return %c0_i32, %c0_i32_0 : i32, i32
  }
  func.func @transform_4(%arg0: i32) -> (i32, i32) {
    %c0_i32 = arith.constant 0 : i32
    %c0_i32_0 = arith.constant 0 : i32
    %c0_i32_1 = arith.constant 0 : i32
    return %c0_i32, %c0_i32_0 : i32, i32
  }
  func.func @transform_5(%arg0: i32) -> (i32, i32) {
    %c0_i32 = arith.constant 0 : i32
    %c0_i32_0 = arith.constant 0 : i32
    %c0_i32_1 = arith.constant 0 : i32
    return %c0_i32, %c0_i32_0 : i32, i32
  }
  func.func @transform_6(%arg0: i32) -> (i32, i32) {
    %c0_i32 = arith.constant 0 : i32
    %c0_i32_0 = arith.constant 0 : i32
    %c0_i32_1 = arith.constant 0 : i32
    return %c0_i32, %c0_i32_0 : i32, i32
  }
  func.func @transform_7(%arg0: i32) -> (i32, i32) {
    %c0_i32 = arith.constant 0 : i32
    %c0_i32_0 = arith.constant 0 : i32
    %c0_i32_1 = arith.constant 0 : i32
    return %c0_i32, %c0_i32_0 : i32, i32
  }
  func.func @transform_8(%arg0: i32) -> (i32, i32) {
    %c0_i32 = arith.constant 0 : i32
    %c0_i32_0 = arith.constant 0 : i32
    %c0_i32_1 = arith.constant 0 : i32
    return %c0_i32, %c0_i32_0 : i32, i32
  }
  func.func @transform_9(%arg0: i32) -> (i32, i32, i32) {
    %c0_i32 = arith.constant 0 : i32
    %c0_i32_0 = arith.constant 0 : i32
    %c0_i32_1 = arith.constant 0 : i32
    return %c0_i32, %arg0, %c0_i32_0 : i32, i32, i32
  }
}

</mosaic_0001>

<bundles_post_ra>
// kernel: token_classificator_forward.2
= control target key start
LH: loop header
LB: loop body
LE: loop exit
PB: predicated region body
PF: predicated region fallthrough
CT: control target
= control target key end

     0   :  { %v41_v0 = vlaneseq  ;;  %v2857_v1 = vmov 0.0   ;;  %vm2858_vm0 = vmmov 0   ;;  %v2859_v4 = vmov 0   ;;  %s2861_s30 = smov 64   ;;  %s2863_s12 = smov 96   ;;  %s3531_s2 = inlined_call_operand.vmem [shape: bf16[32,96], index: 2, kind: input, shape index: {}]   ;;  %s3532_s1 = inlined_call_operand.vmem [shape: bf16[32,192], index: 1, kind: input, shape index: {}]   ;;  %s3533_s0 = inlined_call_operand.vmem [shape: bf16[8,2,32], index: 0, kind: input, shape index: {}]   ;;  %s3534_s5 = inlined_call_operand.vmem [shape: f32[1,32], index: 5, kind: input, shape index: {}]   ;;  %s3535_s4 = inlined_call_operand.vmem [shape: f32[1,192], index: 4, kind: input, shape index: {}]   ;;  %s3536_s3 = inlined_call_operand.vmem [shape: bf16[32,96], index: 3, kind: input, shape index: {}]   ;;  %s3537_s6 = inlined_call_operand.vmem [shape: f32[1,32], index: 6, kind: input, shape index: {}]   ;;  %s3538_s7 = inlined_call_operand.vmem [shape: bf16[8,2,64], index: 7, kind: output, shape index: {}]  }
   0x1   :  { %2554 = vmatprep.subr.bf16.mxu1 %v2857_v1  ;;  %v2690_v2 = vld [vmem:[%s3531_s2] sm:$0xff]   ;;  %2558 = vmatprep.mubr.msk.bf16.mxu1 %vm2858_vm0, %v2857_v1  ;;  %v2694_v6 = vld [vmem:[%s3531_s2 + $0x8] sm:$0xff]   ;;  %v2695_v8 = vld [vmem:[%s3532_s1 + $0x14] ss:$8 sps:$4 sm:$0xff]   ;;  %v2860_v11 = vmov 1966171168  }
   0x2   :  { %v2691_v3 = vld [vmem:[%s3532_s1 + $0x4] ss:$8 sps:$4 sm:$0xff]   ;;  %164 = vmatprep.mubr.bf16.mxu0 %v2859_v4  ;;  %2555 = vmatpush3.bf16.msra.mxu1 %v2690_v2  ;;  %v2693_v5 = vld [vmem:[%s3532_s1] ss:$8 sps:$4 sm:$0xff]   ;;  %v42_v7 = vshrl.u32 %v41_v0, 7  ;;  %v64_v12 = vunpack.c.l.s4 %v2860_v11  ;;  %vm128_vm1 = vcmask 261120  }
   0x3   :  { %132 = vmatprep.subr.bf16.mxu0 %v2691_v3  ;;  %2556 = vmatprep.subr.bf16.mxu1 %v2857_v1  ;;  %v2697_v9 = vld [vmem:[%s3532_s1 + $0x10] ss:$8 sps:$4 sm:$0xff]   ;;  %v27_v10 = vld [vmem:[%s3533_s0] sm:$0x1]  ;;  %v28_v13 = vld [vmem:[%s3533_s0 + $0x1] sm:$0x1] }
   0x4   :  { %133 = vmatpush1.bf16.msra.mxu0 %v2693_v5  ;;  %v29_v14 = vld [vmem:[%s3533_s0 + $0x2] sm:$0x1]  ;;  %v30_v15 = vld [vmem:[%s3533_s0 + $0x3] sm:$0x1]  ;;  %v31_v16 = vld [vmem:[%s3533_s0 + $0x4] sm:$0x1]  ;;  %v59_v19 = vcombine.low %v27_v10, %v28_v13  ;;  %v65_v21 = vunpack.c.0.s8 %v64_v12 }
   0x5   :  { %134 = vmatprep.subr.bf16.mxu0 %v2695_v8  ;;  %v32_v17 = vld [vmem:[%s3533_s0 + $0x5] sm:$0x1]  ;;  %v33_v18 = vld [vmem:[%s3533_s0 + $0x6] sm:$0x1]  ;;  %v60_v20 = vcombine.low %v29_v14, %v30_v15  ;;  %v34_v22 = vld [vmem:[%s3533_s0 + $0x7] sm:$0x1] }
   0x6   :  { %2557 = vmatpush3.bf16.msra.mxu1 %v2694_v6  ;;  %v61_v23 = vcombine.low %v31_v16, %v32_v17  ;;  %v2955_v24 = vld [vmem:[%s3534_s5] ss:$0 sm:$0xff]  ;;  %v62_v25 = vcombine.low %v33_v18, %v34_v22  ;;  %v2958_v26 = vsub.s32 %v65_v21, %v42_v7  ;;  %v2862_v36 = vmov 1983009808   ;;  %v2699_v22 = vld [vmem:[%s3531_s2 + $0x8] sm:$0xff]   ;;  %s2864_s19 = smov 32  }
   0x7   :  { %2570 = vmatprep.subr.bf16.mxu1 %v2857_v1  ;;  %307 = vrot.lane.b32.xlu0 %v2955_v24, %s2861_s30  ;;  %v182_v37 = vunpack.c.l.s4 %v2862_v36  ;;  %v43_v45 = vsub.s32 0, %v42_v7  ;;  %v39_v48 = vld [vmem:[%s3535_s4] sm:$0x3]  ;;  %v47_v49 = vsub.s32 1, %v42_v7  ;;  %vm223_vm2 = vcmask 1041408  }
   0x8   :  { %135 = vmatpush1.bf16.msra.mxu0 %v2697_v9  ;;  %v69_v27 = vrot.slane %v59_v19, %v2958_v26  ;;  %v76_v28 = vrot.slane %v60_v20, %v2958_v26  ;;  %v83_v29 = vrot.slane %v61_v23, %v2958_v26  ;;  %v90_v30 = vrot.slane %v62_v25, %v2958_v26  ;;  %v2698_v21 = vld [vmem:[%s3531_s2] sm:$0xff]  }
   0x9   :  { %2559 = vmatmul.mubr.bf16.vlgmr.msra.gmra.mrb[0].mxu1 %v2859_v4  ;;  %2562 = vmatprep.subr.bf16.mxu0 %v2857_v1  ;;  %v183_v38 = vunpack.c.0.s8 %v182_v37  ;;  %v44_v50 = vrot.slane %v39_v48, %v43_v45  ;;  %v48_v51 = vrot.slane %v39_v48, %v47_v49  ;;  %vm224_vm3 = vcmask 519170   ;;  %v2702_v62 = vld [vmem:[%s3531_s2] sm:$0xff]  }
   0xa   :  { %2574 = vmatprep.mubr.msk.bf16.mxu1 %vm2858_vm0, %v2857_v1  ;;  %v91_v31 = vcombine.low %v69_v27, %v76_v28  ;;  %v92_v32 = vcombine.low %v83_v29, %v90_v30  ;;  %vm2982_vm4 = vmor %vm224_vm3, %vm223_vm2  ;;  %2571 = vmatpush3.bf16.msra.mxu1 %v2698_v21  ;;  %vm478_vm5 = vcmask 253952   ;;  %vm500_vm6 = vcmask 516352  }
   0xb   :  { %v2975_v40 = vsub.s32 %v183_v38, %v42_v7  ;;  %2572 = vmatprep.subr.bf16.mxu1 %v2857_v1 }
   0xc   :  { %v99_v33 = vrot.slane %v91_v31, %v2958_v26  ;;  %v106_v34 = vrot.slane %v92_v32, %v2958_v26 }
   0xe   :  { %v107_v35 = vcombine.low %v99_v33, %v106_v34  ;;  %2573 = vmatpush3.bf16.msra.mxu1 %v2699_v22  ;;  %v2700_v33 = vld [vmem:[%s3536_s3] sm:$0xff]   ;;  %v2701_v34 = vld [vmem:[%s3536_s3 + $0x8] sm:$0xff]  }
   0xf   :  { %2586 = vmatprep.subr.bf16.mxu1 %v2857_v1 }
  0x10   :  { %2405 = vmatmul.mubr.msk.bf16.vlgmr.msra.gmra.mrb[0].mxu0 %vm128_vm1, %v107_v35 }
  0x11   :  { %2566 = vmatprep.mubr.msk.bf16.mxu0 %vm2858_vm0, %v2857_v1  ;;  %2563 = vmatpush3.bf16.msra.mxu0 %v2700_v33 }
  0x12   :  { %2564 = vmatprep.subr.bf16.mxu0 %v2857_v1 }
  0x15   :  { %2565 = vmatpush3.bf16.msra.mxu0 %v2701_v34 }
  0x16   :  { %2578 = vmatprep.subr.bf16.mxu0 %v2857_v1 }
  0x18   :  { %2567 = vmatmul.mubr.bf16.vlgmr.msra.gmra.mrb[4].mxu0 %v2859_v4 }
  0x19   :  { %2582 = vmatprep.mubr.msk.bf16.mxu0 %vm2858_vm0, %v2857_v1 }
  0x79   :  { %v308_v39 = vpop.permute.xlu0 %307 }
  0xdc   :  { %v288_v41 = vpop.f32.mrb[0].mxu1 }
  0xdd   :  { %v310_v42 = vadd.f32 %v308_v39, %v288_v41  ;;  %v2560_v43 = vpop.f32.mrb[1].mxu1 }
  0xde   :  { %v291_v44 = vpop.f32.mrb[2].mxu1 }
  0xdf   :  { %v318_v46 = vrot.slane %v310_v42, %v2975_v40  ;;  %v2561_v47 = vpop.f32.mrb[3].mxu1 }
  0xe1   :  { %319 = vrot.lane.b32.xlu0 %v318_v46, %s2861_s30 }
  0xe3   :  { %v166_v52 = vpop.f32.mrb[0].mxu0 }
  0xe4   :  { %v167_v53 = vadd.f32 %v166_v52, %v44_v50  ;;  %v168_v54 = vpop.f32.mrb[1].mxu0 }
  0xe5   :  { %v169_v55 = vadd.f32 %v168_v54, %v48_v51  ;;  %v170_v56 = vpop.f32.mrb[2].mxu0 }
  0xe6   :  { %v171_v57 = vadd.f32 %v170_v56, %v44_v50  ;;  %v172_v58 = vpop.f32.mrb[3].mxu0 }
  0xe7   :  { %v179_v59 = vcombine.low %v167_v53, %v169_v55  ;;  %v180_v60 = vcombine.high %v167_v53, %v169_v55  ;;  %v173_v61 = vadd.f32 %v172_v58, %v48_v51  ;;  %v3042_v51 = vld [vmem:[%s3537_s6] ss:$0 sm:$0xff] }
  0xe9   :  { %v187_v63 = vrot.slane %v179_v59, %v2975_v40  ;;  %v194_v0 = vrot.slane %v180_v60, %v2975_v40  ;;  %v197_v2 = vcombine.low %v171_v57, %v173_v61  ;;  %v198_v3 = vcombine.high %v171_v57, %v173_v61 }
  0xeb   :  { %v195_v5 = vcombine.high %v187_v63, %v187_v63  ;;  %v196_v6 = vcombine.high %v194_v0, %v194_v0  ;;  %226 = vst.msk [vmem:[#allocation2] sm:$0xf] %vm2982_vm4, %v187_v63  ;;  %228 = vst.msk [vmem:[#allocation2 + $0x8] sm:$0xf] %vm2982_vm4, %v194_v0  ;;  %v205_v7 = vrot.slane %v197_v2, %v2975_v40  ;;  %v389_v50 = vpop.f32.mrb[4].mxu0  ;;  %v2703_v63 = vld [vmem:[%s3531_s2 + $0x8] sm:$0xff]  }
  0xec   :  { %v212_v8 = vrot.slane %v198_v3, %v2975_v40  ;;  %v2568_v52 = vpop.f32.mrb[5].mxu0  ;;  %v402_v59 = vrot.slane %v389_v50, %v2975_v40 }
  0xed   :  { %227 = vst.msk [vmem:[#allocation2 + $0x4] sm:$0xf] %vm2982_vm4, %v195_v5  ;;  %229 = vst.msk [vmem:[#allocation2 + $0xc] sm:$0xf] %vm2982_vm4, %v196_v6  ;;  %v213_v9 = vcombine.high %v205_v7, %v205_v7  ;;  %v392_v53 = vpop.f32.mrb[6].mxu0 }
  0xee   :  { %v214_v10 = vcombine.high %v212_v8, %v212_v8  ;;  %230 = vst.msk [vmem:[#allocation2 + $0x10] sm:$0xf] %vm2982_vm4, %v205_v7  ;;  %232 = vst.msk [vmem:[#allocation2 + $0x18] sm:$0xf] %vm2982_vm4, %v212_v8  ;;  %v2569_v54 = vpop.f32.mrb[7].mxu0 }
  0xef   :  { %231 = vst.msk [vmem:[#allocation2 + $0x14] sm:$0xf] %vm2982_vm4, %v213_v9 }
  0xf0   :  { %233 = vst.msk [vmem:[#allocation2 + $0x1c] sm:$0xf] %vm2982_vm4, %v214_v10 }
  0xf2   :  { %v234_v11 = vld [vmem:[#allocation2] sm:$0xf] }
  0xf3   :  { %v294_v12 = vadd.f32 %v288_v41, %v234_v11 }
  0xf4   :  { %v503_v43 = vld [vmem:[#allocation2 + $0x4] sm:$0xf] }
  0xf5   :  { %v2408_v13 = vmul.f32 -1.442695, %v294_v12 }
  0xf7   :  { %2728 = vpow2.f32 %v2408_v13  ;;  %v338_v7 = vld [vmem:[#allocation2 + $0x1c] sm:$0xf] }
 0x101   :  { %v2729_v14 = vpop.eup %2728 }
 0x102   :  { %v298_v15 = vadd.f32 1.0, %v2729_v14 }
 0x104   :  { %2730 = vrcp.f32 %v298_v15 }
 0x10e   :  { %v2731_v16 = vpop.eup %2730 }
 0x10f   :  { %v329_v25 = vsub.f32 1.0, %v2731_v16  ;;  %v335_v28 = vmul.f32 0.0, %v2731_v16 }
 0x153   :  { %v320_v17 = vpop.permute.xlu0 %319 }
 0x154   :  { %v322_v18 = vmul.f32 %v2731_v16, %v320_v17  ;;  %v2704_v17 = vld [vmem:[%s3536_s3] sm:$0xff]  }
 0x155   :  { %2579 = vmatpush3.bf16.msra.mxu0 %v2704_v17  ;;  %v2708_v17 = vld [vmem:[%s3531_s2] sm:$0xff]  }
 0x156   :  { %324 = vrot.lane.b32.xlu1 %v322_v18, %s2861_s30  ;;  %v2705_v18 = vld [vmem:[%s3536_s3 + $0x8] sm:$0xff]   ;;  %2580 = vmatprep.subr.bf16.mxu0 %v2857_v1 }
 0x159   :  { %2581 = vmatpush3.bf16.msra.mxu0 %v2705_v18  ;;  %v2709_v18 = vld [vmem:[%s3531_s2 + $0x8] sm:$0xff]  }
 0x15a   :  { %2594 = vmatprep.subr.bf16.mxu0 %v2857_v1 }
 0x1c8   :  { %v325_v19 = vpop.permute.xlu1 %324 }
 0x1c9   :  { %v327_v20 = vadd.f32 %v325_v19, %v234_v11  ;;  %v414_v19 = vrot.slane %v338_v7, 2 }
 0x1cb   :  { %2732 = vtanh.f32 %v327_v20 }
 0x1d5   :  { %v2733_v23 = vpop.eup %2732 }
 0x1d6   :  { %331 = vrot.lane.b32.xlu1 %v2733_v23, %s2863_s12 }
 0x1da   :  { %578 = vrot.lane.b32.xlu1 %v2955_v24, %s2861_s30 }
 0x248   :  { %v332_v27 = vpop.permute.xlu1 %331 }
 0x249   :  { %v334_v29 = vmul.f32 %v332_v27, %v329_v25 }
 0x24b   :  { %v336_v30 = vadd.f32 %v335_v28, %v334_v29 }
 0x24c   :  { %v579_v35 = vpop.permute.xlu1 %578 }
 0x24d   :  { %v3018_v31 = vpack.c.bf16 %v336_v30, %v336_v30 }
 0x24f   :  { %508 = vrot.lane.b32.xlu0 %v3018_v31, %s2863_s12 }
 0x2c1   :  { %v509_v32 = vpop.permute.xlu0 %508 }
 0x2c2   :  { %2575 = vmatmul.mubr.msk.bf16.vlgmr.msra.gmra.mrb[4].mxu1 %vm128_vm1, %v509_v32 }
 0x2c3   :  { %2590 = vmatprep.mubr.msk.bf16.mxu1 %vm2858_vm0, %v2857_v1  ;;  %2587 = vmatpush3.bf16.msra.mxu1 %v2702_v62 }
 0x2c4   :  { %2588 = vmatprep.subr.bf16.mxu1 %v2857_v1 }
 0x2c7   :  { %2589 = vmatpush3.bf16.msra.mxu1 %v2703_v63  ;;  %v609_v63 = vld [vmem:[#allocation2 + $0x18] sm:$0xf] }
 0x2c8   :  { %2602 = vmatprep.subr.bf16.mxu1 %v2857_v1 }
 0x395   :  { %v559_v36 = vpop.f32.mrb[4].mxu1 }
 0x396   :  { %v581_v37 = vadd.f32 %v579_v35, %v559_v36  ;;  %v2576_v38 = vpop.f32.mrb[5].mxu1  ;;  %v565_v44 = vadd.f32 %v559_v36, %v503_v43 }
 0x397   :  { %v562_v39 = vpop.f32.mrb[6].mxu1 }
 0x398   :  { %v589_v41 = vrot.slane %v581_v37, %v2975_v40  ;;  %v2577_v42 = vpop.f32.mrb[7].mxu1  ;;  %v2419_v45 = vmul.f32 -1.442695, %v565_v44 }
 0x39a   :  { %590 = vrot.lane.b32.xlu0 %v589_v41, %s2861_s30  ;;  %2734 = vpow2.f32 %v2419_v45 }
 0x3a4   :  { %v2735_v46 = vpop.eup %2734 }
 0x3a5   :  { %v569_v47 = vadd.f32 1.0, %v2735_v46 }
 0x3a7   :  { %2736 = vrcp.f32 %v569_v47 }
 0x3b1   :  { %v2737_v4 = vpop.eup %2736 }
 0x3b2   :  { %v600_v0 = vsub.f32 1.0, %v2737_v4  ;;  %v606_v3 = vmul.f32 %v2737_v4, %v336_v30 }
 0x40c   :  { %v591_v48 = vpop.permute.xlu0 %590 }
 0x40d   :  { %v593_v49 = vmul.f32 %v2737_v4, %v591_v48 }
 0x40f   :  { %595 = vrot.lane.b32.xlu1 %v593_v49, %s2861_s30 }
 0x413   :  { %429 = vrot.lane.b32.xlu1 %v3042_v51, %s2861_s30 }
 0x481   :  { %v596_v55 = vpop.permute.xlu1 %595 }
 0x482   :  { %v598_v56 = vadd.f32 %v596_v55, %v503_v43 }
 0x484   :  { %2738 = vtanh.f32 %v598_v56 }
 0x485   :  { %v430_v57 = vpop.permute.xlu1 %429 }
 0x486   :  { %v432_v60 = vadd.f32 %v430_v57, %v389_v50  ;;  %v776_v50 = vld [vmem:[#allocation2 + $0x8] sm:$0xf] }
 0x488   :  { %v440_v61 = vrot.slane %v432_v60, %v2975_v40 }
 0x48e   :  { %v2739_v58 = vpop.eup %2738 }
 0x48f   :  { %602 = vrot.lane.b32.xlu0 %v2739_v58, %s2863_s12 }
 0x493   :  { %403 = vrot.lane.b32.xlu0 %v402_v59, %s2863_s12 }
 0x497   :  { %441 = vrot.lane.b32.xlu0 %v440_v61, %s2864_s19 }
 0x501   :  { %v603_v2 = vpop.permute.xlu0 %602 }
 0x502   :  { %v605_v5 = vmul.f32 %v603_v2, %v600_v0 }
 0x504   :  { %v3059_v6 = vadd.f32 %v606_v3, %v605_v5 }
 0x505   :  { %v404_v8 = vpop.permute.xlu0 %403 }
 0x506   :  { %v406_v9 = vadd.f32 %v404_v8, %v338_v7  ;;  %v3063_v10 = vpack.c.bf16 %v3059_v6, %v3059_v6  ;;  %v416_v21 = vadd.f32 %v414_v19, %v404_v8  ;;  %v688_v19 = vrot.slane %v609_v63, 2 }
 0x508   :  { %v2412_v11 = vmul.f32 -1.442695, %v406_v9  ;;  %781 = vrot.lane.b32.xlu1 %v3063_v10, %s2863_s12  ;;  %v2413_v22 = vmul.f32 -1.442695, %v416_v21 }
 0x509   :  { %v442_v14 = vpop.permute.xlu0 %441 }
 0x50a   :  { %2740 = vpow2.f32 %v2412_v11 }
 0x50c   :  { %445 = vrot.lane.b32.xlu1 %v338_v7, %s2863_s12 }
 0x510   :  { %851 = vrot.lane.b32.xlu1 %v2955_v24, %s2861_s30 }
 0x514   :  { %v2741_v12 = vpop.eup %2740 }
 0x515   :  { %v410_v13 = vadd.f32 1.0, %v2741_v12 }
 0x517   :  { %2742 = vrcp.f32 %v410_v13 }
 0x518   :  { %2744 = vpow2.f32 %v2413_v22 }
 0x521   :  { %v2743_v15 = vpop.eup %2742 }
 0x522   :  { %v444_v16 = vmul.f32 %v2743_v15, %v442_v14  ;;  %v2745_v23 = vpop.eup %2744  ;;  %v2706_v15 = vld [vmem:[%s3536_s3] sm:$0xff]  }
 0x523   :  { %v420_v25 = vadd.f32 1.0, %v2745_v23 }
 0x524   :  { %450 = vrot.lane.b32.xlu0 %v444_v16, %s2864_s19  ;;  %v2707_v16 = vld [vmem:[%s3536_s3 + $0x8] sm:$0xff]  }
 0x525   :  { %2746 = vrcp.f32 %v420_v25 }
 0x52f   :  { %v2747_v32 = vpop.eup %2746 }
 0x530   :  { %v455_v33 = vsub.f32 1.0, %v2747_v32  ;;  %v457_v36 = vmul.f32 0.0, %v2747_v32 }
 0x57a   :  { %v782_v20 = vpop.permute.xlu1 %781 }
 0x57b   :  { %2591 = vmatmul.mubr.msk.bf16.vlgmr.msra.gmra.mrb[8].mxu1 %vm128_vm1, %v782_v20 }
 0x57c   :  { %2606 = vmatprep.mubr.msk.bf16.mxu1 %vm2858_vm0, %v2857_v1  ;;  %2603 = vmatpush3.bf16.msra.mxu1 %v2708_v17 }
 0x57d   :  { %2604 = vmatprep.subr.bf16.mxu1 %v2857_v1 }
 0x57e   :  { %v446_v27 = vpop.permute.xlu1 %445 }
 0x57f   :  { %v447_v28 = vrot.slane %v446_v27, 2 }
 0x580   :  { %2605 = vmatpush3.bf16.msra.mxu1 %v2709_v18  ;;  %v2710_v18 = vld [vmem:[%s3536_s3] sm:$0xff]  }
 0x581   :  { %2618 = vmatprep.subr.bf16.mxu1 %v2857_v1 }
 0x582   :  { %v852_v39 = vpop.permute.xlu1 %851 }
 0x596   :  { %v451_v29 = vpop.permute.xlu0 %450 }
 0x597   :  { %v453_v30 = vadd.f32 %v451_v29, %v447_v28 }
 0x599   :  { %2748 = vtanh.f32 %v453_v30 }
 0x5a3   :  { %v2749_v34 = vpop.eup %2748 }
 0x5a4   :  { %v456_v35 = vmul.f32 %v2749_v34, %v455_v33 }
 0x5a6   :  { %v3082_v37 = vadd.f32 %v457_v36, %v456_v35 }
 0x5a8   :  { %v3086_v38 = vpack.c.bf16 %v3082_v37, %v3082_v37 }
 0x5aa   :  { %2583 = vmatmul.mubr.msk.bf16.vlgmr.msra.gmra.mrb[8].mxu0 %vm128_vm1, %v3086_v38 }
 0x5ab   :  { %2598 = vmatprep.mubr.msk.bf16.mxu0 %vm2858_vm0, %v2857_v1  ;;  %2595 = vmatpush3.bf16.msra.mxu0 %v2706_v15 }
 0x5ac   :  { %2596 = vmatprep.subr.bf16.mxu0 %v2857_v1 }
 0x5af   :  { %2597 = vmatpush3.bf16.msra.mxu0 %v2707_v16 }
 0x5b0   :  { %2610 = vmatprep.subr.bf16.mxu0 %v2857_v1 }
 0x64e   :  { %v832_v41 = vpop.f32.mrb[8].mxu1 }
 0x64f   :  { %v854_v42 = vadd.f32 %v852_v39, %v832_v41  ;;  %v2592_v43 = vpop.f32.mrb[9].mxu1  ;;  %v838_v52 = vadd.f32 %v832_v41, %v776_v50 }
 0x650   :  { %v835_v44 = vpop.f32.mrb[10].mxu1 }
 0x651   :  { %v862_v45 = vrot.slane %v854_v42, %v2975_v40  ;;  %v2593_v46 = vpop.f32.mrb[11].mxu1  ;;  %v2432_v53 = vmul.f32 -1.442695, %v838_v52 }
 0x653   :  { %863 = vrot.lane.b32.xlu0 %v862_v45, %s2861_s30  ;;  %2750 = vpow2.f32 %v2432_v53 }
 0x657   :  { %703 = vrot.lane.b32.xlu0 %v3042_v51, %s2861_s30 }
 0x65d   :  { %v2751_v54 = vpop.eup %2750 }
 0x65e   :  { %v842_v55 = vadd.f32 1.0, %v2751_v54 }
 0x660   :  { %2752 = vrcp.f32 %v842_v55 }
 0x66a   :  { %v2753_v56 = vpop.eup %2752 }
 0x66b   :  { %v873_v22 = vsub.f32 1.0, %v2753_v56  ;;  %v879_v25 = vmul.f32 %v2753_v56, %v3059_v6 }
 0x67d   :  { %v663_v47 = vpop.f32.mrb[8].mxu0 }
 0x67e   :  { %v2584_v4 = vpop.f32.mrb[9].mxu0  ;;  %v676_v60 = vrot.slane %v663_v47, %v2975_v40 }
 0x67f   :  { %v666_v48 = vpop.f32.mrb[10].mxu0 }
 0x680   :  { %v2585_v49 = vpop.f32.mrb[11].mxu0 }
 0x6c5   :  { %v864_v57 = vpop.permute.xlu0 %863 }
 0x6c6   :  { %v866_v58 = vmul.f32 %v2753_v56, %v864_v57 }
 0x6c8   :  { %868 = vrot.lane.b32.xlu1 %v866_v58, %s2861_s30 }
 0x6c9   :  { %v704_v59 = vpop.permute.xlu0 %703 }
 0x6ca   :  { %v706_v61 = vadd.f32 %v704_v59, %v663_v47 }
 0x6cc   :  { %v714_v62 = vrot.slane %v706_v61, %v2975_v40  ;;  %677 = vrot.lane.b32.xlu1 %v676_v60, %s2863_s12  ;;  %v882_v61 = vld [vmem:[#allocation2 + $0x14] sm:$0xf] }
 0x6ce   :  { %715 = vrot.lane.b32.xlu0 %v714_v62, %s2864_s19  ;;  %v1049_v62 = vld [vmem:[#allocation2 + $0xc] sm:$0xf] }
 0x6d2   :  { %719 = vrot.lane.b32.xlu0 %v609_v63, %s2863_s12 }
 0x73a   :  { %v869_v0 = vpop.permute.xlu1 %868 }
 0x73b   :  { %v871_v2 = vadd.f32 %v869_v0, %v776_v50 }
 0x73d   :  { %2754 = vtanh.f32 %v871_v2 }
 0x73e   :  { %v678_v3 = vpop.permute.xlu1 %677 }
 0x73f   :  { %v680_v5 = vadd.f32 %v678_v3, %v609_v63  ;;  %v690_v20 = vadd.f32 %v688_v19, %v678_v3  ;;  %v2711_v19 = vld [vmem:[%s3536_s3 + $0x8] sm:$0xff]  }
 0x740   :  { %v716_v13 = vpop.permute.xlu0 %715 }
 0x741   :  { %v2424_v7 = vmul.f32 -1.442695, %v680_v5  ;;  %v2425_v21 = vmul.f32 -1.442695, %v690_v20  ;;  %v961_v20 = vrot.slane %v882_v61, 2 }
 0x743   :  { %2756 = vpow2.f32 %v2424_v7 }
 0x744   :  { %v720_v33 = vpop.permute.xlu0 %719 }
 0x745   :  { %v721_v34 = vrot.slane %v720_v33, 2 }
 0x747   :  { %v2755_v8 = vpop.eup %2754 }
 0x748   :  { %875 = vrot.lane.b32.xlu1 %v2755_v8, %s2863_s12 }
 0x74d   :  { %v2757_v9 = vpop.eup %2756 }
 0x74e   :  { %v684_v11 = vadd.f32 1.0, %v2757_v9 }
 0x750   :  { %2758 = vrcp.f32 %v684_v11 }
 0x751   :  { %2760 = vpow2.f32 %v2425_v21 }
 0x75a   :  { %v2759_v12 = vpop.eup %2758 }
 0x75b   :  { %v718_v14 = vmul.f32 %v2759_v12, %v716_v13  ;;  %v2761_v30 = vpop.eup %2760 }
 0x75c   :  { %v694_v32 = vadd.f32 1.0, %v2761_v30 }
 0x75d   :  { %724 = vrot.lane.b32.xlu1 %v718_v14, %s2864_s19 }
 0x75e   :  { %2762 = vrcp.f32 %v694_v32 }
 0x761   :  { %1124 = vrot.lane.b32.xlu1 %v2955_v24, %s2861_s30 }
 0x768   :  { %v2763_v36 = vpop.eup %2762 }
 0x769   :  { %v729_v39 = vsub.f32 1.0, %v2763_v36  ;;  %v731_v43 = vmul.f32 %v2763_v36, %v3082_v37 }
 0x7ba   :  { %v876_v23 = vpop.permute.xlu1 %875 }
 0x7bb   :  { %v878_v27 = vmul.f32 %v876_v23, %v873_v22 }
 0x7bd   :  { %v3123_v28 = vadd.f32 %v879_v25, %v878_v27 }
 0x7bf   :  { %v3127_v29 = vpack.c.bf16 %v3123_v28, %v3123_v28 }
 0x7c1   :  { %1054 = vrot.lane.b32.xlu0 %v3127_v29, %s2863_s12 }
 0x7c5   :  { %976 = vrot.lane.b32.xlu0 %v3042_v51, %s2861_s30 }
 0x7cf   :  { %v725_v6 = vpop.permute.xlu1 %724 }
 0x7d0   :  { %v727_v35 = vadd.f32 %v725_v6, %v721_v34 }
 0x7d2   :  { %2764 = vtanh.f32 %v727_v35 }
 0x7d3   :  { %v1125_v50 = vpop.permute.xlu1 %1124 }
 0x7dc   :  { %v2765_v41 = vpop.eup %2764 }
 0x7dd   :  { %v730_v42 = vmul.f32 %v2765_v41, %v729_v39 }
 0x7df   :  { %v3134_v44 = vadd.f32 %v731_v43, %v730_v42 }
 0x7e1   :  { %v3138_v45 = vpack.c.bf16 %v3134_v44, %v3134_v44 }
 0x7e3   :  { %2599 = vmatmul.mubr.msk.bf16.vlgmr.msra.gmra.mrb[12].mxu0 %vm128_vm1, %v3138_v45 }
 0x7e4   :  { %2614 = vmatprep.mubr.msk.bf16.mxu0 %vm2858_vm0, %v2857_v1  ;;  %2611 = vmatpush3.bf16.msra.mxu0 %v2710_v18  ;;  %v2715_v18 = vld [vmem:[%s3536_s3 + $0x8] sm:$0xff]  }
 0x7e5   :  { %2612 = vmatprep.subr.bf16.mxu0 %v2857_v1 }
 0x7e8   :  { %2613 = vmatpush3.bf16.msra.mxu0 %v2711_v19  ;;  %v1321_v19 = vld [vmem:[#allocation2 + $0x10] sm:$0xf] }
 0x7e9   :  { %2626 = vmatprep.subr.bf16.mxu0 %v2857_v1 }
 0x833   :  { %v1055_v46 = vpop.permute.xlu0 %1054 }
 0x834   :  { %2607 = vmatmul.mubr.msk.bf16.vlgmr.msra.gmra.mrb[12].mxu1 %vm128_vm1, %v1055_v46 }
 0x835   :  { %2622 = vmatprep.mubr.msk.bf16.mxu1 %vm2858_vm0, %v2857_v1 }
 0x837   :  { %v977_v52 = vpop.permute.xlu0 %976 }
 0x8b6   :  { %v936_v47 = vpop.f32.mrb[12].mxu0 }
 0x8b7   :  { %v949_v37 = vrot.slane %v936_v47, %v2975_v40  ;;  %v2600_v4 = vpop.f32.mrb[13].mxu0  ;;  %v979_v57 = vadd.f32 %v977_v52, %v936_v47 }
 0x8b8   :  { %v939_v48 = vpop.f32.mrb[14].mxu0 }
 0x8b9   :  { %950 = vrot.lane.b32.xlu0 %v949_v37, %s2863_s12  ;;  %v2601_v49 = vpop.f32.mrb[15].mxu0  ;;  %v987_v60 = vrot.slane %v979_v57, %v2975_v40  ;;  %v2713_v37 = vld [vmem:[%s3531_s2 + $0x8] sm:$0xff]  }
 0x907   :  { %v1105_v53 = vpop.f32.mrb[12].mxu1 }
 0x908   :  { %v1127_v54 = vadd.f32 %v1125_v50, %v1105_v53  ;;  %v2608_v55 = vpop.f32.mrb[13].mxu1  ;;  %v1111_v63 = vadd.f32 %v1105_v53, %v1049_v62 }
 0x909   :  { %v1108_v56 = vpop.f32.mrb[14].mxu1 }
 0x90a   :  { %v1135_v58 = vrot.slane %v1127_v54, %v2975_v40  ;;  %v2609_v59 = vpop.f32.mrb[15].mxu1  ;;  %v2445_v2 = vmul.f32 -1.442695, %v1111_v63 }
 0x90c   :  { %1136 = vrot.lane.b32.xlu1 %v1135_v58, %s2861_s30  ;;  %2766 = vpow2.f32 %v2445_v2 }
 0x910   :  { %988 = vrot.lane.b32.xlu1 %v987_v60, %s2864_s19  ;;  %v1155_v60 = vld [vmem:[#allocation2 + $0x10] sm:$0xf] }
 0x914   :  { %992 = vrot.lane.b32.xlu1 %v882_v61, %s2863_s12 }
 0x916   :  { %v2767_v7 = vpop.eup %2766 }
 0x917   :  { %v1115_v8 = vadd.f32 1.0, %v2767_v7 }
 0x92b   :  { %v951_v0 = vpop.permute.xlu0 %950 }
 0x92c   :  { %v953_v3 = vadd.f32 %v951_v0, %v882_v61  ;;  %v963_v21 = vadd.f32 %v961_v20, %v951_v0 }
 0x92e   :  { %v2437_v5 = vmul.f32 -1.442695, %v953_v3  ;;  %v2438_v22 = vmul.f32 -1.442695, %v963_v21 }
 0x930   :  { %2768 = vpow2.f32 %v2437_v5 }
 0x931   :  { %2770 = vrcp.f32 %v1115_v8 }
 0x93a   :  { %v2769_v9 = vpop.eup %2768 }
 0x93b   :  { %v957_v11 = vadd.f32 1.0, %v2769_v9  ;;  %v2771_v12 = vpop.eup %2770 }
 0x93c   :  { %v1152_v48 = vmul.f32 %v2771_v12, %v3123_v28 }
 0x93d   :  { %2772 = vrcp.f32 %v957_v11 }
 0x93e   :  { %2774 = vpow2.f32 %v2438_v22  ;;  %v1234_v22 = vrot.slane %v1155_v60, 2 }
 0x947   :  { %v2773_v15 = vpop.eup %2772 }
 0x948   :  { %v2775_v23 = vpop.eup %2774 }
 0x949   :  { %v967_v25 = vadd.f32 1.0, %v2775_v23 }
 0x94b   :  { %2776 = vrcp.f32 %v967_v25 }
 0x955   :  { %v2777_v35 = vpop.eup %2776 }
 0x956   :  { %v1002_v39 = vsub.f32 1.0, %v2777_v35  ;;  %v1004_v43 = vmul.f32 %v2777_v35, %v3134_v44  ;;  %v2712_v44 = vld [vmem:[%s3531_s2] sm:$0xff]  }
 0x957   :  { %2619 = vmatpush3.bf16.msra.mxu1 %v2712_v44 }
 0x958   :  { %2620 = vmatprep.subr.bf16.mxu1 %v2857_v1 }
 0x95b   :  { %2621 = vmatpush3.bf16.msra.mxu1 %v2713_v37 }
 0x95c   :  { %2634 = vmatprep.subr.bf16.mxu1 %v2857_v1 }
 0x97e   :  { %v1137_v13 = vpop.permute.xlu1 %1136 }
 0x97f   :  { %v1139_v14 = vmul.f32 %v2771_v12, %v1137_v13 }
 0x981   :  { %1141 = vrot.lane.b32.xlu0 %v1139_v14, %s2861_s30 }
 0x982   :  { %v989_v16 = vpop.permute.xlu1 %988 }
 0x983   :  { %v991_v17 = vmul.f32 %v2773_v15, %v989_v16 }
 0x985   :  { %997 = vrot.lane.b32.xlu0 %v991_v17, %s2864_s19  ;;  %v2714_v17 = vld [vmem:[%s3536_s3] sm:$0xff]  }
 0x986   :  { %v993_v27 = vpop.permute.xlu1 %992 }
 0x987   :  { %v994_v33 = vrot.slane %v993_v27, 2 }
 0x9f3   :  { %v1142_v30 = vpop.permute.xlu0 %1141 }
 0x9f4   :  { %v1144_v32 = vadd.f32 %v1142_v30, %v1049_v62 }
 0x9f6   :  { %2778 = vtanh.f32 %v1144_v32 }
 0x9f7   :  { %v998_v34 = vpop.permute.xlu0 %997 }
 0x9f8   :  { %v1000_v6 = vadd.f32 %v998_v34, %v994_v33 }
 0x9fa   :  { %2780 = vtanh.f32 %v1000_v6 }
 0xa00   :  { %v2779_v36 = vpop.eup %2778 }
 0xa01   :  { %1148 = vrot.lane.b32.xlu1 %v2779_v36, %s2863_s12 }
 0xa04   :  { %v2781_v41 = vpop.eup %2780 }
 0xa05   :  { %v1003_v42 = vmul.f32 %v2781_v41, %v1002_v39  ;;  %1249 = vrot.lane.b32.xlu1 %v3042_v51, %s2861_s30 }
 0xa07   :  { %v3168_v46 = vadd.f32 %v1004_v43, %v1003_v42 }
 0xa09   :  { %v3172_v47 = vpack.c.bf16 %v3168_v46, %v3168_v46  ;;  %1396 = vrot.lane.b32.xlu1 %v2955_v24, %s2861_s30  ;;  %v1146_v24 = vsub.f32 1.0, %v2771_v12 }
 0xa0b   :  { %2615 = vmatmul.mubr.msk.bf16.vlgmr.msra.gmra.mrb[16].mxu0 %vm128_vm1, %v3172_v47 }
 0xa0c   :  { %2630 = vmatprep.mubr.msk.bf16.mxu0 %vm2858_vm0, %v2857_v1  ;;  %2627 = vmatpush3.bf16.msra.mxu0 %v2714_v17 }
 0xa0d   :  { %2628 = vmatprep.subr.bf16.mxu0 %v2857_v1 }
 0xa10   :  { %2629 = vmatpush3.bf16.msra.mxu0 %v2715_v18 }
 0xa11   :  { %2642 = vmatprep.subr.bf16.mxu0 %v2857_v1 }
 0xa73   :  { %v1149_v4 = vpop.permute.xlu1 %1148 }
 0xa74   :  { %v1151_v49 = vmul.f32 %v1149_v4, %v1146_v24 }
 0xa76   :  { %v3189_v50 = vadd.f32 %v1152_v48, %v1151_v49 }
 0xa77   :  { %v1250_v53 = vpop.permute.xlu1 %1249 }
 0xa78   :  { %v3193_v52 = vpack.c.bf16 %v3189_v50, %v3189_v50 }
 0xa7a   :  { %1326 = vrot.lane.b32.xlu0 %v3193_v52, %s2863_s12 }
 0xa7b   :  { %v1397_v5 = vpop.permute.xlu1 %1396 }
 0xade   :  { %v1209_v54 = vpop.f32.mrb[16].mxu0 }
 0xadf   :  { %v1222_v55 = vrot.slane %v1209_v54, %v2975_v40  ;;  %v1252_v56 = vadd.f32 %v1250_v53, %v1209_v54  ;;  %v2616_v57 = vpop.f32.mrb[17].mxu0 }
 0xae0   :  { %v1212_v58 = vpop.f32.mrb[18].mxu0 }
 0xae1   :  { %1223 = vrot.lane.b32.xlu0 %v1222_v55, %s2863_s12  ;;  %v2617_v28 = vpop.f32.mrb[19].mxu0  ;;  %v1260_v59 = vrot.slane %v1252_v56, %v2975_v40  ;;  %v2717_v56 = vld [vmem:[%s3531_s2 + $0x8] sm:$0xff]  }
 0xae5   :  { %1261 = vrot.lane.b32.xlu0 %v1260_v59, %s2864_s19 }
 0xae9   :  { %1265 = vrot.lane.b32.xlu0 %v1155_v60, %s2863_s12 }
 0xaec   :  { %v1327_v61 = vpop.permute.xlu0 %1326 }
 0xaed   :  { %2623 = vmatmul.mubr.msk.bf16.vlgmr.msra.gmra.mrb[16].mxu1 %vm128_vm1, %v1327_v61 }
 0xaee   :  { %2638 = vmatprep.mubr.msk.bf16.mxu1 %vm2858_vm0, %v2857_v1 }
 0xb53   :  { %v1224_v62 = vpop.permute.xlu0 %1223 }
 0xb54   :  { %v1226_v63 = vadd.f32 %v1224_v62, %v1155_v60  ;;  %v1236_v23 = vadd.f32 %v1234_v22, %v1224_v62 }
 0xb56   :  { %v2450_v0 = vmul.f32 -1.442695, %v1226_v63  ;;  %v2451_v25 = vmul.f32 -1.442695, %v1236_v23 }
 0xb57   :  { %v1262_v15 = vpop.permute.xlu0 %1261 }
 0xb58   :  { %2782 = vpow2.f32 %v2450_v0 }
 0xb5b   :  { %v1266_v6 = vpop.permute.xlu0 %1265 }
 0xb5c   :  { %v1267_v39 = vrot.slane %v1266_v6, 2 }
 0xb62   :  { %v2783_v2 = vpop.eup %2782 }
 0xb63   :  { %v1230_v3 = vadd.f32 1.0, %v2783_v2 }
 0xb65   :  { %2784 = vrcp.f32 %v1230_v3 }
 0xb6f   :  { %v2785_v14 = vpop.eup %2784 }
 0xb70   :  { %v1264_v16 = vmul.f32 %v2785_v14, %v1262_v15 }
 0xbc0   :  { %v1377_v7 = vpop.f32.mrb[16].mxu1 }
 0xbc1   :  { %v1399_v8 = vadd.f32 %v1397_v5, %v1377_v7  ;;  %v2624_v9 = vpop.f32.mrb[17].mxu1  ;;  %v1383_v20 = vadd.f32 %v1377_v7, %v1321_v19 }
 0xbc2   :  { %v1380_v11 = vpop.f32.mrb[18].mxu1  ;;  %v2856_v9 = vld [vmem:[%s3534_s5] ss:$0 sm:$0xff] }
 0xbc3   :  { %v1407_v12 = vrot.slane %v1399_v8, %v2975_v40  ;;  %v2625_v13 = vpop.f32.mrb[19].mxu1  ;;  %v2458_v21 = vmul.f32 -1.442695, %v1383_v20  ;;  %v2718_v20 = vld [vmem:[%s3536_s3] sm:$0xff]  }
 0xbc5   :  { %1408 = vrot.lane.b32.xlu1 %v1407_v12, %s2861_s30  ;;  %2786 = vpow2.f32 %v2458_v21  ;;  %v2719_v21 = vld [vmem:[%s3536_s3 + $0x8] sm:$0xff]  }
 0xbc6   :  { %2788 = vpow2.f32 %v2451_v25 }
 0xbc9   :  { %1270 = vrot.lane.b32.xlu1 %v1264_v16, %s2864_s19 }
 0xbcf   :  { %v2787_v27 = vpop.eup %2786 }
 0xbd0   :  { %v1387_v30 = vadd.f32 1.0, %v2787_v27  ;;  %v2789_v32 = vpop.eup %2788 }
 0xbd1   :  { %v1240_v33 = vadd.f32 1.0, %v2789_v32 }
 0xbd2   :  { %2790 = vrcp.f32 %v1387_v30 }
 0xbd3   :  { %2792 = vrcp.f32 %v1240_v33 }
 0xbdc   :  { %v2791_v34 = vpop.eup %2790 }
 0xbdd   :  { %v2793_v43 = vpop.eup %2792  ;;  %v1418_v60 = vsub.f32 1.0, %v2791_v34  ;;  %v1424_v62 = vmul.f32 %v2791_v34, %v3189_v50  ;;  %v1426_v50 = vld [vmem:[#allocation2 + $0xc] sm:$0xf] }
 0xbde   :  { %v1275_v44 = vsub.f32 1.0, %v2793_v43  ;;  %v1277_v4 = vmul.f32 %v2793_v43, %v3168_v46  ;;  %v2716_v46 = vld [vmem:[%s3531_s2] sm:$0xff]   ;;  %v1505_v22 = vrot.slane %v1426_v50, 2 }
 0xbdf   :  { %2635 = vmatpush3.bf16.msra.mxu1 %v2716_v46  ;;  %v1590_v46 = vld [vmem:[#allocation2 + $0x14] sm:$0xf] }
 0xbe0   :  { %2636 = vmatprep.subr.bf16.mxu1 %v2857_v1 }
 0xbe3   :  { %2637 = vmatpush3.bf16.msra.mxu1 %v2717_v56 }
 0xbe4   :  { %2650 = vmatprep.subr.bf16.mxu1 %v2857_v1 }
 0xc37   :  { %v1409_v35 = vpop.permute.xlu1 %1408 }
 0xc38   :  { %v1411_v36 = vmul.f32 %v2791_v34, %v1409_v35 }
 0xc3a   :  { %1413 = vrot.lane.b32.xlu0 %v1411_v36, %s2861_s30 }
 0xc3b   :  { %v1271_v41 = vpop.permute.xlu1 %1270 }
 0xc3c   :  { %v1273_v42 = vadd.f32 %v1271_v41, %v1267_v39 }
 0xc3e   :  { %2794 = vtanh.f32 %v1273_v42 }
 0xc48   :  { %v2795_v37 = vpop.eup %2794 }
 0xc49   :  { %v1276_v24 = vmul.f32 %v2795_v37, %v1275_v44 }
 0xc4b   :  { %v3218_v48 = vadd.f32 %v1277_v4, %v1276_v24 }
 0xc4d   :  { %v3222_v49 = vpack.c.bf16 %v3218_v48, %v3218_v48 }
 0xc4f   :  { %2631 = vmatmul.mubr.msk.bf16.vlgmr.msra.gmra.mrb[20].mxu0 %vm128_vm1, %v3222_v49 }
 0xc50   :  { %2646 = vmatprep.mubr.msk.bf16.mxu0 %vm2858_vm0, %v2857_v1  ;;  %2643 = vmatpush3.bf16.msra.mxu0 %v2718_v20 }
 0xc51   :  { %2644 = vmatprep.subr.bf16.mxu0 %v2857_v1 }
 0xc54   :  { %2645 = vmatpush3.bf16.msra.mxu0 %v2719_v21 }
 0xc55   :  { %2658 = vmatprep.subr.bf16.mxu0 %v2857_v1 }
 0xcac   :  { %v1414_v53 = vpop.permute.xlu0 %1413 }
 0xcad   :  { %v1416_v54 = vadd.f32 %v1414_v53, %v1321_v19 }
 0xcaf   :  { %2796 = vtanh.f32 %v1416_v54 }
 0xcb9   :  { %v2797_v55 = vpop.eup %2796 }
 0xcba   :  { %1420 = vrot.lane.b32.xlu1 %v2797_v55, %s2863_s12 }
 0xcbe   :  { %1520 = vrot.lane.b32.xlu1 %v3042_v51, %s2861_s30 }
 0xd22   :  { %v1480_v57 = vpop.f32.mrb[20].mxu0 }
 0xd23   :  { %v2632_v58 = vpop.f32.mrb[21].mxu0  ;;  %v1493_v8 = vrot.slane %v1480_v57, %v2975_v40 }
 0xd24   :  { %v1483_v28 = vpop.f32.mrb[22].mxu0 }
 0xd25   :  { %v2633_v59 = vpop.f32.mrb[23].mxu0 }
 0xd2c   :  { %v1421_v61 = vpop.permute.xlu1 %1420 }
 0xd2d   :  { %v1423_v63 = vmul.f32 %v1421_v61, %v1418_v60 }
 0xd2f   :  { %v3240_v0 = vadd.f32 %v1424_v62, %v1423_v63 }
 0xd30   :  { %v1521_v2 = vpop.permute.xlu1 %1520 }
 0xd31   :  { %v1523_v3 = vadd.f32 %v1521_v2, %v1480_v57  ;;  %v3244_v5 = vpack.c.bf16 %v3240_v0, %v3240_v0 }
 0xd33   :  { %v1531_v7 = vrot.slane %v1523_v3, %v2975_v40  ;;  %1595 = vrot.lane.b32.xlu0 %v3244_v5, %s2863_s12 }
 0xd35   :  { %1532 = vrot.lane.b32.xlu1 %v1531_v7, %s2864_s19 }
 0xd37   :  { %1494 = vrot.lane.b32.xlu0 %v1493_v8, %s2863_s12  ;;  %v1695_v8 = vld [vmem:[#allocation2 + $0x8] sm:$0xf] }
 0xd3b   :  { %1536 = vrot.lane.b32.xlu0 %v1426_v50, %s2863_s12 }
 0xd3f   :  { %1665 = vrot.lane.b32.xlu0 %v2856_v9, %s2861_s30 }
 0xda5   :  { %v1596_v11 = vpop.permute.xlu0 %1595 }
 0xda6   :  { %2639 = vmatmul.mubr.msk.bf16.vlgmr.msra.gmra.mrb[20].mxu1 %vm128_vm1, %v1596_v11  ;;  %v2720_v11 = vld [vmem:[%s3531_s2] sm:$0xff]  }
 0xda7   :  { %2654 = vmatprep.mubr.msk.bf16.mxu1 %vm2858_vm0, %v2857_v1  ;;  %v1533_v18 = vpop.permute.xlu1 %1532  ;;  %2651 = vmatpush3.bf16.msra.mxu1 %v2720_v11 }
 0xda8   :  { %2652 = vmatprep.subr.bf16.mxu1 %v2857_v1 }
 0xda9   :  { %v1495_v12 = vpop.permute.xlu0 %1494 }
 0xdaa   :  { %v1497_v13 = vadd.f32 %v1495_v12, %v1426_v50  ;;  %v1507_v23 = vadd.f32 %v1505_v22, %v1495_v12 }
 0xdac   :  { %v2463_v14 = vmul.f32 -1.442695, %v1497_v13  ;;  %v2464_v25 = vmul.f32 -1.442695, %v1507_v23 }
 0xdad   :  { %v1537_v32 = vpop.permute.xlu0 %1536 }
 0xdae   :  { %2798 = vpow2.f32 %v2463_v14  ;;  %v1538_v33 = vrot.slane %v1537_v32, 2 }
 0xdb1   :  { %v1666_v37 = vpop.permute.xlu0 %1665 }
 0xdb8   :  { %v2799_v15 = vpop.eup %2798 }
 0xdb9   :  { %v1501_v16 = vadd.f32 1.0, %v2799_v15  ;;  %v3300_v15 = vld [vmem:[%s3534_s5] ss:$0 sm:$0xff] }
 0xdbb   :  { %2800 = vrcp.f32 %v1501_v16 }
 0xdbc   :  { %2802 = vpow2.f32 %v2464_v25 }
 0xdc5   :  { %v2801_v17 = vpop.eup %2800 }
 0xdc6   :  { %v1535_v19 = vmul.f32 %v2801_v17, %v1533_v18  ;;  %v2803_v27 = vpop.eup %2802 }
 0xdc7   :  { %v1511_v30 = vadd.f32 1.0, %v2803_v27 }
 0xdc8   :  { %1541 = vrot.lane.b32.xlu1 %v1535_v19, %s2864_s19 }
 0xdc9   :  { %2804 = vrcp.f32 %v1511_v30 }
 0xdd3   :  { %v2805_v35 = vpop.eup %2804 }
 0xdd4   :  { %v1546_v36 = vsub.f32 1.0, %v2805_v35  ;;  %v1548_v42 = vmul.f32 %v2805_v35, %v3218_v48  ;;  %v2722_v35 = vld [vmem:[%s3536_s3] sm:$0xff]  }
 0xe3a   :  { %v1542_v34 = vpop.permute.xlu1 %1541 }
 0xe3b   :  { %v1544_v6 = vadd.f32 %v1542_v34, %v1538_v33 }
 0xe3d   :  { %2806 = vtanh.f32 %v1544_v6 }
 0xe47   :  { %v2807_v39 = vpop.eup %2806 }
 0xe48   :  { %v1547_v41 = vmul.f32 %v2807_v39, %v1546_v36  ;;  %v2723_v36 = vld [vmem:[%s3536_s3 + $0x8] sm:$0xff]   ;;  %v1774_v39 = vrot.slane %v1695_v8, 2 }
 0xe4a   :  { %v3270_v43 = vadd.f32 %v1548_v42, %v1547_v41 }
 0xe4c   :  { %v3274_v44 = vpack.c.bf16 %v3270_v43, %v3270_v43 }
 0xe4e   :  { %2647 = vmatmul.mubr.msk.bf16.vlgmr.msra.gmra.mrb[24].mxu0 %vm128_vm1, %v3274_v44 }
 0xe4f   :  { %2662 = vmatprep.mubr.msk.bf16.mxu0 %vm2858_vm0, %v2857_v1  ;;  %2659 = vmatpush3.bf16.msra.mxu0 %v2722_v35 }
 0xe50   :  { %2660 = vmatprep.subr.bf16.mxu0 %v2857_v1 }
 0xe53   :  { %2661 = vmatpush3.bf16.msra.mxu0 %v2723_v36 }
 0xe54   :  { %2674 = vmatprep.subr.bf16.mxu0 %v2857_v1 }
 0xe79   :  { %v1646_v24 = vpop.f32.mrb[20].mxu1 }
 0xe7a   :  { %v1668_v4 = vadd.f32 %v1666_v37, %v1646_v24  ;;  %v2640_v53 = vpop.f32.mrb[21].mxu1  ;;  %v1652_v56 = vadd.f32 %v1646_v24, %v1590_v46 }
 0xe7b   :  { %v1649_v54 = vpop.f32.mrb[22].mxu1 }
 0xe7c   :  { %v1676_v55 = vrot.slane %v1668_v4, %v2975_v40  ;;  %v2641_v48 = vpop.f32.mrb[23].mxu1  ;;  %v2471_v57 = vmul.f32 -1.442695, %v1652_v56 }
 0xe7e   :  { %1677 = vrot.lane.b32.xlu1 %v1676_v55, %s2861_s30  ;;  %2808 = vpow2.f32 %v2471_v57 }
 0xe88   :  { %v2809_v58 = vpop.eup %2808 }
 0xe89   :  { %v1656_v28 = vadd.f32 1.0, %v2809_v58 }
 0xe8b   :  { %2810 = vrcp.f32 %v1656_v28 }
 0xe95   :  { %v2811_v59 = vpop.eup %2810 }
 0xe96   :  { %v1687_v13 = vsub.f32 1.0, %v2811_v59  ;;  %v1693_v16 = vmul.f32 %v2811_v59, %v3240_v0 }
 0xef0   :  { %v1678_v60 = vpop.permute.xlu1 %1677 }
 0xef1   :  { %v1680_v61 = vmul.f32 %v2811_v59, %v1678_v60 }
 0xef3   :  { %1682 = vrot.lane.b32.xlu0 %v1680_v61, %s2861_s30 }
 0xef7   :  { %1789 = vrot.lane.b32.xlu0 %v3042_v51, %s2861_s30  ;;  %v2721_v51 = vld [vmem:[%s3531_s2 + $0x8] sm:$0xff]  }
 0xef8   :  { %2653 = vmatpush3.bf16.msra.mxu1 %v2721_v51 }
 0xef9   :  { %2666 = vmatprep.subr.bf16.mxu1 %v2857_v1 }
 0xf21   :  { %v1749_v62 = vpop.f32.mrb[24].mxu0 }
 0xf22   :  { %v1762_v63 = vrot.slane %v1749_v62, %v2975_v40  ;;  %v2648_v2 = vpop.f32.mrb[25].mxu0 }
 0xf23   :  { %v1752_v3 = vpop.f32.mrb[26].mxu0 }
 0xf24   :  { %v2649_v7 = vpop.f32.mrb[27].mxu0  ;;  %1763 = vrot.lane.b32.xlu0 %v1762_v63, %s2863_s12 }
 0xf25   :  { %v2491_v7 = vld [vmem:[%s3537_s6] ss:$0 sm:$0xff] }
 0xf28   :  { %1805 = vrot.lane.b32.xlu0 %v1695_v8, %s2863_s12 }
 0xf2c   :  { %1934 = vrot.lane.b32.xlu0 %v3300_v15, %s2861_s30 }
 0xf65   :  { %v1683_v50 = vpop.permute.xlu0 %1682 }
 0xf66   :  { %v1685_v9 = vadd.f32 %v1683_v50, %v1590_v46 }
 0xf68   :  { %2812 = vtanh.f32 %v1685_v9 }
 0xf69   :  { %v1790_v18 = vpop.permute.xlu0 %1789 }
 0xf6a   :  { %v1792_v20 = vadd.f32 %v1790_v18, %v1749_v62 }
 0xf6c   :  { %v1800_v22 = vrot.slane %v1792_v20, %v2975_v40 }
 0xf72   :  { %v2813_v12 = vpop.eup %2812 }
 0xf73   :  { %1689 = vrot.lane.b32.xlu1 %v2813_v12, %s2863_s12 }
 0xf96   :  { %v1764_v0 = vpop.permute.xlu0 %1763 }
 0xf97   :  { %v1766_v23 = vadd.f32 %v1764_v0, %v1695_v8  ;;  %v1776_v41 = vadd.f32 %v1774_v39, %v1764_v0  ;;  %v1859_v8 = vld [vmem:[#allocation2 + $0x18] sm:$0xf] }
 0xf99   :  { %v2476_v25 = vmul.f32 -1.442695, %v1766_v23  ;;  %v2477_v42 = vmul.f32 -1.442695, %v1776_v41 }
 0xf9a   :  { %v1806_v4 = vpop.permute.xlu0 %1805 }
 0xf9b   :  { %2814 = vpow2.f32 %v2476_v25  ;;  %v1807_v53 = vrot.slane %v1806_v4, 2 }
 0xf9e   :  { %v1935_v60 = vpop.permute.xlu0 %1934 }
 0xfa5   :  { %v2815_v27 = vpop.eup %2814 }
 0xfa6   :  { %v1770_v30 = vadd.f32 1.0, %v2815_v27  ;;  %v1964_v27 = vld [vmem:[#allocation2 + $0x4] sm:$0xf] }
 0xfa8   :  { %2816 = vrcp.f32 %v1770_v30 }
 0xfa9   :  { %2818 = vpow2.f32 %v2477_v42 }
 0xfb2   :  { %v2817_v33 = vpop.eup %2816 }
 0xfb3   :  { %v2819_v37 = vpop.eup %2818 }
 0xfb4   :  { %v1780_v24 = vadd.f32 1.0, %v2819_v37 }
 0xfb6   :  { %2820 = vrcp.f32 %v1780_v24 }
 0xfc0   :  { %v2821_v48 = vpop.eup %2820 }
 0xfc1   :  { %v1815_v46 = vsub.f32 1.0, %v2821_v48  ;;  %v1817_v58 = vmul.f32 %v2821_v48, %v3270_v43 }
 0xfe5   :  { %v1690_v14 = vpop.permute.xlu1 %1689 }
 0xfe6   :  { %v1692_v17 = vmul.f32 %v1690_v14, %v1687_v13 }
 0xfe8   :  { %v3305_v19 = vadd.f32 %v1693_v16, %v1692_v17 }
 0xfea   :  { %v3309_v21 = vpack.c.bf16 %v3305_v19, %v3305_v19 }
 0xfec   :  { %1864 = vrot.lane.b32.xlu1 %v3309_v21, %s2863_s12 }
 0xff0   :  { %1801 = vrot.lane.b32.xlu1 %v1800_v22, %s2864_s19 }
0x105e   :  { %v1865_v32 = vpop.permute.xlu1 %1864 }
0x105f   :  { %2655 = vmatmul.mubr.msk.bf16.vlgmr.msra.gmra.mrb[24].mxu1 %vm128_vm1, %v1865_v32 }
0x1060   :  { %2670 = vmatprep.mubr.msk.bf16.mxu1 %vm2858_vm0, %v2857_v1 }
0x1062   :  { %v1802_v34 = vpop.permute.xlu1 %1801 }
0x1063   :  { %v1804_v6 = vmul.f32 %v2817_v33, %v1802_v34  ;;  %v2724_v33 = vld [vmem:[%s3531_s2] sm:$0xff]  }
0x1064   :  { %2667 = vmatpush3.bf16.msra.mxu1 %v2724_v33 }
0x1065   :  { %1810 = vrot.lane.b32.xlu1 %v1804_v6, %s2864_s19  ;;  %v2725_v6 = vld [vmem:[%s3531_s2 + $0x8] sm:$0xff]   ;;  %2668 = vmatprep.subr.bf16.mxu1 %v2857_v1 }
0x1068   :  { %2669 = vmatpush3.bf16.msra.mxu1 %v2725_v6  ;;  %v2128_v6 = vld [vmem:[#allocation2 + $0x1c] sm:$0xf] }
0x10d7   :  { %v1811_v54 = vpop.permute.xlu1 %1810 }
0x10d8   :  { %v1813_v55 = vadd.f32 %v1811_v54, %v1807_v53 }
0x10da   :  { %2822 = vtanh.f32 %v1813_v55 }
0x10e4   :  { %v2823_v56 = vpop.eup %2822 }
0x10e5   :  { %v1816_v57 = vmul.f32 %v2823_v56, %v1815_v46  ;;  %v2726_v56 = vld [vmem:[%s3536_s3] sm:$0xff]  }
0x10e7   :  { %v3328_v28 = vadd.f32 %v1817_v58, %v1816_v57  ;;  %v2043_v57 = vrot.slane %v1964_v27, 2 }
0x10e9   :  { %v3332_v59 = vpack.c.bf16 %v3328_v28, %v3328_v28 }
0x10eb   :  { %2663 = vmatmul.mubr.msk.bf16.vlgmr.msra.gmra.mrb[28].mxu0 %vm128_vm1, %v3332_v59 }
0x10ec   :  { %2678 = vmatprep.mubr.msk.bf16.mxu0 %vm2858_vm0, %v2857_v1  ;;  %2675 = vmatpush3.bf16.msra.mxu0 %v2726_v56 }
0x10ed   :  { %2676 = vmatprep.subr.bf16.mxu0 %v2857_v1 }
0x1132   :  { %v1915_v61 = vpop.f32.mrb[24].mxu1 }
0x1133   :  { %v1937_v62 = vadd.f32 %v1935_v60, %v1915_v61  ;;  %v2656_v63 = vpop.f32.mrb[25].mxu1  ;;  %v1921_v50 = vadd.f32 %v1915_v61, %v1859_v8 }
0x1134   :  { %v1918_v2 = vpop.f32.mrb[26].mxu1 }
0x1135   :  { %v1945_v3 = vrot.slane %v1937_v62, %v2975_v40  ;;  %v2657_v43 = vpop.f32.mrb[27].mxu1  ;;  %v2484_v9 = vmul.f32 -1.442695, %v1921_v50 }
0x1137   :  { %1946 = vrot.lane.b32.xlu1 %v1945_v3, %s2861_s30  ;;  %2824 = vpow2.f32 %v2484_v9 }
0x113b   :  { %2058 = vrot.lane.b32.xlu1 %v2491_v7, %s2861_s30 }
0x1141   :  { %v2825_v11 = vpop.eup %2824 }
0x1142   :  { %v1925_v12 = vadd.f32 1.0, %v2825_v11 }
0x1144   :  { %2826 = vrcp.f32 %v1925_v12 }
0x114e   :  { %v2827_v51 = vpop.eup %2826 }
0x114f   :  { %v1956_v42 = vsub.f32 1.0, %v2827_v51  ;;  %v1962_v24 = vmul.f32 %v2827_v51, %v3305_v19  ;;  %v2727_v19 = vld [vmem:[%s3536_s3 + $0x8] sm:$0xff]  }
0x1150   :  { %2677 = vmatpush3.bf16.msra.mxu0 %v2727_v19 }
0x11a9   :  { %v1947_v13 = vpop.permute.xlu1 %1946 }
0x11aa   :  { %v1949_v14 = vmul.f32 %v2827_v51, %v1947_v13 }
0x11ac   :  { %1951 = vrot.lane.b32.xlu0 %v1949_v14, %s2861_s30 }
0x11ad   :  { %v2059_v16 = vpop.permute.xlu1 %2058 }
0x11be   :  { %v2018_v17 = vpop.f32.mrb[28].mxu0 }
0x11bf   :  { %v2031_v18 = vrot.slane %v2018_v17, %v2975_v40  ;;  %v2061_v20 = vadd.f32 %v2059_v16, %v2018_v17  ;;  %v2664_v22 = vpop.f32.mrb[29].mxu0 }
0x11c0   :  { %v2021_v0 = vpop.f32.mrb[30].mxu0 }
0x11c1   :  { %v2665_v23 = vpop.f32.mrb[31].mxu0  ;;  %2032 = vrot.lane.b32.xlu0 %v2031_v18, %s2863_s12  ;;  %v2069_v25 = vrot.slane %v2061_v20, %v2975_v40 }
0x11c5   :  { %2070 = vrot.lane.b32.xlu0 %v2069_v25, %s2864_s19 }
0x11c9   :  { %2074 = vrot.lane.b32.xlu0 %v1964_v27, %s2863_s12 }
0x11cd   :  { %2203 = vrot.lane.b32.xlu0 %v3300_v15, %s2861_s30 }
0x121e   :  { %v1952_v30 = vpop.permute.xlu0 %1951 }
0x121f   :  { %v1954_v32 = vadd.f32 %v1952_v30, %v1859_v8 }
0x1221   :  { %2828 = vtanh.f32 %v1954_v32 }
0x122b   :  { %v2829_v34 = vpop.eup %2828 }
0x122c   :  { %1958 = vrot.lane.b32.xlu1 %v2829_v34, %s2863_s12  ;;  %v2233_v34 = vld [vmem:[#allocation2] sm:$0xf] }
0x1233   :  { %v2033_v35 = vpop.permute.xlu0 %2032 }
0x1234   :  { %v2035_v15 = vadd.f32 %v2033_v35, %v1964_v27  ;;  %v2045_v58 = vadd.f32 %v2043_v57, %v2033_v35  ;;  %v467_v57 = vrot.slane %v3018_v31, %v2958_v26  ;;  %v1287_v31 = vrot.slane %v3193_v52, %v2958_v26 }
0x1236   :  { %v2489_v36 = vmul.f32 -1.442695, %v2035_v15  ;;  %v2490_v60 = vmul.f32 -1.442695, %v2045_v58  ;;  %v474_v58 = vrot.slane %v467_v57, %v2958_v26 }
0x1237   :  { %v2071_v48 = vpop.permute.xlu0 %2070 }
0x1238   :  { %2830 = vpow2.f32 %v2489_v36 }
0x123b   :  { %v2075_v63 = vpop.permute.xlu0 %2074 }
0x123c   :  { %v2076_v3 = vrot.slane %v2075_v63, 2 }
0x123f   :  { %v2204_v13 = vpop.permute.xlu0 %2203 }
0x1242   :  { %v2831_v39 = vpop.eup %2830 }
0x1243   :  { %v2039_v41 = vadd.f32 1.0, %v2831_v39 }
0x1245   :  { %2832 = vrcp.f32 %v2039_v41 }
0x1246   :  { %2834 = vpow2.f32 %v2490_v60  ;;  %v741_v60 = vrot.slane %v3063_v10, %v2958_v26  ;;  %v1558_v10 = vrot.slane %v3244_v5, %v2958_v26 }
0x124f   :  { %v2833_v55 = vpop.eup %2832 }
0x1250   :  { %v2073_v46 = vmul.f32 %v2833_v55, %v2071_v48  ;;  %v2835_v61 = vpop.eup %2834 }
0x1251   :  { %v2049_v62 = vadd.f32 1.0, %v2835_v61  ;;  %v748_v61 = vrot.slane %v741_v60, %v2958_v26 }
0x1253   :  { %2836 = vrcp.f32 %v2049_v62  ;;  %v1014_v62 = vrot.slane %v3127_v29, %v2958_v26  ;;  %v1827_v29 = vrot.slane %v3309_v21, %v2958_v26 }
0x1255   :  { %v1021_v63 = vrot.slane %v1014_v62, %v2958_v26 }
0x125d   :  { %v2837_v50 = vpop.eup %2836 }
0x125e   :  { %v2084_v1 = vsub.f32 1.0, %v2837_v50  ;;  %v2086_v11 = vmul.f32 %v2837_v50, %v3328_v28 }
0x129e   :  { %v1959_v37 = vpop.permute.xlu1 %1958 }
0x129f   :  { %v1961_v4 = vmul.f32 %v1959_v37, %v1956_v42 }
0x12a1   :  { %v3361_v53 = vadd.f32 %v1962_v24, %v1961_v4 }
0x12a3   :  { %v3365_v54 = vpack.c.bf16 %v3361_v53, %v3361_v53 }
0x12a5   :  { %2133 = vrot.lane.b32.xlu1 %v3365_v54, %s2863_s12  ;;  %v2096_v52 = vrot.slane %v3365_v54, %v2958_v26  ;;  %v762_v54 = vrot.slane %v3138_v45, %v2958_v26 }
0x12a9   :  { %2079 = vrot.lane.b32.xlu1 %v2073_v46, %s2864_s19 }
0x12ad   :  { %2327 = vrot.lane.b32.xlu1 %v2491_v7, %s2861_s30 }
0x1317   :  { %v2134_v2 = vpop.permute.xlu1 %2133 }
0x1318   :  { %2671 = vmatmul.mubr.msk.bf16.vlgmr.msra.gmra.mrb[28].mxu1 %vm128_vm1, %v2134_v2  ;;  %v1294_v2 = vrot.slane %v1287_v31, %v2958_v26 }
0x131b   :  { %v2080_v43 = vpop.permute.xlu1 %2079 }
0x131c   :  { %v2082_v8 = vadd.f32 %v2080_v43, %v2076_v3  ;;  %v1565_v3 = vrot.slane %v1558_v10, %v2958_v26  ;;  %v1834_v43 = vrot.slane %v1827_v29, %v2958_v26 }
0x131e   :  { %2838 = vtanh.f32 %v2082_v8  ;;  %v2103_v8 = vrot.slane %v2096_v52, %v2958_v26 }
0x131f   :  { %v2328_v28 = vpop.permute.xlu1 %2327 }
0x1328   :  { %v2839_v9 = vpop.eup %2838 }
0x1329   :  { %v2085_v7 = vmul.f32 %v2839_v9, %v2084_v1  ;;  %v488_v1 = vrot.slane %v3086_v38, %v2958_v26 }
0x132b   :  { %v3380_v12 = vadd.f32 %v2086_v11, %v2085_v7  ;;  %v495_v9 = vrot.slane %v488_v1, %v2958_v26  ;;  %v769_v7 = vrot.slane %v762_v54, %v2958_v26  ;;  %v1035_v11 = vrot.slane %v3172_v47, %v2958_v26 }
0x132d   :  { %v3384_v51 = vpack.c.bf16 %v3380_v12, %v3380_v12  ;;  %v1042_v38 = vrot.slane %v1035_v11, %v2958_v26 }
0x132f   :  { %2679 = vmatmul.mubr.msk.bf16.vlgmr.msra.gmra.mrb[32].mxu0 %vm128_vm1, %v3384_v51 }
0x13eb   :  { %v2184_v14 = vpop.f32.mrb[28].mxu1 }
0x13ec   :  { %v2206_v16 = vadd.f32 %v2204_v13, %v2184_v14  ;;  %v2672_v17 = vpop.f32.mrb[29].mxu1  ;;  %v2190_v35 = vadd.f32 %v2184_v14, %v2128_v6  ;;  %v2312_v13 = vrot.slane %v2233_v34, 2 }
0x13ed   :  { %v2187_v18 = vpop.f32.mrb[30].mxu1 }
0x13ee   :  { %v2214_v20 = vrot.slane %v2206_v16, %v2975_v40  ;;  %v2673_v22 = vpop.f32.mrb[31].mxu1  ;;  %v2497_v15 = vmul.f32 -1.442695, %v2190_v35  ;;  %v1308_v16 = vrot.slane %v3222_v49, %v2958_v26  ;;  %v1578_v18 = vrot.slane %v3274_v44, %v2958_v26 }
0x13ef   :  { %v2116_v22 = vrot.slane %v3384_v51, %v2958_v26 }
0x13f0   :  { %2215 = vrot.lane.b32.xlu0 %v2214_v20, %s2861_s30  ;;  %2840 = vpow2.f32 %v2497_v15  ;;  %v1315_v45 = vrot.slane %v1308_v16, %v2958_v26  ;;  %v1585_v47 = vrot.slane %v1578_v18, %v2958_v26  ;;  %v1847_v20 = vrot.slane %v3332_v59, %v2958_v26 }
0x13f2   :  { %v1854_v49 = vrot.slane %v1847_v20, %v2958_v26 }
0x13fa   :  { %v2841_v36 = vpop.eup %2840 }
0x13fb   :  { %v2194_v39 = vadd.f32 1.0, %v2841_v36 }
0x13fd   :  { %2842 = vrcp.f32 %v2194_v39 }
0x1402   :  { %v2287_v0 = vpop.f32.mrb[32].mxu0 }
0x1403   :  { %v2300_v23 = vrot.slane %v2287_v0, %v2975_v40  ;;  %v2330_v25 = vadd.f32 %v2328_v28, %v2287_v0  ;;  %v2680_v27 = vpop.f32.mrb[33].mxu0  ;;  %v2123_v28 = vrot.slane %v2116_v22, %v2958_v26 }
0x1404   :  { %v2290_v30 = vpop.f32.mrb[34].mxu0 }
0x1405   :  { %v2338_v32 = vrot.slane %v2330_v25, %v2975_v40  ;;  %2301 = vrot.lane.b32.xlu1 %v2300_v23, %s2863_s12  ;;  %v2681_v33 = vpop.f32.mrb[35].mxu0 }
0x1407   :  { %2339 = vrot.lane.b32.xlu0 %v2338_v32, %s2864_s19  ;;  %v3395_v41 = vpop.eup %2842 }
0x140b   :  { %2343 = vrot.lane.b32.xlu0 %v2233_v34, %s2863_s12 }
0x1462   :  { %v2216_v42 = vpop.permute.xlu0 %2215 }
0x1463   :  { %v2218_v40 = vmul.f32 %v3395_v41, %v2216_v42 }
0x1465   :  { %2220 = vrot.lane.b32.xlu1 %v2218_v40, %s2861_s30 }
0x1477   :  { %v2302_v37 = vpop.permute.xlu1 %2301 }
0x1478   :  { %v2304_v24 = vadd.f32 %v2302_v37, %v2233_v34  ;;  %v2314_v14 = vadd.f32 %v2312_v13, %v2302_v37 }
0x1479   :  { %v2340_v56 = vpop.permute.xlu0 %2339 }
0x147a   :  { %v2502_v4 = vmul.f32 -1.442695, %v2304_v24  ;;  %v2503_v17 = vmul.f32 -1.442695, %v2314_v14 }
0x147c   :  { %2844 = vpow2.f32 %v2502_v4  ;;  %v2225_v4 = vsub.f32 1.0, %v3395_v41 }
0x147d   :  { %v2344_v23 = vpop.permute.xlu0 %2343 }
0x147e   :  { %v2345_v25 = vrot.slane %v2344_v23, 2 }
0x1486   :  { %v2845_v55 = vpop.eup %2844 }
0x1487   :  { %v2308_v48 = vadd.f32 1.0, %v2845_v55 }
0x1489   :  { %2846 = vrcp.f32 %v2308_v48 }
0x1493   :  { %v2847_v46 = vpop.eup %2846 }
0x1494   :  { %v2342_v19 = vmul.f32 %v2847_v46, %v2340_v56 }
0x1496   :  { %2348 = vrot.lane.b32.xlu1 %v2342_v19, %s2864_s19 }
0x149a   :  { %475 = vrot.lane.b32.xlu1 %v474_v58, %s2863_s12 }
0x149e   :  { %749 = vrot.lane.b32.xlu1 %v748_v61, %s2863_s12 }
0x14a2   :  { %1022 = vrot.lane.b32.xlu1 %v1021_v63, %s2863_s12 }
0x14a6   :  { %1295 = vrot.lane.b32.xlu1 %v1294_v2, %s2863_s12 }
0x14aa   :  { %1566 = vrot.lane.b32.xlu1 %v1565_v3, %s2863_s12 }
0x14ae   :  { %1835 = vrot.lane.b32.xlu1 %v1834_v43, %s2863_s12 }
0x14b2   :  { %2104 = vrot.lane.b32.xlu1 %v2103_v8, %s2863_s12 }
0x14d7   :  { %v2221_v5 = vpop.permute.xlu1 %2220 }
0x14d8   :  { %v2223_v50 = vadd.f32 %v2221_v5, %v2128_v6 }
0x14da   :  { %2848 = vtanh.f32 %v2223_v50 }
0x14db   :  { %2850 = vpow2.f32 %v2503_v17 }
0x14e4   :  { %v2849_v21 = vpop.eup %2848 }
0x14e5   :  { %2227 = vrot.lane.b32.xlu0 %v2849_v21, %s2863_s12  ;;  %v2851_v44 = vpop.eup %2850 }
0x14e6   :  { %v2318_v0 = vadd.f32 1.0, %v2851_v44 }
0x14e8   :  { %2852 = vrcp.f32 %v2318_v0 }
0x14e9   :  { %496 = vrot.lane.b32.xlu0 %v495_v9, %s2864_s19 }
0x14ed   :  { %770 = vrot.lane.b32.xlu0 %v769_v7, %s2864_s19 }
0x14f1   :  { %1043 = vrot.lane.b32.xlu0 %v1042_v38, %s2864_s19 }
0x14f2   :  { %v2853_v32 = vpop.eup %2852 }
0x14f3   :  { %v2353_v34 = vsub.f32 1.0, %v2853_v32  ;;  %v2355_v15 = vmul.f32 %v2853_v32, %v3380_v12  ;;  %v2231_v12 = vmul.f32 %v3395_v41, %v3361_v53 }
0x14f5   :  { %1316 = vrot.lane.b32.xlu0 %v1315_v45, %s2864_s19 }
0x14f9   :  { %1586 = vrot.lane.b32.xlu0 %v1585_v47, %s2864_s19 }
0x14fd   :  { %1855 = vrot.lane.b32.xlu0 %v1854_v49, %s2864_s19 }
0x1501   :  { %2124 = vrot.lane.b32.xlu0 %v2123_v28, %s2864_s19 }
0x1508   :  { %v2349_v27 = vpop.permute.xlu1 %2348 }
0x1509   :  { %v2351_v59 = vadd.f32 %v2349_v27, %v2345_v25 }
0x150b   :  { %2854 = vtanh.f32 %v2351_v59 }
0x150c   :  { %v476_v30 = vpop.permute.xlu1 %475 }
0x150d   :  { %479 = vst.msk [vmem:[%s3538_s7] sm:$0x1] %vm478_vm5, %v476_v30 }
0x1510   :  { %v750_v51 = vpop.permute.xlu1 %749 }
0x1511   :  { %2427 = vst.msk [vmem:[%s3538_s7 + $0x1] sm:$0x1] %vm478_vm5, %v750_v51 }
0x1514   :  { %v1023_v33 = vpop.permute.xlu1 %1022 }
0x1515   :  { %v2855_v6 = vpop.eup %2854  ;;  %2440 = vst.msk [vmem:[%s3538_s7 + $0x2] sm:$0x1] %vm478_vm5, %v1023_v33 }
0x1516   :  { %v2354_v35 = vmul.f32 %v2855_v6, %v2353_v34 }
0x1518   :  { %v1296_v36 = vpop.permute.xlu1 %1295  ;;  %v2356_v39 = vadd.f32 %v2355_v15, %v2354_v35 }
0x1519   :  { %2453 = vst.msk [vmem:[%s3538_s7 + $0x3] sm:$0x1] %vm478_vm5, %v1296_v36 }
0x151a   :  { %v2377_v42 = vpack.c.bf16 %v2356_v39, %v2356_v39 }
0x151c   :  { %v2385_v40 = vrot.slane %v2377_v42, %v2958_v26  ;;  %v1567_v24 = vpop.permute.xlu1 %1566 }
0x151e   :  { %v2392_v37 = vrot.slane %v2385_v40, %v2958_v26 }
0x1520   :  { %2393 = vrot.lane.b32.xlu0 %v2392_v37, %s2864_s19  ;;  %v1836_v46 = vpop.permute.xlu1 %1835 }
0x1524   :  { %v2105_v61 = vpop.permute.xlu1 %2104 }
0x1557   :  { %v2228_v55 = vpop.permute.xlu0 %2227 }
0x1558   :  { %v2230_v48 = vmul.f32 %v2228_v55, %v2225_v4 }
0x155a   :  { %v2232_v56 = vadd.f32 %v2231_v12, %v2230_v48 }
0x155b   :  { %v497_v19 = vpop.permute.xlu0 %496 }
0x155c   :  { %v2357_v57 = vpack.c.bf16 %v2232_v56, %v2232_v56  ;;  %2415 = vst.msk [vmem:[%s3538_s7 + $0x7] sm:$0x1] %vm500_vm6, %v497_v19 }
0x155e   :  { %v2365_v58 = vrot.slane %v2357_v57, %v2958_v26 }
0x155f   :  { %v771_v60 = vpop.permute.xlu0 %770 }
0x1560   :  { %2428 = vst.msk [vmem:[%s3538_s7 + $0x6] sm:$0x1] %vm500_vm6, %v771_v60  ;;  %v2372_v53 = vrot.slane %v2365_v58, %v2958_v26 }
0x1561   :  { %2492 = vst.msk [vmem:[%s3538_s7 + $0x6] sm:$0x1] %vm478_vm5, %v2105_v61 }
0x1562   :  { %2373 = vrot.lane.b32.xlu1 %v2372_v53, %s2863_s12 }
0x1563   :  { %v1044_v41 = vpop.permute.xlu0 %1043 }
0x1564   :  { %2441 = vst.msk [vmem:[%s3538_s7 + $0x5] sm:$0x1] %vm500_vm6, %v1044_v41 }
0x1565   :  { %2479 = vst.msk [vmem:[%s3538_s7 + $0x5] sm:$0x1] %vm478_vm5, %v1836_v46 }
0x1567   :  { %v1317_v62 = vpop.permute.xlu0 %1316 }
0x1568   :  { %2454 = vst.msk [vmem:[%s3538_s7 + $0x4] sm:$0x1] %vm500_vm6, %v1317_v62 }
0x1569   :  { %2466 = vst.msk [vmem:[%s3538_s7 + $0x4] sm:$0x1] %vm478_vm5, %v1567_v24 }
0x156b   :  { %v1587_v26 = vpop.permute.xlu0 %1586 }
0x156c   :  { %2467 = vst.msk [vmem:[%s3538_s7 + $0x3] sm:$0x1] %vm500_vm6, %v1587_v26 }
0x156f   :  { %v1856_v63 = vpop.permute.xlu0 %1855 }
0x1570   :  { %2480 = vst.msk [vmem:[%s3538_s7 + $0x2] sm:$0x1] %vm500_vm6, %v1856_v63 }
0x1573   :  { %v2125_v31 = vpop.permute.xlu0 %2124 }
0x1574   :  { %2493 = vst.msk [vmem:[%s3538_s7 + $0x1] sm:$0x1] %vm500_vm6, %v2125_v31 }
0x1592   :  { %v2394_v2 = vpop.permute.xlu0 %2393 }
0x1593   :  { %2396 = vst.msk [vmem:[%s3538_s7] sm:$0x1] %vm500_vm6, %v2394_v2 }
0x15d4   :  { %v2374_v10 = vpop.permute.xlu1 %2373 }
0x15d5   :  { %2505 = vst.msk [vmem:[%s3538_s7 + $0x7] sm:$0x1] %vm478_vm5, %v2374_v10 }

// kernel: token_classificator_forward.3
= control target key start
LH: loop header
LB: loop body
LE: loop exit
PB: predicated region body
PF: predicated region fallthrough
CT: control target
= control target key end

     0   :  { %v51_v0 = vlaneseq  ;;  %v3112_v1 = vmov 0.0   ;;  %vm3113_vm0 = vmmov 0   ;;  %v3114_v4 = vmov 0   ;;  %s3118_s11 = smov 96   ;;  %s3119_s16 = smov 32   ;;  %s3830_s1 = inlined_call_operand.vmem [shape: bf16[64,192], index: 1, kind: input, shape index: {}]   ;;  %s3831_s2 = inlined_call_operand.vmem [shape: bf16[32,96], index: 2, kind: input, shape index: {}]   ;;  %s3832_s0 = inlined_call_operand.vmem [shape: bf16[8,2,64], index: 0, kind: input, shape index: {}]   ;;  %s3833_s5 = inlined_call_operand.vmem [shape: f32[1,32], index: 5, kind: input, shape index: {}]   ;;  %s3834_s4 = inlined_call_operand.vmem [shape: f32[1,192], index: 4, kind: input, shape index: {}]   ;;  %s3835_s3 = inlined_call_operand.vmem [shape: bf16[32,96], index: 3, kind: input, shape index: {}]   ;;  %s3836_s6 = inlined_call_operand.vmem [shape: f32[1,32], index: 6, kind: input, shape index: {}]   ;;  %s3837_s7 = inlined_call_operand.vmem [shape: bf16[64,8], index: 7, kind: input, shape index: {}]   ;;  %s3838_s8 = inlined_call_operand.vmem [shape: f32[1,8], index: 8, kind: input, shape index: {}]   ;;  %s3839_s9 = inlined_call_operand.vmem [shape: f32[8,2,8], index: 9, kind: output, shape index: {}]  }
   0x1   :  { %2787 = vmatprep.subr.bf16.mxu1 %v3112_v1  ;;  %v2935_v2 = vld [vmem:[%s3830_s1 + $0x4] ss:$8 sps:$4 sm:$0xff]   ;;  %2791 = vmatprep.mubr.msk.bf16.mxu1 %vm3113_vm0, %v3112_v1  ;;  %v3115_v5 = vmov 1966171168   ;;  %v2938_v7 = vld [vmem:[%s3830_s1] ss:$8 sps:$4 sm:$0xff]  }
   0x2   :  { %v2937_v3 = vld [vmem:[%s3831_s2] sm:$0xff]   ;;  %194 = vmatprep.mubr.bf16.mxu0 %v3114_v4  ;;  %v74_v6 = vunpack.c.l.s4 %v3115_v5  ;;  %162 = vmatprep.subr.bf16.mxu0 %v2935_v2  ;;  %v3183_v8 = vshrl.u32 %v51_v0, 7  ;;  %v2939_v9 = vld [vmem:[%s3830_s1 + $0x14] ss:$8 sps:$4 sm:$0xff]   ;;  %v2941_v11 = vld [vmem:[%s3831_s2 + $0x8] sm:$0xff]   ;;  %vm158_vm1 = vcmask 523264  }
   0x3   :  { %2788 = vmatpush3.bf16.msra.mxu1 %v2937_v3  ;;  %163 = vmatpush1.bf16.msra.mxu0 %v2938_v7  ;;  %v2942_v12 = vld [vmem:[%s3830_s1 + $0x10] ss:$8 sps:$4 sm:$0xff]   ;;  %v2943_v13 = vld [vmem:[%s3830_s1 + $0x24] ss:$8 sps:$4 sm:$0xff]   ;;  %v2945_v14 = vld [vmem:[%s3830_s1 + $0x20] ss:$8 sps:$4 sm:$0xff]  }
   0x4   :  { %v75_v10 = vunpack.c.0.s8 %v74_v6  ;;  %2789 = vmatprep.subr.bf16.mxu1 %v3112_v1  ;;  %164 = vmatprep.subr.bf16.mxu0 %v2939_v9  ;;  %v2946_v16 = vld [vmem:[%s3830_s1 + $0x34] ss:$8 sps:$4 sm:$0xff]   ;;  %v33_v17 = vld [vmem:[%s3832_s0] sm:$0x1]  ;;  %v34_v18 = vld [vmem:[%s3832_s0 + $0x1] sm:$0x1] }
   0x5   :  { %v35_v19 = vld [vmem:[%s3832_s0 + $0x2] sm:$0x1]  ;;  %v36_v20 = vld [vmem:[%s3832_s0 + $0x3] sm:$0x1]  ;;  %v37_v21 = vld [vmem:[%s3832_s0 + $0x4] sm:$0x1]  ;;  %v69_v22 = vcombine.low %v33_v17, %v34_v18 }
   0x6   :  { %v3202_v15 = vsub.s32 %v75_v10, %v3183_v8  ;;  %v38_v23 = vld [vmem:[%s3832_s0 + $0x5] sm:$0x1]  ;;  %v39_v24 = vld [vmem:[%s3832_s0 + $0x6] sm:$0x1]  ;;  %v40_v25 = vld [vmem:[%s3832_s0 + $0x7] sm:$0x1]  ;;  %v70_v26 = vcombine.low %v35_v19, %v36_v20 }
   0x7   :  { %2790 = vmatpush3.bf16.msra.mxu1 %v2941_v11  ;;  %165 = vmatpush1.bf16.msra.mxu0 %v2942_v12  ;;  %v2948_v27 = vld [vmem:[%s3830_s1 + $0x30] ss:$8 sps:$4 sm:$0xff]   ;;  %v71_v28 = vcombine.low %v37_v21, %v38_v23  ;;  %v72_v29 = vcombine.low %v39_v24, %v40_v25  ;;  %v3240_v31 = vld [vmem:[%s3833_s5] ss:$0 sm:$0xff]  ;;  %s3116_s0 = smov 64   ;;  %v53_v51 = vsub.s32 0, %v3183_v8 }
   0x8   :  { %2795 = vmatprep.subr.bf16.mxu1 %v3112_v1  ;;  %166 = vmatprep.subr.bf16.mxu0 %v2943_v13  ;;  %v79_v30 = vrot.slane %v69_v22, %v3202_v15  ;;  %v86_v32 = vrot.slane %v70_v26, %v3202_v15  ;;  %v3117_v40 = vmov 1983009808   ;;  %v49_v52 = vld [vmem:[%s3834_s4] sm:$0x3]  ;;  %v57_v53 = vsub.s32 1, %v3183_v8 }
   0x9   :  { %338 = vrot.lane.b32.xlu0 %v3240_v31, %s3116_s0  ;;  %v93_v33 = vrot.slane %v71_v28, %v3202_v15  ;;  %v100_v34 = vrot.slane %v72_v29, %v3202_v15  ;;  %v212_v41 = vunpack.c.l.s4 %v3117_v40  ;;  %v54_v54 = vrot.slane %v49_v52, %v53_v51  ;;  %v2949_v26 = vld [vmem:[%s3835_s3] sm:$0xff]  }
   0xa   :  { %2792 = vmatmul.mubr.bf16.vlgmr.msra.gmra.mrb[0].mxu1 %v3114_v4  ;;  %v101_v35 = vcombine.low %v79_v30, %v86_v32  ;;  %v58_v55 = vrot.slane %v49_v52, %v57_v53  ;;  %vm253_vm2 = vcmask 1041408   ;;  %vm254_vm3 = vcmask 519170   ;;  %v2951_v28 = vld [vmem:[%s3831_s2] sm:$0xff]   ;;  %v2952_v30 = vld [vmem:[%s3831_s2 + $0x8] sm:$0xff]  }
   0xb   :  { %2799 = vmatprep.mubr.msk.bf16.mxu1 %vm3113_vm0, %v3112_v1  ;;  %167 = vmatpush1.bf16.msra.mxu0 %v2945_v14  ;;  %v102_v36 = vcombine.low %v93_v33, %v100_v34  ;;  %v213_v42 = vunpack.c.0.s8 %v212_v41  ;;  %vm3265_vm4 = vmor %vm254_vm3, %vm253_vm2  ;;  %vm281_vm5 = vcmask 261120   ;;  %v2953_v3 = vld [vmem:[%s3831_s2] sm:$0xff]   ;;  %vm509_vm6 = vcmask 253952  }
   0xc   :  { %168 = vmatprep.subr.bf16.mxu0 %v2946_v16  ;;  %v109_v37 = vrot.slane %v101_v35, %v3202_v15  ;;  %2796 = vmatpush3.bf16.msra.mxu1 %v2949_v26  ;;  %vm531_vm7 = vcmask 516352   ;;  %vm2620_vm8 = vcmask 58368  }
   0xd   :  { %v116_v38 = vrot.slane %v102_v36, %v3202_v15  ;;  %v3256_v44 = vsub.s32 %v213_v42, %v3183_v8  ;;  %2797 = vmatprep.subr.bf16.mxu1 %v3112_v1 }
   0xf   :  { %169 = vmatpush1.bf16.msra.mxu0 %v2948_v27  ;;  %v117_v39 = vcombine.low %v109_v37, %v116_v38  ;;  %v2950_v27 = vld [vmem:[%s3835_s3 + $0x8] sm:$0xff]  }
  0x10   :  { %2819 = vmatprep.subr.bf16.mxu0 %v3112_v1  ;;  %2798 = vmatpush3.bf16.msra.mxu1 %v2950_v27 }
  0x11   :  { %2803 = vmatprep.subr.bf16.mxu1 %v3112_v1 }
  0x12   :  { %2641 = vmatmul.mubr.msk.bf16.vlgmr.msra.gmra.mrb[0].mxu0 %vm158_vm1, %v117_v39 }
  0x13   :  { %2823 = vmatprep.mubr.msk.bf16.mxu0 %vm3113_vm0, %v3112_v1  ;;  %2800 = vmatmul.mubr.bf16.vlgmr.msra.gmra.mrb[4].mxu1 %v3114_v4 }
  0x14   :  { %2804 = vmatpush3.bf16.msra.mxu1 %v2951_v28  ;;  %2807 = vmatprep.mubr.msk.bf16.mxu1 %vm3113_vm0, %v3112_v1 }
  0x15   :  { %2805 = vmatprep.subr.bf16.mxu1 %v3112_v1  ;;  %2820 = vmatpush3.bf16.msra.mxu0 %v2953_v3 }
  0x16   :  { %2821 = vmatprep.subr.bf16.mxu0 %v3112_v1 }
  0x18   :  { %2806 = vmatpush3.bf16.msra.mxu1 %v2952_v30 }
  0x19   :  { %2811 = vmatprep.subr.bf16.mxu1 %v3112_v1 }
  0x7b   :  { %v339_v43 = vpop.permute.xlu0 %338 }
  0xdd   :  { %v319_v45 = vpop.f32.mrb[0].mxu1 }
  0xde   :  { %v341_v46 = vadd.f32 %v339_v43, %v319_v45  ;;  %v2793_v47 = vpop.f32.mrb[1].mxu1 }
  0xdf   :  { %v322_v48 = vpop.f32.mrb[2].mxu1 }
  0xe0   :  { %v349_v49 = vrot.slane %v341_v46, %v3256_v44  ;;  %v2794_v50 = vpop.f32.mrb[3].mxu1 }
  0xe2   :  { %350 = vrot.lane.b32.xlu0 %v349_v49, %s3116_s0 }
  0xe5   :  { %v196_v56 = vpop.f32.mrb[0].mxu0 }
  0xe6   :  { %v197_v57 = vadd.f32 %v196_v56, %v54_v54  ;;  %v198_v58 = vpop.f32.mrb[1].mxu0  ;;  %v420_v4 = vpop.f32.mrb[4].mxu1 }
  0xe7   :  { %v199_v59 = vadd.f32 %v198_v58, %v58_v55  ;;  %v200_v60 = vpop.f32.mrb[2].mxu0  ;;  %v2801_v38 = vpop.f32.mrb[5].mxu1  ;;  %v3325_v58 = vld [vmem:[%s3836_s6] ss:$0 sm:$0xff] }
  0xe8   :  { %v201_v61 = vadd.f32 %v200_v60, %v54_v54  ;;  %v202_v62 = vpop.f32.mrb[3].mxu0  ;;  %v423_v39 = vpop.f32.mrb[6].mxu1 }
  0xe9   :  { %v209_v63 = vcombine.low %v197_v57, %v199_v59  ;;  %v210_v0 = vcombine.high %v197_v57, %v199_v59  ;;  %v203_v2 = vadd.f32 %v202_v62, %v58_v55  ;;  %v2802_v40 = vpop.f32.mrb[7].mxu1 }
  0xeb   :  { %v217_v5 = vrot.slane %v209_v63, %v3256_v44  ;;  %v224_v6 = vrot.slane %v210_v0, %v3256_v44  ;;  %v227_v7 = vcombine.low %v201_v61, %v203_v2  ;;  %v228_v8 = vcombine.high %v201_v61, %v203_v2 }
  0xec   :  { %v433_v63 = vrot.slane %v420_v4, %v3256_v44 }
  0xed   :  { %v225_v9 = vcombine.high %v217_v5, %v217_v5  ;;  %v226_v10 = vcombine.high %v224_v6, %v224_v6  ;;  %256 = vst.msk [vmem:[#allocation2] sm:$0xf] %vm3265_vm4, %v217_v5  ;;  %258 = vst.msk [vmem:[#allocation2 + $0x8] sm:$0xf] %vm3265_vm4, %v224_v6  ;;  %v235_v11 = vrot.slane %v227_v7, %v3256_v44  ;;  %v2954_v5 = vld [vmem:[%s3831_s2 + $0x8] sm:$0xff]  }
  0xee   :  { %v242_v12 = vrot.slane %v228_v8, %v3256_v44  ;;  %2822 = vmatpush3.bf16.msra.mxu0 %v2954_v5 }
  0xef   :  { %257 = vst.msk [vmem:[#allocation2 + $0x4] sm:$0xf] %vm3265_vm4, %v225_v9  ;;  %259 = vst.msk [vmem:[#allocation2 + $0xc] sm:$0xf] %vm3265_vm4, %v226_v10  ;;  %v243_v13 = vcombine.high %v235_v11, %v235_v11  ;;  %2835 = vmatprep.subr.bf16.mxu0 %v3112_v1 }
  0xf0   :  { %v244_v14 = vcombine.high %v242_v12, %v242_v12  ;;  %260 = vst.msk [vmem:[#allocation2 + $0x10] sm:$0xf] %vm3265_vm4, %v235_v11  ;;  %262 = vst.msk [vmem:[#allocation2 + $0x18] sm:$0xf] %vm3265_vm4, %v242_v12 }
  0xf1   :  { %261 = vst.msk [vmem:[#allocation2 + $0x14] sm:$0xf] %vm3265_vm4, %v243_v13 }
  0xf2   :  { %263 = vst.msk [vmem:[#allocation2 + $0x1c] sm:$0xf] %vm3265_vm4, %v244_v14 }
  0xf4   :  { %v264_v16 = vld [vmem:[#allocation2] sm:$0xf] }
  0xf5   :  { %v325_v17 = vadd.f32 %v319_v45, %v264_v16 }
  0xf6   :  { %v534_v50 = vld [vmem:[#allocation2 + $0x4] sm:$0xf] }
  0xf7   :  { %v2644_v18 = vmul.f32 -1.442695, %v325_v17  ;;  %v640_v5 = vld [vmem:[#allocation2 + $0x18] sm:$0xf] }
  0xf9   :  { %2983 = vpow2.f32 %v2644_v18  ;;  %v369_v11 = vld [vmem:[#allocation2 + $0x1c] sm:$0xf] }
 0x103   :  { %v2984_v19 = vpop.eup %2983 }
 0x104   :  { %v329_v20 = vadd.f32 1.0, %v2984_v19 }
 0x106   :  { %2985 = vrcp.f32 %v329_v20 }
 0x110   :  { %v2986_v21 = vpop.eup %2985 }
 0x111   :  { %v360_v32 = vsub.f32 1.0, %v2986_v21  ;;  %v366_v34 = vmul.f32 0.0, %v2986_v21 }
 0x154   :  { %v351_v22 = vpop.permute.xlu0 %350 }
 0x155   :  { %v353_v23 = vmul.f32 %v2986_v21, %v351_v22  ;;  %v2955_v22 = vld [vmem:[%s3835_s3] sm:$0xff]  }
 0x157   :  { %355 = vrot.lane.b32.xlu1 %v353_v23, %s3116_s0  ;;  %v2956_v23 = vld [vmem:[%s3835_s3 + $0x8] sm:$0xff]  }
 0x1c9   :  { %v356_v24 = vpop.permute.xlu1 %355 }
 0x1ca   :  { %v358_v25 = vadd.f32 %v356_v24, %v264_v16  ;;  %v445_v24 = vrot.slane %v369_v11, 2 }
 0x1cc   :  { %2987 = vtanh.f32 %v358_v25 }
 0x1d6   :  { %v2988_v29 = vpop.eup %2987 }
 0x1d7   :  { %362 = vrot.lane.b32.xlu1 %v2988_v29, %s3118_s11 }
 0x1db   :  { %609 = vrot.lane.b32.xlu1 %v3240_v31, %s3116_s0 }
 0x249   :  { %v363_v33 = vpop.permute.xlu1 %362 }
 0x24a   :  { %v365_v35 = vmul.f32 %v363_v33, %v360_v32 }
 0x24c   :  { %v367_v36 = vadd.f32 %v366_v34, %v365_v35 }
 0x24d   :  { %v610_v42 = vpop.permute.xlu1 %609 }
 0x24e   :  { %v3312_v37 = vpack.c.bf16 %v367_v36, %v367_v36 }
 0x250   :  { %539 = vrot.lane.b32.xlu0 %v3312_v37, %s3118_s11 }
 0x2c2   :  { %v540_v41 = vpop.permute.xlu0 %539 }
 0x2c3   :  { %2808 = vmatmul.mubr.msk.bf16.vlgmr.msra.gmra.mrb[8].mxu1 %vm281_vm5, %v540_v41 }
 0x2c4   :  { %2815 = vmatprep.mubr.msk.bf16.mxu1 %vm3113_vm0, %v3112_v1  ;;  %2812 = vmatpush3.bf16.msra.mxu1 %v2955_v22  ;;  %v2959_v22 = vld [vmem:[%s3831_s2] sm:$0xff]  }
 0x2c5   :  { %2813 = vmatprep.subr.bf16.mxu1 %v3112_v1 }
 0x2c8   :  { %2814 = vmatpush3.bf16.msra.mxu1 %v2956_v23  ;;  %v2960_v23 = vld [vmem:[%s3831_s2 + $0x8] sm:$0xff]  }
 0x2c9   :  { %2827 = vmatprep.subr.bf16.mxu1 %v3112_v1 }
 0x396   :  { %v590_v43 = vpop.f32.mrb[8].mxu1 }
 0x397   :  { %v612_v45 = vadd.f32 %v610_v42, %v590_v43  ;;  %v2809_v46 = vpop.f32.mrb[9].mxu1  ;;  %v596_v51 = vadd.f32 %v590_v43, %v534_v50 }
 0x398   :  { %v593_v47 = vpop.f32.mrb[10].mxu1 }
 0x399   :  { %v620_v48 = vrot.slane %v612_v45, %v3256_v44  ;;  %v2810_v49 = vpop.f32.mrb[11].mxu1  ;;  %v2654_v52 = vmul.f32 -1.442695, %v596_v51 }
 0x39b   :  { %621 = vrot.lane.b32.xlu0 %v620_v48, %s3116_s0  ;;  %2989 = vpow2.f32 %v2654_v52 }
 0x3a5   :  { %v2990_v53 = vpop.eup %2989 }
 0x3a6   :  { %v600_v54 = vadd.f32 1.0, %v2990_v53 }
 0x3a8   :  { %2991 = vrcp.f32 %v600_v54  ;;  %v807_v54 = vld [vmem:[#allocation2 + $0x8] sm:$0xf] }
 0x3b2   :  { %v2992_v55 = vpop.eup %2991 }
 0x3b3   :  { %v631_v6 = vsub.f32 1.0, %v2992_v55  ;;  %v637_v8 = vmul.f32 %v2992_v55, %v367_v36 }
 0x40d   :  { %v622_v56 = vpop.permute.xlu0 %621 }
 0x40e   :  { %v624_v57 = vmul.f32 %v2992_v55, %v622_v56 }
 0x410   :  { %626 = vrot.lane.b32.xlu1 %v624_v57, %s3116_s0 }
 0x414   :  { %460 = vrot.lane.b32.xlu1 %v3325_v58, %s3116_s0 }
 0x482   :  { %v627_v59 = vpop.permute.xlu1 %626 }
 0x483   :  { %v629_v60 = vadd.f32 %v627_v59, %v534_v50 }
 0x485   :  { %2993 = vtanh.f32 %v629_v60 }
 0x486   :  { %v461_v62 = vpop.permute.xlu1 %460 }
 0x487   :  { %v463_v0 = vadd.f32 %v461_v62, %v420_v4 }
 0x489   :  { %v471_v2 = vrot.slane %v463_v0, %v3256_v44 }
 0x48f   :  { %v2994_v61 = vpop.eup %2993 }
 0x490   :  { %633 = vrot.lane.b32.xlu0 %v2994_v61, %s3118_s11 }
 0x494   :  { %434 = vrot.lane.b32.xlu0 %v433_v63, %s3118_s11 }
 0x498   :  { %472 = vrot.lane.b32.xlu0 %v471_v2, %s3119_s16 }
 0x502   :  { %v634_v7 = vpop.permute.xlu0 %633 }
 0x503   :  { %v636_v9 = vmul.f32 %v634_v7, %v631_v6 }
 0x505   :  { %v3342_v10 = vadd.f32 %v637_v8, %v636_v9 }
 0x506   :  { %v435_v12 = vpop.permute.xlu0 %434 }
 0x507   :  { %v437_v13 = vadd.f32 %v435_v12, %v369_v11  ;;  %v3346_v14 = vpack.c.bf16 %v3342_v10, %v3342_v10  ;;  %v447_v26 = vadd.f32 %v445_v24, %v435_v12  ;;  %v719_v24 = vrot.slane %v640_v5, 2 }
 0x509   :  { %v2648_v16 = vmul.f32 -1.442695, %v437_v13  ;;  %812 = vrot.lane.b32.xlu1 %v3346_v14, %s3118_s11  ;;  %v2649_v27 = vmul.f32 -1.442695, %v447_v26 }
 0x50a   :  { %v473_v20 = vpop.permute.xlu0 %472 }
 0x50b   :  { %2995 = vpow2.f32 %v2648_v16 }
 0x50d   :  { %476 = vrot.lane.b32.xlu1 %v369_v11, %s3118_s11 }
 0x511   :  { %882 = vrot.lane.b32.xlu1 %v3240_v31, %s3116_s0 }
 0x515   :  { %v2996_v17 = vpop.eup %2995 }
 0x516   :  { %v441_v18 = vadd.f32 1.0, %v2996_v17 }
 0x518   :  { %2997 = vrcp.f32 %v441_v18 }
 0x519   :  { %2999 = vpow2.f32 %v2649_v27 }
 0x522   :  { %v2998_v19 = vpop.eup %2997 }
 0x523   :  { %v475_v21 = vmul.f32 %v2998_v19, %v473_v20  ;;  %v3000_v28 = vpop.eup %2999  ;;  %v2957_v20 = vld [vmem:[%s3835_s3] sm:$0xff]  }
 0x524   :  { %v451_v29 = vadd.f32 1.0, %v3000_v28 }
 0x525   :  { %481 = vrot.lane.b32.xlu0 %v475_v21, %s3119_s16  ;;  %v2958_v21 = vld [vmem:[%s3835_s3 + $0x8] sm:$0xff]  }
 0x526   :  { %3001 = vrcp.f32 %v451_v29 }
 0x530   :  { %v3002_v35 = vpop.eup %3001 }
 0x531   :  { %v486_v36 = vsub.f32 1.0, %v3002_v35  ;;  %v488_v39 = vmul.f32 0.0, %v3002_v35 }
 0x57b   :  { %v813_v25 = vpop.permute.xlu1 %812 }
 0x57c   :  { %2824 = vmatmul.mubr.msk.bf16.vlgmr.msra.gmra.mrb[4].mxu0 %vm281_vm5, %v813_v25 }
 0x57d   :  { %2839 = vmatprep.mubr.msk.bf16.mxu0 %vm3113_vm0, %v3112_v1  ;;  %2836 = vmatpush3.bf16.msra.mxu0 %v2959_v22 }
 0x57e   :  { %2837 = vmatprep.subr.bf16.mxu0 %v3112_v1 }
 0x57f   :  { %v477_v30 = vpop.permute.xlu1 %476 }
 0x580   :  { %v478_v32 = vrot.slane %v477_v30, 2 }
 0x581   :  { %2838 = vmatpush3.bf16.msra.mxu0 %v2960_v23  ;;  %v2961_v23 = vld [vmem:[%s3835_s3] sm:$0xff]  }
 0x582   :  { %2851 = vmatprep.subr.bf16.mxu0 %v3112_v1 }
 0x583   :  { %v883_v42 = vpop.permute.xlu1 %882 }
 0x597   :  { %v482_v33 = vpop.permute.xlu0 %481 }
 0x598   :  { %v484_v34 = vadd.f32 %v482_v33, %v478_v32 }
 0x59a   :  { %3003 = vtanh.f32 %v484_v34 }
 0x5a4   :  { %v3004_v4 = vpop.eup %3003 }
 0x5a5   :  { %v487_v38 = vmul.f32 %v3004_v4, %v486_v36 }
 0x5a7   :  { %v3365_v40 = vadd.f32 %v488_v39, %v487_v38 }
 0x5a9   :  { %v3369_v41 = vpack.c.bf16 %v3365_v40, %v3365_v40 }
 0x5ab   :  { %2816 = vmatmul.mubr.msk.bf16.vlgmr.msra.gmra.mrb[12].mxu1 %vm281_vm5, %v3369_v41 }
 0x5ac   :  { %2831 = vmatprep.mubr.msk.bf16.mxu1 %vm3113_vm0, %v3112_v1  ;;  %2828 = vmatpush3.bf16.msra.mxu1 %v2957_v20 }
 0x5ad   :  { %2829 = vmatprep.subr.bf16.mxu1 %v3112_v1 }
 0x5b0   :  { %2830 = vmatpush3.bf16.msra.mxu1 %v2958_v21 }
 0x5b1   :  { %2843 = vmatprep.subr.bf16.mxu1 %v3112_v1 }
 0x64f   :  { %v863_v43 = vpop.f32.mrb[4].mxu0 }
 0x650   :  { %v885_v45 = vadd.f32 %v883_v42, %v863_v43  ;;  %v2825_v46 = vpop.f32.mrb[5].mxu0  ;;  %v869_v55 = vadd.f32 %v863_v43, %v807_v54 }
 0x651   :  { %v866_v47 = vpop.f32.mrb[6].mxu0 }
 0x652   :  { %v893_v48 = vrot.slane %v885_v45, %v3256_v44  ;;  %v2826_v49 = vpop.f32.mrb[7].mxu0  ;;  %v2665_v56 = vmul.f32 -1.442695, %v869_v55 }
 0x654   :  { %894 = vrot.lane.b32.xlu0 %v893_v48, %s3116_s0  ;;  %3005 = vpow2.f32 %v2665_v56 }
 0x658   :  { %734 = vrot.lane.b32.xlu0 %v3325_v58, %s3116_s0 }
 0x65e   :  { %v3006_v57 = vpop.eup %3005 }
 0x65f   :  { %v873_v59 = vadd.f32 1.0, %v3006_v57 }
 0x661   :  { %3007 = vrcp.f32 %v873_v59 }
 0x66b   :  { %v3008_v60 = vpop.eup %3007 }
 0x66c   :  { %v904_v27 = vsub.f32 1.0, %v3008_v60  ;;  %v910_v29 = vmul.f32 %v3008_v60, %v3342_v10 }
 0x67e   :  { %v694_v50 = vpop.f32.mrb[12].mxu1 }
 0x67f   :  { %v2817_v51 = vpop.f32.mrb[13].mxu1  ;;  %v707_v0 = vrot.slane %v694_v50, %v3256_v44 }
 0x680   :  { %v697_v52 = vpop.f32.mrb[14].mxu1 }
 0x681   :  { %v2818_v53 = vpop.f32.mrb[15].mxu1 }
 0x6c6   :  { %v895_v61 = vpop.permute.xlu0 %894 }
 0x6c7   :  { %v897_v62 = vmul.f32 %v3008_v60, %v895_v61 }
 0x6c9   :  { %899 = vrot.lane.b32.xlu1 %v897_v62, %s3116_s0 }
 0x6ca   :  { %v735_v63 = vpop.permute.xlu0 %734 }
 0x6cb   :  { %v737_v2 = vadd.f32 %v735_v63, %v694_v50 }
 0x6cd   :  { %v745_v3 = vrot.slane %v737_v2, %v3256_v44  ;;  %708 = vrot.lane.b32.xlu1 %v707_v0, %s3118_s11  ;;  %v913_v2 = vld [vmem:[#allocation2 + $0x14] sm:$0xf] }
 0x6cf   :  { %746 = vrot.lane.b32.xlu0 %v745_v3, %s3119_s16  ;;  %v1080_v3 = vld [vmem:[#allocation2 + $0xc] sm:$0xf] }
 0x6d3   :  { %750 = vrot.lane.b32.xlu0 %v640_v5, %s3118_s11 }
 0x73b   :  { %v900_v6 = vpop.permute.xlu1 %899 }
 0x73c   :  { %v902_v7 = vadd.f32 %v900_v6, %v807_v54 }
 0x73e   :  { %3009 = vtanh.f32 %v902_v7 }
 0x73f   :  { %v709_v8 = vpop.permute.xlu1 %708 }
 0x740   :  { %v711_v9 = vadd.f32 %v709_v8, %v640_v5  ;;  %v721_v25 = vadd.f32 %v719_v24, %v709_v8  ;;  %v2962_v24 = vld [vmem:[%s3835_s3 + $0x8] sm:$0xff]  }
 0x741   :  { %v747_v18 = vpop.permute.xlu0 %746 }
 0x742   :  { %v2659_v11 = vmul.f32 -1.442695, %v711_v9  ;;  %v2660_v26 = vmul.f32 -1.442695, %v721_v25  ;;  %v992_v25 = vrot.slane %v913_v2, 2 }
 0x744   :  { %3011 = vpow2.f32 %v2659_v11 }
 0x745   :  { %v751_v36 = vpop.permute.xlu0 %750 }
 0x746   :  { %v752_v4 = vrot.slane %v751_v36, 2 }
 0x748   :  { %v3010_v12 = vpop.eup %3009 }
 0x749   :  { %906 = vrot.lane.b32.xlu1 %v3010_v12, %s3118_s11 }
 0x74e   :  { %v3012_v13 = vpop.eup %3011 }
 0x74f   :  { %v715_v16 = vadd.f32 1.0, %v3012_v13 }
 0x751   :  { %3013 = vrcp.f32 %v715_v16 }
 0x752   :  { %3015 = vpow2.f32 %v2660_v26 }
 0x75b   :  { %v3014_v17 = vpop.eup %3013 }
 0x75c   :  { %v749_v19 = vmul.f32 %v3014_v17, %v747_v18  ;;  %v3016_v34 = vpop.eup %3015 }
 0x75d   :  { %v725_v35 = vadd.f32 1.0, %v3016_v34 }
 0x75e   :  { %755 = vrot.lane.b32.xlu1 %v749_v19, %s3119_s16 }
 0x75f   :  { %3017 = vrcp.f32 %v725_v35 }
 0x762   :  { %1155 = vrot.lane.b32.xlu1 %v3240_v31, %s3116_s0 }
 0x769   :  { %v3018_v39 = vpop.eup %3017 }
 0x76a   :  { %v760_v42 = vsub.f32 1.0, %v3018_v39  ;;  %v762_v46 = vmul.f32 %v3018_v39, %v3365_v40 }
 0x7bb   :  { %v907_v28 = vpop.permute.xlu1 %906 }
 0x7bc   :  { %v909_v30 = vmul.f32 %v907_v28, %v904_v27 }
 0x7be   :  { %v3406_v32 = vadd.f32 %v910_v29, %v909_v30 }
 0x7c0   :  { %v3410_v33 = vpack.c.bf16 %v3406_v32, %v3406_v32 }
 0x7c2   :  { %1085 = vrot.lane.b32.xlu0 %v3410_v33, %s3118_s11 }
 0x7c6   :  { %1007 = vrot.lane.b32.xlu0 %v3325_v58, %s3116_s0 }
 0x7d0   :  { %v756_v10 = vpop.permute.xlu1 %755 }
 0x7d1   :  { %v758_v38 = vadd.f32 %v756_v10, %v752_v4 }
 0x7d3   :  { %3019 = vtanh.f32 %v758_v38 }
 0x7d4   :  { %v1156_v54 = vpop.permute.xlu1 %1155 }
 0x7dd   :  { %v3020_v43 = vpop.eup %3019 }
 0x7de   :  { %v761_v45 = vmul.f32 %v3020_v43, %v760_v42 }
 0x7e0   :  { %v3417_v47 = vadd.f32 %v762_v46, %v761_v45 }
 0x7e2   :  { %v3421_v48 = vpack.c.bf16 %v3417_v47, %v3417_v47 }
 0x7e4   :  { %2832 = vmatmul.mubr.msk.bf16.vlgmr.msra.gmra.mrb[16].mxu1 %vm281_vm5, %v3421_v48 }
 0x7e5   :  { %2847 = vmatprep.mubr.msk.bf16.mxu1 %vm3113_vm0, %v3112_v1  ;;  %2844 = vmatpush3.bf16.msra.mxu1 %v2961_v23  ;;  %v2966_v23 = vld [vmem:[%s3835_s3 + $0x8] sm:$0xff]  }
 0x7e6   :  { %2845 = vmatprep.subr.bf16.mxu1 %v3112_v1 }
 0x7e9   :  { %2846 = vmatpush3.bf16.msra.mxu1 %v2962_v24  ;;  %v1352_v24 = vld [vmem:[#allocation2 + $0x10] sm:$0xf] }
 0x7ea   :  { %2859 = vmatprep.subr.bf16.mxu1 %v3112_v1 }
 0x834   :  { %v1086_v49 = vpop.permute.xlu0 %1085 }
 0x835   :  { %2840 = vmatmul.mubr.msk.bf16.vlgmr.msra.gmra.mrb[8].mxu0 %vm281_vm5, %v1086_v49 }
 0x836   :  { %2855 = vmatprep.mubr.msk.bf16.mxu0 %vm3113_vm0, %v3112_v1 }
 0x838   :  { %v1008_v55 = vpop.permute.xlu0 %1007 }
 0x8b7   :  { %v967_v50 = vpop.f32.mrb[16].mxu1 }
 0x8b8   :  { %v980_v40 = vrot.slane %v967_v50, %v3256_v44  ;;  %v2833_v51 = vpop.f32.mrb[17].mxu1  ;;  %v1010_v61 = vadd.f32 %v1008_v55, %v967_v50 }
 0x8b9   :  { %v970_v52 = vpop.f32.mrb[18].mxu1 }
 0x8ba   :  { %981 = vrot.lane.b32.xlu0 %v980_v40, %s3118_s11  ;;  %v2834_v53 = vpop.f32.mrb[19].mxu1  ;;  %v1018_v0 = vrot.slane %v1010_v61, %v3256_v44  ;;  %v2964_v40 = vld [vmem:[%s3831_s2 + $0x8] sm:$0xff]  }
 0x908   :  { %v1136_v56 = vpop.f32.mrb[8].mxu0 }
 0x909   :  { %v1158_v57 = vadd.f32 %v1156_v54, %v1136_v56  ;;  %v2841_v59 = vpop.f32.mrb[9].mxu0  ;;  %v1142_v5 = vadd.f32 %v1136_v56, %v1080_v3 }
 0x90a   :  { %v1139_v60 = vpop.f32.mrb[10].mxu0 }
 0x90b   :  { %v1166_v62 = vrot.slane %v1158_v57, %v3256_v44  ;;  %v2842_v63 = vpop.f32.mrb[11].mxu0  ;;  %v2676_v7 = vmul.f32 -1.442695, %v1142_v5 }
 0x90d   :  { %1167 = vrot.lane.b32.xlu1 %v1166_v62, %s3116_s0  ;;  %3021 = vpow2.f32 %v2676_v7 }
 0x911   :  { %1019 = vrot.lane.b32.xlu1 %v1018_v0, %s3119_s16  ;;  %v1186_v0 = vld [vmem:[#allocation2 + $0x10] sm:$0xf] }
 0x915   :  { %1023 = vrot.lane.b32.xlu1 %v913_v2, %s3118_s11 }
 0x917   :  { %v3022_v11 = vpop.eup %3021 }
 0x918   :  { %v1146_v12 = vadd.f32 1.0, %v3022_v11 }
 0x92c   :  { %v982_v6 = vpop.permute.xlu0 %981 }
 0x92d   :  { %v984_v8 = vadd.f32 %v982_v6, %v913_v2  ;;  %v994_v26 = vadd.f32 %v992_v25, %v982_v6 }
 0x92f   :  { %v2670_v9 = vmul.f32 -1.442695, %v984_v8  ;;  %v2671_v27 = vmul.f32 -1.442695, %v994_v26 }
 0x931   :  { %3023 = vpow2.f32 %v2670_v9 }
 0x932   :  { %3025 = vrcp.f32 %v1146_v12 }
 0x93b   :  { %v3024_v13 = vpop.eup %3023 }
 0x93c   :  { %v988_v16 = vadd.f32 1.0, %v3024_v13  ;;  %v3026_v17 = vpop.eup %3025 }
 0x93d   :  { %v1183_v52 = vmul.f32 %v3026_v17, %v3406_v32 }
 0x93e   :  { %3027 = vrcp.f32 %v988_v16 }
 0x93f   :  { %3029 = vpow2.f32 %v2671_v27  ;;  %v1265_v27 = vrot.slane %v1186_v0, 2 }
 0x948   :  { %v3028_v20 = vpop.eup %3027 }
 0x949   :  { %v3030_v28 = vpop.eup %3029 }
 0x94a   :  { %v998_v29 = vadd.f32 1.0, %v3030_v28 }
 0x94c   :  { %3031 = vrcp.f32 %v998_v29 }
 0x956   :  { %v3032_v38 = vpop.eup %3031 }
 0x957   :  { %v1033_v42 = vsub.f32 1.0, %v3032_v38  ;;  %v1035_v46 = vmul.f32 %v3032_v38, %v3417_v47  ;;  %v2963_v47 = vld [vmem:[%s3831_s2] sm:$0xff]  }
 0x958   :  { %2852 = vmatpush3.bf16.msra.mxu0 %v2963_v47 }
 0x959   :  { %2853 = vmatprep.subr.bf16.mxu0 %v3112_v1 }
 0x95c   :  { %2854 = vmatpush3.bf16.msra.mxu0 %v2964_v40 }
 0x95d   :  { %2867 = vmatprep.subr.bf16.mxu0 %v3112_v1 }
 0x97f   :  { %v1168_v18 = vpop.permute.xlu1 %1167 }
 0x980   :  { %v1170_v19 = vmul.f32 %v3026_v17, %v1168_v18 }
 0x982   :  { %1172 = vrot.lane.b32.xlu0 %v1170_v19, %s3116_s0 }
 0x983   :  { %v1020_v21 = vpop.permute.xlu1 %1019 }
 0x984   :  { %v1022_v22 = vmul.f32 %v3028_v20, %v1020_v21 }
 0x986   :  { %1028 = vrot.lane.b32.xlu0 %v1022_v22, %s3119_s16  ;;  %v2965_v22 = vld [vmem:[%s3835_s3] sm:$0xff]  }
 0x987   :  { %v1024_v30 = vpop.permute.xlu1 %1023 }
 0x988   :  { %v1025_v36 = vrot.slane %v1024_v30, 2 }
 0x9f4   :  { %v1173_v34 = vpop.permute.xlu0 %1172 }
 0x9f5   :  { %v1175_v35 = vadd.f32 %v1173_v34, %v1080_v3 }
 0x9f7   :  { %3033 = vtanh.f32 %v1175_v35 }
 0x9f8   :  { %v1029_v4 = vpop.permute.xlu0 %1028 }
 0x9f9   :  { %v1031_v10 = vadd.f32 %v1029_v4, %v1025_v36 }
 0x9fb   :  { %3035 = vtanh.f32 %v1031_v10 }
 0xa01   :  { %v3034_v39 = vpop.eup %3033 }
 0xa02   :  { %1179 = vrot.lane.b32.xlu1 %v3034_v39, %s3118_s11 }
 0xa05   :  { %v3036_v43 = vpop.eup %3035 }
 0xa06   :  { %v1034_v45 = vmul.f32 %v3036_v43, %v1033_v42  ;;  %1280 = vrot.lane.b32.xlu1 %v3325_v58, %s3116_s0 }
 0xa08   :  { %v3451_v49 = vadd.f32 %v1035_v46, %v1034_v45 }
 0xa0a   :  { %v3455_v50 = vpack.c.bf16 %v3451_v49, %v3451_v49  ;;  %1427 = vrot.lane.b32.xlu1 %v3240_v31, %s3116_s0  ;;  %v1177_v31 = vsub.f32 1.0, %v3026_v17 }
 0xa0c   :  { %2848 = vmatmul.mubr.msk.bf16.vlgmr.msra.gmra.mrb[20].mxu1 %vm281_vm5, %v3455_v50 }
 0xa0d   :  { %2863 = vmatprep.mubr.msk.bf16.mxu1 %vm3113_vm0, %v3112_v1  ;;  %2860 = vmatpush3.bf16.msra.mxu1 %v2965_v22 }
 0xa0e   :  { %2861 = vmatprep.subr.bf16.mxu1 %v3112_v1 }
 0xa11   :  { %2862 = vmatpush3.bf16.msra.mxu1 %v2966_v23 }
 0xa12   :  { %2875 = vmatprep.subr.bf16.mxu1 %v3112_v1 }
 0xa74   :  { %v1180_v51 = vpop.permute.xlu1 %1179 }
 0xa75   :  { %v1182_v53 = vmul.f32 %v1180_v51, %v1177_v31 }
 0xa77   :  { %v3472_v54 = vadd.f32 %v1183_v52, %v1182_v53 }
 0xa78   :  { %v1281_v56 = vpop.permute.xlu1 %1280 }
 0xa79   :  { %v3476_v55 = vpack.c.bf16 %v3472_v54, %v3472_v54 }
 0xa7b   :  { %1357 = vrot.lane.b32.xlu0 %v3476_v55, %s3118_s11 }
 0xa7c   :  { %v1428_v9 = vpop.permute.xlu1 %1427 }
 0xadf   :  { %v1240_v57 = vpop.f32.mrb[20].mxu1 }
 0xae0   :  { %v1253_v59 = vrot.slane %v1240_v57, %v3256_v44  ;;  %v1283_v60 = vadd.f32 %v1281_v56, %v1240_v57  ;;  %v2849_v61 = vpop.f32.mrb[21].mxu1 }
 0xae1   :  { %v1243_v62 = vpop.f32.mrb[22].mxu1 }
 0xae2   :  { %1254 = vrot.lane.b32.xlu0 %v1253_v59, %s3118_s11  ;;  %v2850_v32 = vpop.f32.mrb[23].mxu1  ;;  %v1291_v63 = vrot.slane %v1283_v60, %v3256_v44  ;;  %v2968_v60 = vld [vmem:[%s3831_s2 + $0x8] sm:$0xff]  }
 0xae6   :  { %1292 = vrot.lane.b32.xlu0 %v1291_v63, %s3119_s16 }
 0xaea   :  { %1296 = vrot.lane.b32.xlu0 %v1186_v0, %s3118_s11 }
 0xaed   :  { %v1358_v2 = vpop.permute.xlu0 %1357 }
 0xaee   :  { %2856 = vmatmul.mubr.msk.bf16.vlgmr.msra.gmra.mrb[12].mxu0 %vm281_vm5, %v1358_v2 }
 0xaef   :  { %2871 = vmatprep.mubr.msk.bf16.mxu0 %vm3113_vm0, %v3112_v1 }
 0xb54   :  { %v1255_v3 = vpop.permute.xlu0 %1254 }
 0xb55   :  { %v1257_v5 = vadd.f32 %v1255_v3, %v1186_v0  ;;  %v1267_v28 = vadd.f32 %v1265_v27, %v1255_v3 }
 0xb57   :  { %v2681_v6 = vmul.f32 -1.442695, %v1257_v5  ;;  %v2682_v29 = vmul.f32 -1.442695, %v1267_v28 }
 0xb58   :  { %v1293_v20 = vpop.permute.xlu0 %1292 }
 0xb59   :  { %3037 = vpow2.f32 %v2681_v6 }
 0xb5c   :  { %v1297_v10 = vpop.permute.xlu0 %1296 }
 0xb5d   :  { %v1298_v42 = vrot.slane %v1297_v10, 2 }
 0xb63   :  { %v3038_v7 = vpop.eup %3037 }
 0xb64   :  { %v1261_v8 = vadd.f32 1.0, %v3038_v7 }
 0xb66   :  { %3039 = vrcp.f32 %v1261_v8 }
 0xb70   :  { %v3040_v19 = vpop.eup %3039 }
 0xb71   :  { %v1295_v21 = vmul.f32 %v3040_v19, %v1293_v20 }
 0xbc1   :  { %v1408_v11 = vpop.f32.mrb[12].mxu0 }
 0xbc2   :  { %v1430_v12 = vadd.f32 %v1428_v9, %v1408_v11  ;;  %v2857_v13 = vpop.f32.mrb[13].mxu0  ;;  %v1414_v25 = vadd.f32 %v1408_v11, %v1352_v24 }
 0xbc3   :  { %v1411_v16 = vpop.f32.mrb[14].mxu0  ;;  %v3111_v13 = vld [vmem:[%s3833_s5] ss:$0 sm:$0xff] }
 0xbc4   :  { %v1438_v17 = vrot.slane %v1430_v12, %v3256_v44  ;;  %v2858_v18 = vpop.f32.mrb[15].mxu0  ;;  %v2687_v26 = vmul.f32 -1.442695, %v1414_v25  ;;  %v2969_v25 = vld [vmem:[%s3835_s3] sm:$0xff]  }
 0xbc6   :  { %1439 = vrot.lane.b32.xlu1 %v1438_v17, %s3116_s0  ;;  %3041 = vpow2.f32 %v2687_v26  ;;  %v2970_v26 = vld [vmem:[%s3835_s3 + $0x8] sm:$0xff]  }
 0xbc7   :  { %3043 = vpow2.f32 %v2682_v29 }
 0xbca   :  { %1301 = vrot.lane.b32.xlu1 %v1295_v21, %s3119_s16 }
 0xbd0   :  { %v3042_v30 = vpop.eup %3041 }
 0xbd1   :  { %v1418_v34 = vadd.f32 1.0, %v3042_v30  ;;  %v3044_v35 = vpop.eup %3043 }
 0xbd2   :  { %v1271_v36 = vadd.f32 1.0, %v3044_v35 }
 0xbd3   :  { %3045 = vrcp.f32 %v1418_v34 }
 0xbd4   :  { %3047 = vrcp.f32 %v1271_v36 }
 0xbdd   :  { %v3046_v4 = vpop.eup %3045 }
 0xbde   :  { %v3048_v46 = vpop.eup %3047  ;;  %v1449_v0 = vsub.f32 1.0, %v3046_v4  ;;  %v1455_v3 = vmul.f32 %v3046_v4, %v3472_v54  ;;  %v1457_v54 = vld [vmem:[#allocation2 + $0xc] sm:$0xf] }
 0xbdf   :  { %v1306_v47 = vsub.f32 1.0, %v3048_v46  ;;  %v1308_v51 = vmul.f32 %v3048_v46, %v3451_v49  ;;  %v2967_v49 = vld [vmem:[%s3831_s2] sm:$0xff]   ;;  %v1536_v27 = vrot.slane %v1457_v54, 2 }
 0xbe0   :  { %2868 = vmatpush3.bf16.msra.mxu0 %v2967_v49  ;;  %v1621_v49 = vld [vmem:[#allocation2 + $0x14] sm:$0xf] }
 0xbe1   :  { %2869 = vmatprep.subr.bf16.mxu0 %v3112_v1 }
 0xbe4   :  { %2870 = vmatpush3.bf16.msra.mxu0 %v2968_v60 }
 0xbe5   :  { %2883 = vmatprep.subr.bf16.mxu0 %v3112_v1 }
 0xc38   :  { %v1440_v38 = vpop.permute.xlu1 %1439 }
 0xc39   :  { %v1442_v39 = vmul.f32 %v3046_v4, %v1440_v38 }
 0xc3b   :  { %1444 = vrot.lane.b32.xlu0 %v1442_v39, %s3116_s0 }
 0xc3c   :  { %v1302_v43 = vpop.permute.xlu1 %1301 }
 0xc3d   :  { %v1304_v45 = vadd.f32 %v1302_v43, %v1298_v42 }
 0xc3f   :  { %3049 = vtanh.f32 %v1304_v45 }
 0xc49   :  { %v3050_v40 = vpop.eup %3049 }
 0xc4a   :  { %v1307_v31 = vmul.f32 %v3050_v40, %v1306_v47 }
 0xc4c   :  { %v3501_v52 = vadd.f32 %v1308_v51, %v1307_v31 }
 0xc4e   :  { %v3505_v53 = vpack.c.bf16 %v3501_v52, %v3501_v52 }
 0xc50   :  { %2864 = vmatmul.mubr.msk.bf16.vlgmr.msra.gmra.mrb[24].mxu1 %vm281_vm5, %v3505_v53 }
 0xc51   :  { %2879 = vmatprep.mubr.msk.bf16.mxu1 %vm3113_vm0, %v3112_v1  ;;  %2876 = vmatpush3.bf16.msra.mxu1 %v2969_v25 }
 0xc52   :  { %2877 = vmatprep.subr.bf16.mxu1 %v3112_v1 }
 0xc55   :  { %2878 = vmatpush3.bf16.msra.mxu1 %v2970_v26 }
 0xc56   :  { %2891 = vmatprep.subr.bf16.mxu1 %v3112_v1 }
 0xcad   :  { %v1445_v56 = vpop.permute.xlu0 %1444 }
 0xcae   :  { %v1447_v57 = vadd.f32 %v1445_v56, %v1352_v24 }
 0xcb0   :  { %3051 = vtanh.f32 %v1447_v57 }
 0xcba   :  { %v3052_v59 = vpop.eup %3051 }
 0xcbb   :  { %1451 = vrot.lane.b32.xlu1 %v3052_v59, %s3118_s11 }
 0xcbf   :  { %1551 = vrot.lane.b32.xlu1 %v3325_v58, %s3116_s0 }
 0xd23   :  { %v1511_v61 = vpop.f32.mrb[24].mxu1 }
 0xd24   :  { %v2865_v62 = vpop.f32.mrb[25].mxu1  ;;  %v1524_v12 = vrot.slane %v1511_v61, %v3256_v44 }
 0xd25   :  { %v1514_v32 = vpop.f32.mrb[26].mxu1 }
 0xd26   :  { %v2866_v63 = vpop.f32.mrb[27].mxu1 }
 0xd2d   :  { %v1452_v2 = vpop.permute.xlu1 %1451 }
 0xd2e   :  { %v1454_v5 = vmul.f32 %v1452_v2, %v1449_v0 }
 0xd30   :  { %v3523_v6 = vadd.f32 %v1455_v3, %v1454_v5 }
 0xd31   :  { %v1552_v7 = vpop.permute.xlu1 %1551 }
 0xd32   :  { %v1554_v8 = vadd.f32 %v1552_v7, %v1511_v61  ;;  %v3527_v9 = vpack.c.bf16 %v3523_v6, %v3523_v6 }
 0xd34   :  { %v1562_v11 = vrot.slane %v1554_v8, %v3256_v44  ;;  %1626 = vrot.lane.b32.xlu0 %v3527_v9, %s3118_s11 }
 0xd36   :  { %1563 = vrot.lane.b32.xlu1 %v1562_v11, %s3119_s16 }
 0xd38   :  { %1525 = vrot.lane.b32.xlu0 %v1524_v12, %s3118_s11  ;;  %v1726_v12 = vld [vmem:[#allocation2 + $0x8] sm:$0xf] }
 0xd3c   :  { %1567 = vrot.lane.b32.xlu0 %v1457_v54, %s3118_s11 }
 0xd40   :  { %1696 = vrot.lane.b32.xlu0 %v3111_v13, %s3116_s0 }
 0xda6   :  { %v1627_v16 = vpop.permute.xlu0 %1626 }
 0xda7   :  { %2872 = vmatmul.mubr.msk.bf16.vlgmr.msra.gmra.mrb[16].mxu0 %vm281_vm5, %v1627_v16  ;;  %v2971_v16 = vld [vmem:[%s3831_s2] sm:$0xff]  }
 0xda8   :  { %2887 = vmatprep.mubr.msk.bf16.mxu0 %vm3113_vm0, %v3112_v1  ;;  %v1564_v23 = vpop.permute.xlu1 %1563  ;;  %2884 = vmatpush3.bf16.msra.mxu0 %v2971_v16 }
 0xda9   :  { %2885 = vmatprep.subr.bf16.mxu0 %v3112_v1 }
 0xdaa   :  { %v1526_v17 = vpop.permute.xlu0 %1525 }
 0xdab   :  { %v1528_v18 = vadd.f32 %v1526_v17, %v1457_v54  ;;  %v1538_v28 = vadd.f32 %v1536_v27, %v1526_v17 }
 0xdad   :  { %v2692_v19 = vmul.f32 -1.442695, %v1528_v18  ;;  %v2693_v29 = vmul.f32 -1.442695, %v1538_v28 }
 0xdae   :  { %v1568_v35 = vpop.permute.xlu0 %1567 }
 0xdaf   :  { %3053 = vpow2.f32 %v2692_v19  ;;  %v1569_v36 = vrot.slane %v1568_v35, 2 }
 0xdb2   :  { %v1697_v40 = vpop.permute.xlu0 %1696 }
 0xdb9   :  { %v3054_v20 = vpop.eup %3053 }
 0xdba   :  { %v1532_v21 = vadd.f32 1.0, %v3054_v20  ;;  %v3583_v20 = vld [vmem:[%s3833_s5] ss:$0 sm:$0xff] }
 0xdbc   :  { %3055 = vrcp.f32 %v1532_v21 }
 0xdbd   :  { %3057 = vpow2.f32 %v2693_v29 }
 0xdc6   :  { %v3056_v22 = vpop.eup %3055 }
 0xdc7   :  { %v1566_v24 = vmul.f32 %v3056_v22, %v1564_v23  ;;  %v3058_v30 = vpop.eup %3057 }
 0xdc8   :  { %v1542_v34 = vadd.f32 1.0, %v3058_v30 }
 0xdc9   :  { %1572 = vrot.lane.b32.xlu1 %v1566_v24, %s3119_s16 }
 0xdca   :  { %3059 = vrcp.f32 %v1542_v34 }
 0xdd4   :  { %v3060_v38 = vpop.eup %3059 }
 0xdd5   :  { %v1577_v39 = vsub.f32 1.0, %v3060_v38  ;;  %v1579_v45 = vmul.f32 %v3060_v38, %v3501_v52  ;;  %v2973_v38 = vld [vmem:[%s3835_s3] sm:$0xff]  }
 0xe3b   :  { %v1573_v4 = vpop.permute.xlu1 %1572 }
 0xe3c   :  { %v1575_v10 = vadd.f32 %v1573_v4, %v1569_v36 }
 0xe3e   :  { %3061 = vtanh.f32 %v1575_v10 }
 0xe48   :  { %v3062_v42 = vpop.eup %3061 }
 0xe49   :  { %v1578_v43 = vmul.f32 %v3062_v42, %v1577_v39  ;;  %v2974_v39 = vld [vmem:[%s3835_s3 + $0x8] sm:$0xff]   ;;  %v1805_v42 = vrot.slane %v1726_v12, 2 }
 0xe4b   :  { %v3553_v46 = vadd.f32 %v1579_v45, %v1578_v43 }
 0xe4d   :  { %v3557_v47 = vpack.c.bf16 %v3553_v46, %v3553_v46 }
 0xe4f   :  { %2880 = vmatmul.mubr.msk.bf16.vlgmr.msra.gmra.mrb[28].mxu1 %vm281_vm5, %v3557_v47 }
 0xe50   :  { %2895 = vmatprep.mubr.msk.bf16.mxu1 %vm3113_vm0, %v3112_v1  ;;  %2892 = vmatpush3.bf16.msra.mxu1 %v2973_v38 }
 0xe51   :  { %2893 = vmatprep.subr.bf16.mxu1 %v3112_v1 }
 0xe54   :  { %2894 = vmatpush3.bf16.msra.mxu1 %v2974_v39 }
 0xe55   :  { %2907 = vmatprep.subr.bf16.mxu1 %v3112_v1 }
 0xe7a   :  { %v1677_v31 = vpop.f32.mrb[16].mxu0 }
 0xe7b   :  { %v1699_v51 = vadd.f32 %v1697_v40, %v1677_v31  ;;  %v2873_v56 = vpop.f32.mrb[17].mxu0  ;;  %v1683_v60 = vadd.f32 %v1677_v31, %v1621_v49 }
 0xe7c   :  { %v1680_v57 = vpop.f32.mrb[18].mxu0 }
 0xe7d   :  { %v1707_v59 = vrot.slane %v1699_v51, %v3256_v44  ;;  %v2874_v52 = vpop.f32.mrb[19].mxu0  ;;  %v2698_v61 = vmul.f32 -1.442695, %v1683_v60 }
 0xe7f   :  { %1708 = vrot.lane.b32.xlu1 %v1707_v59, %s3116_s0  ;;  %3063 = vpow2.f32 %v2698_v61 }
 0xe89   :  { %v3064_v62 = vpop.eup %3063 }
 0xe8a   :  { %v1687_v32 = vadd.f32 1.0, %v3064_v62 }
 0xe8c   :  { %3065 = vrcp.f32 %v1687_v32 }
 0xe96   :  { %v3066_v63 = vpop.eup %3065 }
 0xe97   :  { %v1718_v18 = vsub.f32 1.0, %v3066_v63  ;;  %v1724_v21 = vmul.f32 %v3066_v63, %v3523_v6 }
 0xef1   :  { %v1709_v0 = vpop.permute.xlu1 %1708 }
 0xef2   :  { %v1711_v2 = vmul.f32 %v3066_v63, %v1709_v0 }
 0xef4   :  { %1713 = vrot.lane.b32.xlu0 %v1711_v2, %s3116_s0 }
 0xef8   :  { %1820 = vrot.lane.b32.xlu0 %v3325_v58, %s3116_s0  ;;  %v2972_v58 = vld [vmem:[%s3831_s2 + $0x8] sm:$0xff]  }
 0xef9   :  { %2886 = vmatpush3.bf16.msra.mxu0 %v2972_v58 }
 0xefa   :  { %2899 = vmatprep.subr.bf16.mxu0 %v3112_v1 }
 0xf22   :  { %v1780_v3 = vpop.f32.mrb[28].mxu1 }
 0xf23   :  { %v1793_v5 = vrot.slane %v1780_v3, %v3256_v44  ;;  %v2881_v7 = vpop.f32.mrb[29].mxu1 }
 0xf24   :  { %v1783_v8 = vpop.f32.mrb[30].mxu1 }
 0xf25   :  { %v2882_v11 = vpop.f32.mrb[31].mxu1  ;;  %1794 = vrot.lane.b32.xlu0 %v1793_v5, %s3118_s11 }
 0xf26   :  { %v2716_v11 = vld [vmem:[%s3836_s6] ss:$0 sm:$0xff] }
 0xf29   :  { %1836 = vrot.lane.b32.xlu0 %v1726_v12, %s3118_s11 }
 0xf2d   :  { %1965 = vrot.lane.b32.xlu0 %v3583_v20, %s3116_s0 }
 0xf66   :  { %v1714_v54 = vpop.permute.xlu0 %1713 }
 0xf67   :  { %v1716_v13 = vadd.f32 %v1714_v54, %v1621_v49 }
 0xf69   :  { %3067 = vtanh.f32 %v1716_v13 }
 0xf6a   :  { %v1821_v23 = vpop.permute.xlu0 %1820 }
 0xf6b   :  { %v1823_v25 = vadd.f32 %v1821_v23, %v1780_v3 }
 0xf6d   :  { %v1831_v27 = vrot.slane %v1823_v25, %v3256_v44 }
 0xf73   :  { %v3068_v17 = vpop.eup %3067 }
 0xf74   :  { %1720 = vrot.lane.b32.xlu1 %v3068_v17, %s3118_s11 }
 0xf97   :  { %v1795_v6 = vpop.permute.xlu0 %1794 }
 0xf98   :  { %v1797_v28 = vadd.f32 %v1795_v6, %v1726_v12  ;;  %v1807_v43 = vadd.f32 %v1805_v42, %v1795_v6  ;;  %v1890_v12 = vld [vmem:[#allocation2 + $0x18] sm:$0xf] }
 0xf9a   :  { %v2703_v29 = vmul.f32 -1.442695, %v1797_v28  ;;  %v2704_v45 = vmul.f32 -1.442695, %v1807_v43 }
 0xf9b   :  { %v1837_v51 = vpop.permute.xlu0 %1836 }
 0xf9c   :  { %3069 = vpow2.f32 %v2703_v29  ;;  %v1838_v56 = vrot.slane %v1837_v51, 2 }
 0xf9f   :  { %v1966_v0 = vpop.permute.xlu0 %1965 }
 0xfa6   :  { %v3070_v30 = vpop.eup %3069 }
 0xfa7   :  { %v1801_v34 = vadd.f32 1.0, %v3070_v30  ;;  %v1995_v30 = vld [vmem:[#allocation2 + $0x4] sm:$0xf] }
 0xfa9   :  { %3071 = vrcp.f32 %v1801_v34 }
 0xfaa   :  { %3073 = vpow2.f32 %v2704_v45 }
 0xfb3   :  { %v3072_v36 = vpop.eup %3071 }
 0xfb4   :  { %v3074_v40 = vpop.eup %3073 }
 0xfb5   :  { %v1811_v31 = vadd.f32 1.0, %v3074_v40 }
 0xfb7   :  { %3075 = vrcp.f32 %v1811_v31 }
 0xfc1   :  { %v3076_v52 = vpop.eup %3075 }
 0xfc2   :  { %v1846_v49 = vsub.f32 1.0, %v3076_v52  ;;  %v1848_v62 = vmul.f32 %v3076_v52, %v3553_v46 }
 0xfe6   :  { %v1721_v19 = vpop.permute.xlu1 %1720 }
 0xfe7   :  { %v1723_v22 = vmul.f32 %v1721_v19, %v1718_v18 }
 0xfe9   :  { %v3588_v24 = vadd.f32 %v1724_v21, %v1723_v22 }
 0xfeb   :  { %v3592_v26 = vpack.c.bf16 %v3588_v24, %v3588_v24 }
 0xfed   :  { %1895 = vrot.lane.b32.xlu1 %v3592_v26, %s3118_s11 }
 0xff1   :  { %1832 = vrot.lane.b32.xlu1 %v1831_v27, %s3119_s16 }
0x105f   :  { %v1896_v35 = vpop.permute.xlu1 %1895 }
0x1060   :  { %2888 = vmatmul.mubr.msk.bf16.vlgmr.msra.gmra.mrb[20].mxu0 %vm281_vm5, %v1896_v35 }
0x1061   :  { %2903 = vmatprep.mubr.msk.bf16.mxu0 %vm3113_vm0, %v3112_v1 }
0x1063   :  { %v1833_v4 = vpop.permute.xlu1 %1832 }
0x1064   :  { %v1835_v10 = vmul.f32 %v3072_v36, %v1833_v4  ;;  %v2975_v36 = vld [vmem:[%s3831_s2] sm:$0xff]  }
0x1065   :  { %2900 = vmatpush3.bf16.msra.mxu0 %v2975_v36 }
0x1066   :  { %1841 = vrot.lane.b32.xlu1 %v1835_v10, %s3119_s16  ;;  %v2976_v10 = vld [vmem:[%s3831_s2 + $0x8] sm:$0xff]   ;;  %2901 = vmatprep.subr.bf16.mxu0 %v3112_v1 }
0x1069   :  { %2902 = vmatpush3.bf16.msra.mxu0 %v2976_v10  ;;  %v2264_v10 = vld [vmem:[#allocation2] sm:$0xf] }
0x106a   :  { %2915 = vmatprep.subr.bf16.mxu0 %v3112_v1 }
0x10d8   :  { %v1842_v57 = vpop.permute.xlu1 %1841 }
0x10d9   :  { %v1844_v59 = vadd.f32 %v1842_v57, %v1838_v56 }
0x10db   :  { %3077 = vtanh.f32 %v1844_v59 }
0x10e5   :  { %v3078_v60 = vpop.eup %3077 }
0x10e6   :  { %v1847_v61 = vmul.f32 %v3078_v60, %v1846_v49  ;;  %v2977_v60 = vld [vmem:[%s3835_s3] sm:$0xff]  }
0x10e8   :  { %v3611_v32 = vadd.f32 %v1848_v62, %v1847_v61  ;;  %v2074_v61 = vrot.slane %v1995_v30, 2 }
0x10ea   :  { %v3615_v63 = vpack.c.bf16 %v3611_v32, %v3611_v32 }
0x10ec   :  { %2896 = vmatmul.mubr.msk.bf16.vlgmr.msra.gmra.mrb[32].mxu1 %vm281_vm5, %v3615_v63 }
0x10ed   :  { %2911 = vmatprep.mubr.msk.bf16.mxu1 %vm3113_vm0, %v3112_v1  ;;  %2908 = vmatpush3.bf16.msra.mxu1 %v2977_v60 }
0x10ee   :  { %2909 = vmatprep.subr.bf16.mxu1 %v3112_v1 }
0x1133   :  { %v1946_v2 = vpop.f32.mrb[20].mxu0 }
0x1134   :  { %v1968_v3 = vadd.f32 %v1966_v0, %v1946_v2  ;;  %v2889_v5 = vpop.f32.mrb[21].mxu0  ;;  %v1952_v54 = vadd.f32 %v1946_v2, %v1890_v12 }
0x1135   :  { %v1949_v7 = vpop.f32.mrb[22].mxu0 }
0x1136   :  { %v1976_v8 = vrot.slane %v1968_v3, %v3256_v44  ;;  %v2890_v46 = vpop.f32.mrb[23].mxu0  ;;  %v2709_v13 = vmul.f32 -1.442695, %v1952_v54 }
0x1138   :  { %1977 = vrot.lane.b32.xlu1 %v1976_v8, %s3116_s0  ;;  %3079 = vpow2.f32 %v2709_v13 }
0x113c   :  { %2089 = vrot.lane.b32.xlu1 %v2716_v11, %s3116_s0 }
0x1142   :  { %v3080_v16 = vpop.eup %3079 }
0x1143   :  { %v1956_v17 = vadd.f32 1.0, %v3080_v16 }
0x1145   :  { %3081 = vrcp.f32 %v1956_v17 }
0x114f   :  { %v3082_v58 = vpop.eup %3081 }
0x1150   :  { %v1987_v45 = vsub.f32 1.0, %v3082_v58  ;;  %v1993_v31 = vmul.f32 %v3082_v58, %v3588_v24  ;;  %v2978_v24 = vld [vmem:[%s3835_s3 + $0x8] sm:$0xff]  }
0x1151   :  { %2910 = vmatpush3.bf16.msra.mxu1 %v2978_v24 }
0x11aa   :  { %v1978_v18 = vpop.permute.xlu1 %1977 }
0x11ab   :  { %v1980_v19 = vmul.f32 %v3082_v58, %v1978_v18 }
0x11ad   :  { %1982 = vrot.lane.b32.xlu0 %v1980_v19, %s3116_s0 }
0x11ae   :  { %v2090_v21 = vpop.permute.xlu1 %2089 }
0x11bf   :  { %v2049_v22 = vpop.f32.mrb[32].mxu1 }
0x11c0   :  { %v2062_v23 = vrot.slane %v2049_v22, %v3256_v44  ;;  %v2092_v25 = vadd.f32 %v2090_v21, %v2049_v22  ;;  %v2897_v27 = vpop.f32.mrb[33].mxu1 }
0x11c1   :  { %v2052_v6 = vpop.f32.mrb[34].mxu1 }
0x11c2   :  { %v2898_v28 = vpop.f32.mrb[35].mxu1  ;;  %2063 = vrot.lane.b32.xlu0 %v2062_v23, %s3118_s11  ;;  %v2100_v29 = vrot.slane %v2092_v25, %v3256_v44 }
0x11c6   :  { %2101 = vrot.lane.b32.xlu0 %v2100_v29, %s3119_s16 }
0x11ca   :  { %2105 = vrot.lane.b32.xlu0 %v1995_v30, %s3118_s11 }
0x11ce   :  { %2234 = vrot.lane.b32.xlu0 %v3583_v20, %s3116_s0 }
0x121f   :  { %v1983_v34 = vpop.permute.xlu0 %1982 }
0x1220   :  { %v1985_v35 = vadd.f32 %v1983_v34, %v1890_v12 }
0x1222   :  { %3083 = vtanh.f32 %v1985_v35 }
0x122c   :  { %v3084_v4 = vpop.eup %3083 }
0x122d   :  { %1989 = vrot.lane.b32.xlu1 %v3084_v4, %s3118_s11 }
0x1234   :  { %v2064_v20 = vpop.permute.xlu0 %2063 }
0x1235   :  { %v2066_v38 = vadd.f32 %v2064_v20, %v1995_v30  ;;  %v2076_v62 = vadd.f32 %v2074_v61, %v2064_v20  ;;  %v2159_v20 = vld [vmem:[#allocation2 + $0x1c] sm:$0xf] }
0x1237   :  { %v2714_v39 = vmul.f32 -1.442695, %v2066_v38  ;;  %v2715_v0 = vmul.f32 -1.442695, %v2076_v62 }
0x1238   :  { %v2102_v52 = vpop.permute.xlu0 %2101 }
0x1239   :  { %3085 = vpow2.f32 %v2714_v39 }
0x123c   :  { %v2106_v5 = vpop.permute.xlu0 %2105 }
0x123d   :  { %v2107_v8 = vrot.slane %v2106_v5, 2 }
0x1240   :  { %v2235_v19 = vpop.permute.xlu0 %2234 }
0x1243   :  { %v3086_v42 = vpop.eup %3085 }
0x1244   :  { %v2070_v43 = vadd.f32 1.0, %v3086_v42 }
0x1246   :  { %3087 = vrcp.f32 %v2070_v43 }
0x1247   :  { %3089 = vpow2.f32 %v2715_v0  ;;  %v498_v0 = vrot.slane %v3312_v37, %v3202_v15  ;;  %v1318_v37 = vrot.slane %v3476_v55, %v3202_v15 }
0x1250   :  { %v3088_v59 = vpop.eup %3087 }
0x1251   :  { %v2104_v49 = vmul.f32 %v3088_v59, %v2102_v52  ;;  %v3090_v2 = vpop.eup %3089 }
0x1252   :  { %v2080_v3 = vadd.f32 1.0, %v3090_v2  ;;  %v505_v2 = vrot.slane %v498_v0, %v3202_v15  ;;  %v2980_v0 = vld [vmem:[%s3837_s7 + $0x8] sm:$0xff]  }
0x1254   :  { %3091 = vrcp.f32 %v2080_v3  ;;  %v772_v3 = vrot.slane %v3346_v14, %v3202_v15  ;;  %v1589_v14 = vrot.slane %v3527_v9, %v3202_v15 }
0x1256   :  { %v779_v5 = vrot.slane %v772_v3, %v3202_v15 }
0x125e   :  { %v3092_v54 = vpop.eup %3091 }
0x125f   :  { %v2117_v17 = vmul.f32 %v3092_v54, %v3611_v32 }
0x129f   :  { %v1990_v40 = vpop.permute.xlu1 %1989 }
0x12a0   :  { %v1992_v51 = vmul.f32 %v1990_v40, %v1987_v45 }
0x12a2   :  { %v3645_v56 = vadd.f32 %v1993_v31, %v1992_v51 }
0x12a4   :  { %v3649_v57 = vpack.c.bf16 %v3645_v56, %v3645_v56 }
0x12a6   :  { %2164 = vrot.lane.b32.xlu1 %v3649_v57, %s3118_s11  ;;  %v2127_v55 = vrot.slane %v3649_v57, %v3202_v15  ;;  %v793_v57 = vrot.slane %v3421_v48, %v3202_v15 }
0x12aa   :  { %2110 = vrot.lane.b32.xlu1 %v2104_v49, %s3119_s16 }
0x12ae   :  { %2358 = vrot.lane.b32.xlu1 %v2716_v11, %s3116_s0  ;;  %v2115_v11 = vsub.f32 1.0, %v3092_v54 }
0x1318   :  { %v2165_v7 = vpop.permute.xlu1 %2164 }
0x1319   :  { %2904 = vmatmul.mubr.msk.bf16.vlgmr.msra.gmra.mrb[24].mxu0 %vm281_vm5, %v2165_v7  ;;  %v1045_v7 = vrot.slane %v3410_v33, %v3202_v15  ;;  %v1858_v33 = vrot.slane %v3592_v26, %v3202_v15 }
0x131a   :  { %2923 = vmatprep.mubr.msk.bf16.mxu0 %vm3113_vm0, %v3112_v1 }
0x131b   :  { %v1865_v54 = vrot.slane %v1858_v33, %v3202_v15 }
0x131c   :  { %v2111_v46 = vpop.permute.xlu1 %2110 }
0x131d   :  { %v2113_v12 = vadd.f32 %v2111_v46, %v2107_v8  ;;  %v1052_v8 = vrot.slane %v1045_v7, %v3202_v15  ;;  %v1325_v46 = vrot.slane %v1318_v37, %v3202_v15 }
0x131f   :  { %3093 = vtanh.f32 %v2113_v12  ;;  %v1596_v12 = vrot.slane %v1589_v14, %v3202_v15  ;;  %v2982_v14 = vld [vmem:[%s3837_s7 + $0x18] sm:$0xff]  }
0x1320   :  { %v2359_v32 = vpop.permute.xlu1 %2358 }
0x1329   :  { %v3094_v13 = vpop.eup %3093 }
0x132a   :  { %v2116_v16 = vmul.f32 %v3094_v13, %v2115_v11  ;;  %v2134_v11 = vrot.slane %v2127_v55, %v3202_v15 }
0x132c   :  { %v3666_v58 = vadd.f32 %v2117_v17, %v2116_v16  ;;  %v519_v16 = vrot.slane %v3369_v41, %v3202_v15 }
0x132e   :  { %v3670_v18 = vpack.c.bf16 %v3666_v58, %v3666_v58  ;;  %v526_v17 = vrot.slane %v519_v16, %v3202_v15 }
0x1330   :  { %2912 = vmatmul.mubr.msk.bf16.vlgmr.msra.gmra.mrb[36].mxu1 %vm281_vm5, %v3670_v18 }
0x13ec   :  { %v2215_v21 = vpop.f32.mrb[24].mxu0 }
0x13ed   :  { %v2237_v22 = vadd.f32 %v2235_v19, %v2215_v21  ;;  %v2905_v23 = vpop.f32.mrb[25].mxu0  ;;  %v2221_v38 = vadd.f32 %v2215_v21, %v2159_v20  ;;  %v800_v19 = vrot.slane %v793_v57, %v3202_v15  ;;  %v1066_v21 = vrot.slane %v3455_v50, %v3202_v15 }
0x13ee   :  { %v2218_v25 = vpop.f32.mrb[26].mxu0 }
0x13ef   :  { %v2245_v27 = vrot.slane %v2237_v22, %v3256_v44  ;;  %v2906_v6 = vpop.f32.mrb[27].mxu0  ;;  %v2720_v39 = vmul.f32 -1.442695, %v2221_v38  ;;  %v2343_v22 = vrot.slane %v2264_v10, 2  ;;  %v1073_v41 = vrot.slane %v1066_v21, %v3202_v15 }
0x13f0   :  { %v1339_v25 = vrot.slane %v3505_v53, %v3202_v15  ;;  %v1609_v6 = vrot.slane %v3557_v47, %v3202_v15 }
0x13f1   :  { %2246 = vrot.lane.b32.xlu0 %v2245_v27, %s3116_s0  ;;  %3095 = vpow2.f32 %v2720_v39 }
0x13f2   :  { %v1346_v48 = vrot.slane %v1339_v25, %v3202_v15  ;;  %v1616_v50 = vrot.slane %v1609_v6, %v3202_v15 }
0x13fb   :  { %v3096_v42 = vpop.eup %3095 }
0x13fc   :  { %v2225_v43 = vadd.f32 1.0, %v3096_v42 }
0x13fe   :  { %3097 = vrcp.f32 %v2225_v43 }
0x1403   :  { %v2318_v28 = vpop.f32.mrb[36].mxu1 }
0x1404   :  { %v2331_v29 = vrot.slane %v2318_v28, %v3256_v44  ;;  %v2361_v30 = vadd.f32 %v2359_v32, %v2318_v28  ;;  %v2913_v34 = vpop.f32.mrb[37].mxu1  ;;  %v1878_v32 = vrot.slane %v3615_v63, %v3202_v15  ;;  %v2147_v28 = vrot.slane %v3670_v18, %v3202_v15 }
0x1405   :  { %v2321_v35 = vpop.f32.mrb[38].mxu1 }
0x1406   :  { %v2369_v36 = vrot.slane %v2361_v30, %v3256_v44  ;;  %2332 = vrot.lane.b32.xlu1 %v2331_v29, %s3118_s11  ;;  %v2914_v4 = vpop.f32.mrb[39].mxu1  ;;  %v1885_v53 = vrot.slane %v1878_v32, %v3202_v15  ;;  %v2154_v29 = vrot.slane %v2147_v28, %v3202_v15 }
0x1408   :  { %2370 = vrot.lane.b32.xlu0 %v2369_v36, %s3119_s16  ;;  %v3681_v45 = vpop.eup %3097 }
0x140c   :  { %2374 = vrot.lane.b32.xlu0 %v2264_v10, %s3118_s11 }
0x1463   :  { %v2247_v40 = vpop.permute.xlu0 %2246 }
0x1464   :  { %v2249_v31 = vmul.f32 %v3681_v45, %v2247_v40 }
0x1466   :  { %2251 = vrot.lane.b32.xlu1 %v2249_v31, %s3116_s0 }
0x1478   :  { %v2333_v51 = vpop.permute.xlu1 %2332 }
0x1479   :  { %v2335_v59 = vadd.f32 %v2333_v51, %v2264_v10  ;;  %v2345_v23 = vadd.f32 %v2343_v22, %v2333_v51 }
0x147a   :  { %v2371_v61 = vpop.permute.xlu0 %2370 }
0x147b   :  { %v2725_v52 = vmul.f32 -1.442695, %v2335_v59  ;;  %v2726_v27 = vmul.f32 -1.442695, %v2345_v23 }
0x147d   :  { %3099 = vpow2.f32 %v2725_v52 }
0x147e   :  { %v2375_v34 = vpop.permute.xlu0 %2374 }
0x147f   :  { %v2376_v35 = vrot.slane %v2375_v34, 2  ;;  %v2728_v34 = vld [vmem:[%s3838_s8] ss:$0 sm:$0xff] }
0x1487   :  { %v3100_v49 = vpop.eup %3099 }
0x1488   :  { %v2339_v60 = vadd.f32 1.0, %v3100_v49 }
0x148a   :  { %3101 = vrcp.f32 %v2339_v60  ;;  %v2256_v60 = vsub.f32 1.0, %v3681_v45 }
0x1494   :  { %v3102_v24 = vpop.eup %3101 }
0x1495   :  { %v2373_v62 = vmul.f32 %v3102_v24, %v2371_v61  ;;  %v2979_v24 = vld [vmem:[%s3837_s7] sm:$0xff]  }
0x1496   :  { %2916 = vmatpush3.bf16.msra.mxu0 %v2979_v24 }
0x1497   :  { %2379 = vrot.lane.b32.xlu1 %v2373_v62, %s3119_s16  ;;  %2917 = vmatprep.subr.bf16.mxu0 %v3112_v1 }
0x149a   :  { %2918 = vmatpush3.bf16.msra.mxu0 %v2980_v0 }
0x149b   :  { %506 = vrot.lane.b32.xlu1 %v505_v2, %s3118_s11  ;;  %2919 = vmatprep.subr.bf16.mxu0 %v3112_v1 }
0x149f   :  { %780 = vrot.lane.b32.xlu1 %v779_v5, %s3118_s11 }
0x14a3   :  { %1053 = vrot.lane.b32.xlu1 %v1052_v8, %s3118_s11 }
0x14a7   :  { %1326 = vrot.lane.b32.xlu1 %v1325_v46, %s3118_s11 }
0x14ab   :  { %1597 = vrot.lane.b32.xlu1 %v1596_v12, %s3118_s11 }
0x14af   :  { %1866 = vrot.lane.b32.xlu1 %v1865_v54, %s3118_s11 }
0x14b3   :  { %2135 = vrot.lane.b32.xlu1 %v2134_v11, %s3118_s11 }
0x14d8   :  { %v2252_v9 = vpop.permute.xlu1 %2251 }
0x14d9   :  { %v2254_v13 = vadd.f32 %v2252_v9, %v2159_v20 }
0x14db   :  { %3103 = vtanh.f32 %v2254_v13 }
0x14dc   :  { %3105 = vpow2.f32 %v2726_v27 }
0x14e5   :  { %v3104_v26 = vpop.eup %3103 }
0x14e6   :  { %2258 = vrot.lane.b32.xlu0 %v3104_v26, %s3118_s11  ;;  %v3106_v47 = vpop.eup %3105 }
0x14e7   :  { %v2349_v30 = vadd.f32 1.0, %v3106_v47 }
0x14e9   :  { %3107 = vrcp.f32 %v2349_v30 }
0x14ea   :  { %527 = vrot.lane.b32.xlu0 %v526_v17, %s3119_s16 }
0x14ee   :  { %801 = vrot.lane.b32.xlu0 %v800_v19, %s3119_s16 }
0x14f2   :  { %1074 = vrot.lane.b32.xlu0 %v1073_v41, %s3119_s16 }
0x14f3   :  { %v3108_v18 = vpop.eup %3107 }
0x14f4   :  { %v2384_v38 = vsub.f32 1.0, %v3108_v18  ;;  %v2386_v43 = vmul.f32 %v3108_v18, %v3666_v58  ;;  %v2262_v58 = vmul.f32 %v3681_v45, %v3645_v56  ;;  %v2981_v56 = vld [vmem:[%s3837_s7 + $0x10] sm:$0xff]  }
0x14f5   :  { %2920 = vmatpush3.bf16.msra.mxu0 %v2981_v56 }
0x14f6   :  { %1347 = vrot.lane.b32.xlu0 %v1346_v48, %s3119_s16  ;;  %2921 = vmatprep.subr.bf16.mxu0 %v3112_v1 }
0x14f9   :  { %2922 = vmatpush3.bf16.msra.mxu0 %v2982_v14 }
0x14fa   :  { %1617 = vrot.lane.b32.xlu0 %v1616_v50, %s3119_s16 }
0x14fe   :  { %1886 = vrot.lane.b32.xlu0 %v1885_v53, %s3119_s16 }
0x1502   :  { %2155 = vrot.lane.b32.xlu0 %v2154_v29, %s3119_s16 }
0x1509   :  { %v2380_v36 = vpop.permute.xlu1 %2379 }
0x150a   :  { %v2382_v63 = vadd.f32 %v2380_v36, %v2376_v35 }
0x150c   :  { %3109 = vtanh.f32 %v2382_v63 }
0x150d   :  { %v507_v4 = vpop.permute.xlu1 %506 }
0x150e   :  { %510 = vst.msk [vmem:[#allocation3] sm:$0x1] %vm509_vm6, %v507_v4 }
0x1511   :  { %v781_v10 = vpop.permute.xlu1 %780 }
0x1512   :  { %784 = vst.msk [vmem:[#allocation3 + $0x1] sm:$0x1] %vm509_vm6, %v781_v10 }
0x1515   :  { %v1054_v20 = vpop.permute.xlu1 %1053 }
0x1516   :  { %v3110_v39 = vpop.eup %3109  ;;  %1057 = vst.msk [vmem:[#allocation3 + $0x2] sm:$0x1] %vm509_vm6, %v1054_v20 }
0x1517   :  { %v2385_v42 = vmul.f32 %v3110_v39, %v2384_v38 }
0x1519   :  { %v1327_v40 = vpop.permute.xlu1 %1326  ;;  %v2387_v31 = vadd.f32 %v2386_v43, %v2385_v42 }
0x151a   :  { %1330 = vst.msk [vmem:[#allocation3 + $0x3] sm:$0x1] %vm509_vm6, %v1327_v40 }
0x151b   :  { %v2408_v51 = vpack.c.bf16 %v2387_v31, %v2387_v31 }
0x151d   :  { %v2416_v59 = vrot.slane %v2408_v51, %v3202_v15  ;;  %v1598_v49 = vpop.permute.xlu1 %1597 }
0x151f   :  { %v2423_v52 = vrot.slane %v2416_v59, %v3202_v15 }
0x1521   :  { %2424 = vrot.lane.b32.xlu0 %v2423_v52, %s3119_s16  ;;  %v1867_v2 = vpop.permute.xlu1 %1866 }
0x1525   :  { %v2136_v37 = vpop.permute.xlu1 %2135 }
0x1558   :  { %v2259_v61 = vpop.permute.xlu0 %2258 }
0x1559   :  { %v2261_v62 = vmul.f32 %v2259_v61, %v2256_v60 }
0x155b   :  { %v2263_v3 = vadd.f32 %v2262_v58, %v2261_v62 }
0x155c   :  { %v528_v5 = vpop.permute.xlu0 %527 }
0x155d   :  { %v2388_v7 = vpack.c.bf16 %v2263_v3, %v2263_v3  ;;  %532 = vst.msk [vmem:[#allocation3 + $0x7] sm:$0x1] %vm531_vm7, %v528_v5 }
0x155f   :  { %v2396_v45 = vrot.slane %v2388_v7, %v3202_v15 }
0x1560   :  { %v802_v8 = vpop.permute.xlu0 %801 }
0x1561   :  { %805 = vst.msk [vmem:[#allocation3 + $0x6] sm:$0x1] %vm531_vm7, %v802_v8  ;;  %v2403_v46 = vrot.slane %v2396_v45, %v3202_v15 }
0x1562   :  { %2138 = vst.msk [vmem:[#allocation3 + $0x6] sm:$0x1] %vm509_vm6, %v2136_v37 }
0x1563   :  { %2404 = vrot.lane.b32.xlu1 %v2403_v46, %s3118_s11 }
0x1564   :  { %v1075_v12 = vpop.permute.xlu0 %1074 }
0x1565   :  { %1078 = vst.msk [vmem:[#allocation3 + $0x5] sm:$0x1] %vm531_vm7, %v1075_v12 }
0x1566   :  { %1869 = vst.msk [vmem:[#allocation3 + $0x5] sm:$0x1] %vm509_vm6, %v1867_v2 }
0x1568   :  { %v1348_v33 = vpop.permute.xlu0 %1347 }
0x1569   :  { %1351 = vst.msk [vmem:[#allocation3 + $0x4] sm:$0x1] %vm531_vm7, %v1348_v33  ;;  %v2434_v25 = vld [vmem:[#allocation3 + $0x6] sm:$0x1] }
0x156a   :  { %1600 = vst.msk [vmem:[#allocation3 + $0x4] sm:$0x1] %vm509_vm6, %v1598_v49 }
0x156c   :  { %v1618_v54 = vpop.permute.xlu0 %1617 }
0x156d   :  { %1620 = vst.msk [vmem:[#allocation3 + $0x3] sm:$0x1] %vm531_vm7, %v1618_v54  ;;  %v2433_v22 = vld [vmem:[#allocation3 + $0x5] sm:$0x1] }
0x1570   :  { %v1887_v55 = vpop.permute.xlu0 %1886 }
0x1571   :  { %1889 = vst.msk [vmem:[#allocation3 + $0x2] sm:$0x1] %vm531_vm7, %v1887_v55  ;;  %v2432_v19 = vld [vmem:[#allocation3 + $0x4] sm:$0x1] }
0x1572   :  { %v2461_v23 = vcombine.low %v2432_v19, %v2433_v22 }
0x1574   :  { %v2156_v1 = vpop.permute.xlu0 %2155  ;;  %v2431_v57 = vld [vmem:[#allocation3 + $0x3] sm:$0x1]  ;;  %v2483_v50 = vrot.slane %v2461_v23, %v3202_v15 }
0x1575   :  { %2158 = vst.msk [vmem:[#allocation3 + $0x1] sm:$0x1] %vm531_vm7, %v2156_v1 }
0x1578   :  { %v2430_v26 = vld [vmem:[#allocation3 + $0x2] sm:$0x1] }
0x1579   :  { %v2460_v21 = vcombine.low %v2430_v26, %v2431_v57 }
0x157b   :  { %v2476_v6 = vrot.slane %v2460_v21, %v3202_v15 }
0x157c   :  { %v2429_v16 = vld [vmem:[#allocation3 + $0x1] sm:$0x1] }
0x1593   :  { %v2425_v11 = vpop.permute.xlu0 %2424 }
0x1594   :  { %2427 = vst.msk [vmem:[#allocation3] sm:$0x1] %vm531_vm7, %v2425_v11 }
0x159b   :  { %v2428_v13 = vld [vmem:[#allocation3] sm:$0x1] }
0x159c   :  { %v2459_v17 = vcombine.low %v2428_v13, %v2429_v16 }
0x159e   :  { %v2469_v41 = vrot.slane %v2459_v17, %v3202_v15 }
0x15a0   :  { %v2491_v53 = vcombine.low %v2469_v41, %v2476_v6 }
0x15a2   :  { %v2499_v29 = vrot.slane %v2491_v53, %v3202_v15 }
0x15d5   :  { %v2405_v9 = vpop.permute.xlu1 %2404 }
0x15d6   :  { %2407 = vst.msk [vmem:[#allocation3 + $0x7] sm:$0x1] %vm509_vm6, %v2405_v9 }
0x15dd   :  { %v2435_v27 = vld [vmem:[#allocation3 + $0x7] sm:$0x1] }
0x15de   :  { %v2462_v48 = vcombine.low %v2434_v25, %v2435_v27 }
0x15e0   :  { %v2490_v32 = vrot.slane %v2462_v48, %v3202_v15 }
0x15e2   :  { %v2492_v28 = vcombine.low %v2483_v50, %v2490_v32 }
0x15e4   :  { %v2506_v47 = vrot.slane %v2492_v28, %v3202_v15 }
0x15e6   :  { %v2507_v30 = vcombine.low %v2499_v29, %v2506_v47 }
0x15e8   :  { %2924 = vmatmul.mubr.msk.bf16.vlgmr.msra.gmra.mrb[28].mxu0 %vm158_vm1, %v2507_v30 }
0x16bb   :  { %v2569_v35 = vpop.f32.mrb[28].mxu0 }
0x16bc   :  { %v2570_v36 = vadd.f32 %v2728_v34, %v2569_v35  ;;  %v2925_v63 = vpop.f32.mrb[29].mxu0 }
0x16bd   :  { %v2572_v4 = vpop.f32.mrb[30].mxu0 }
0x16be   :  { %v2578_v10 = vcombine.high %v2570_v36, %v2570_v36  ;;  %v2585_v18 = vrot.slane %v2570_v36, %v3256_v44  ;;  %v2573_v20 = vadd.f32 %v2728_v34, %v2572_v4  ;;  %v2926_v38 = vpop.f32.mrb[31].mxu0 }
0x16c0   :  { %v2592_v39 = vrot.slane %v2578_v10, %v3256_v44  ;;  %v2593_v15 = vcombine.high %v2585_v18, %v2585_v18  ;;  %2621 = vst.msk [vmem:[%s3839_s9] sm:$0x3] %vm2620_vm8, %v2585_v18  ;;  %v2595_v42 = vcombine.high %v2573_v20, %v2573_v20  ;;  %v2602_v43 = vrot.slane %v2573_v20, %v3256_v44 }
0x16c2   :  { %v2594_v40 = vcombine.high %v2592_v39, %v2592_v39  ;;  %2622 = vst.msk [vmem:[%s3839_s9 + $0x2] sm:$0x3] %vm2620_vm8, %v2593_v15  ;;  %2623 = vst.msk [vmem:[%s3839_s9 + $0x4] sm:$0x3] %vm2620_vm8, %v2592_v39  ;;  %v2609_v31 = vrot.slane %v2595_v42, %v3256_v44  ;;  %v2610_v51 = vcombine.high %v2602_v43, %v2602_v43 }
0x16c3   :  { %2625 = vst.msk [vmem:[%s3839_s9 + $0x8] sm:$0x3] %vm2620_vm8, %v2602_v43 }
0x16c4   :  { %2624 = vst.msk [vmem:[%s3839_s9 + $0x6] sm:$0x3] %vm2620_vm8, %v2594_v40  ;;  %v2611_v59 = vcombine.high %v2609_v31, %v2609_v31  ;;  %2626 = vst.msk [vmem:[%s3839_s9 + $0xa] sm:$0x3] %vm2620_vm8, %v2610_v51 }
0x16c5   :  { %2627 = vst.msk [vmem:[%s3839_s9 + $0xc] sm:$0x3] %vm2620_vm8, %v2609_v31 }
0x16c6   :  { %2628 = vst.msk [vmem:[%s3839_s9 + $0xe] sm:$0x3] %vm2620_vm8, %v2611_v59 }

</bundles_post_ra>
